<compile_context>
chip_gen: v7x
topology: tpu7x:2x2x1
jax: 0.10.0
libtpu: 0.0.40
codegen_flags: <defaults>
</compile_context>

<pallas_src>
import math
from functools import lru_cache

import jax
import jax.numpy as jnp
from jax import lax
from jax.experimental import pallas as pl
from jax.experimental.pallas import tpu as pltpu


# -----------------------------------------------------------------------------
# Kernel 1a: GroupNorm statistics sweep -> per-channel (scale, bias)
# grid = (B, num_row_tiles); row axis is the reduction ("arbitrary") axis.
# -----------------------------------------------------------------------------
def gn_stats_kernel(x_ref, gmat_ref, gamma_ref, beta_ref, scale_ref, bias_ref):
    r = pl.program_id(1)

    @pl.when(r == 0)
    def _():
        scale_ref[0] = jnp.zeros_like(scale_ref[0])
        bias_ref[0] = jnp.zeros_like(bias_ref[0])

    x = x_ref[0]                                            # (TR, C) f32
    scale_ref[0] += jnp.sum(x, axis=0, keepdims=True)       # running sum(x)
    bias_ref[0] += jnp.sum(x * x, axis=0, keepdims=True)    # running sum(x^2)

    @pl.when(r == pl.num_programs(1) - 1)
    def _():
        s1 = scale_ref[0]                                   # (1, C)
        s2 = bias_ref[0]
        # gmat[i, j] = 1/(HW*group_size) if channels i, j share a group else 0,
        # so (per-channel sums) @ gmat broadcasts the group mean back to channels.
        mean = jnp.dot(s1, gmat_ref[...], preferred_element_type=jnp.float32)
        ex2 = jnp.dot(s2, gmat_ref[...], preferred_element_type=jnp.float32)
        var = jnp.maximum(ex2 - mean * mean, 0.0)
        inv = lax.rsqrt(var + jnp.float32(1e-5))
        sc = gamma_ref[...] * inv                           # fold gamma into scale
        scale_ref[0] = sc
        bias_ref[0] = beta_ref[...] - mean * sc


# -----------------------------------------------------------------------------
# Kernel 1b: GN apply + fused QKV projection (row-tiled), one bf16 (TR, 3C) out
# -----------------------------------------------------------------------------
def gn_qkv_kernel(x_ref, scale_ref, bias_ref, wqkv_ref, bqkv_ref, qkv_ref):
    h = x_ref[0] * scale_ref[0] + bias_ref[0]               # (TR, C) f32
    # one bf16 (TR, C) @ (C, 3C) MXU pass; 1/sqrt(C) pre-folded into q columns
    qkv = jnp.dot(h.astype(jnp.bfloat16), wqkv_ref[...],
                  preferred_element_type=jnp.float32) + bqkv_ref[...]
    qkv_ref[0] = qkv.astype(jnp.bfloat16)


# -----------------------------------------------------------------------------
# Kernel 2a: single-pass attention (nk = 1) + output projection + residual
# grid = (B, num_q_tiles); no online-softmax machinery, K/V streamed once.
# -----------------------------------------------------------------------------
def attn_single_pass_kernel(q_ref, k_ref, v_ref, x_ref, wp_ref, bp_ref, o_ref):
    q = q_ref[0]                                            # (TQ, C) bf16, scale folded
    k = k_ref[0]                                            # (HW, C) bf16
    s = lax.dot_general(q, k, (((1,), (1,)), ((), ())),
                        preferred_element_type=jnp.float32)  # (TQ, HW) f32
    m = jnp.max(s, axis=-1, keepdims=True)
    p = jnp.exp(s - m)
    l = jnp.sum(p, axis=-1, keepdims=True)
    a = jnp.dot(p.astype(jnp.bfloat16), v_ref[0],
                preferred_element_type=jnp.float32)          # (TQ, C) f32
    a = a * pl.reciprocal(l, approx=True)                    # deferred normalization
    out = jnp.dot(a.astype(jnp.bfloat16), wp_ref[...],
                  preferred_element_type=jnp.float32) + bp_ref[...]
    o_ref[0] = x_ref[0] + out                                # f32 residual add


# -----------------------------------------------------------------------------
# Kernel 2b: flash-style attention fallback for very large HW (nk > 1)
# grid = (B, num_q_tiles, num_k_tiles); k-tile axis is the reduction axis.
# -----------------------------------------------------------------------------
def flash_attn_proj_kernel(q_ref, k_ref, v_ref, x_ref, wp_ref, bp_ref,
                           o_ref, m_sc, l_sc, acc_sc):
    ki = pl.program_id(2)

    @pl.when(ki == 0)
    def _():
        m_sc[...] = jnp.full_like(m_sc, -jnp.inf)
        l_sc[...] = jnp.zeros_like(l_sc)
        acc_sc[...] = jnp.zeros_like(acc_sc)

    q = q_ref[0]                                            # (TQ, C) bf16
    k = k_ref[0]                                            # (TK, C) bf16
    s = lax.dot_general(q, k, (((1,), (1,)), ((), ())),
                        preferred_element_type=jnp.float32)  # (TQ, TK) f32

    m_prev = m_sc[...]
    m_new = jnp.maximum(m_prev, jnp.max(s, axis=-1, keepdims=True))
    alpha = jnp.exp(m_prev - m_new)
    p = jnp.exp(s - m_new)
    l_sc[...] = alpha * l_sc[...] + jnp.sum(p, axis=-1, keepdims=True)
    acc_sc[...] = alpha * acc_sc[...] + jnp.dot(
        p.astype(jnp.bfloat16), v_ref[0], preferred_element_type=jnp.float32)
    m_sc[...] = m_new

    @pl.when(ki == pl.num_programs(2) - 1)
    def _():
        a = acc_sc[...] * pl.reciprocal(l_sc[...], approx=True)
        out = jnp.dot(a.astype(jnp.bfloat16), wp_ref[...],
                      preferred_element_type=jnp.float32) + bp_ref[...]
        o_ref[0] = x_ref[0] + out


# -----------------------------------------------------------------------------
# VMEM budget (generation-aware) and tile policy
# -----------------------------------------------------------------------------
@lru_cache(maxsize=1)
def _vmem_cap_bytes():
    try:
        return int(pltpu.get_tpu_info().vmem_capacity_bytes)
    except Exception:
        return 64 * 2 ** 20          # conservative fallback = smallest (v7x)


def _vmem_budget_bytes():
    return max(32 * 2 ** 20, _vmem_cap_bytes() - 8 * 2 ** 20)


def _clamp_limit(est, budget):
    return int(min(budget, max(32 * 2 ** 20, int(1.25 * est))))


def _row_tiles(hw, cap):
    if hw % 128 == 0:
        align = 128
    elif hw % 8 == 0:
        align = 8
    else:
        return [hw]
    cands = [t for t in range(align, min(hw, cap) + 1, align) if hw % t == 0]
    return sorted(set(cands), reverse=True) if cands else [hw]


def _stats_est(tr, c):
    return 2 * tr * c * 4 + 2 * tr * c * 4 + c * c * 4 + 16 * c * 4


def _qkv_est(tr, c):
    return (2 * tr * c * 4
            + 2 * (c * 3 * c * 2 + 3 * c * 4 + 4 * c * 4)
            + tr * c * 4 + tr * 3 * c * 4 + tr * 3 * c * 2
            + 2 * tr * 3 * c * 2)


def _attn_single_est(tq, hw, c):
    return (2 * (tq * c * 2 + 2 * hw * c * 2 + tq * c * 4 + c * c * 2 + 3 * c * 4)
            + 2 * tq * hw * 4 + tq * hw * 2
            + 2 * tq * c * 4
            + 2 * tq * c * 4)


def _attn_flash_est(tq, tk, c):
    return (2 * (tq * c * 2 + 2 * tk * c * 2 + tq * c * 4 + c * c * 2 + 3 * c * 4)
            + 2 * tq * tk * 4 + tq * tk * 2
            + tq * c * 4 + 2 * tq * 4
            + 2 * tq * c * 4
            + 2 * tq * c * 4)


def _pick_row_tile(hw, c, budget):
    cands = _row_tiles(hw, cap=2048)
    for tr in cands:
        if max(_stats_est(tr, c), _qkv_est(tr, c)) <= budget:
            return tr
    return cands[-1]


def _pick_attn_tiles(hw, c, budget):
    q_cands = _row_tiles(hw, cap=1024)
    # Prefer single-pass (TK = HW) with the largest q tile that fits VMEM.
    for tq in q_cands:
        if _attn_single_est(tq, hw, c) <= budget:
            return tq, hw, True
    # Flash fallback for very large HW: largest (TQ, TK) that fits.
    for tq in q_cands:
        for tk in q_cands:
            if _attn_flash_est(tq, tk, c) <= budget:
                return tq, tk, False
    t = q_cands[-1]
    return t, t, False


# -----------------------------------------------------------------------------
# Wrapper
# -----------------------------------------------------------------------------
def _attn_block_impl(x_nchw, params):
    B, C, H, W = x_nchw.shape
    HW = H * W
    x = jnp.transpose(x_nchw, (0, 2, 3, 1)).reshape(B, HW, C).astype(jnp.float32)

    gmat, gamma, beta = params["gmat"], params["gamma"], params["beta"]
    wqkv, bqkv = params["wqkv"], params["bqkv"]
    wp, bp = params["wp"], params["bp"]

    budget = _vmem_budget_bytes()
    TR = _pick_row_tile(HW, C, budget)
    nr = HW // TR

    # ---- 1a) GroupNorm statistics -> per-channel (scale, bias) -------------
    scale, bias = pl.pallas_call(
        gn_stats_kernel,
        out_shape=(jax.ShapeDtypeStruct((B, 1, C), jnp.float32),
                   jax.ShapeDtypeStruct((B, 1, C), jnp.float32)),
        grid=(B, nr),
        in_specs=[
            pl.BlockSpec((1, TR, C), lambda b, r: (b, r, 0)),   # x rows
            pl.BlockSpec((C, C), lambda b, r: (0, 0)),          # group matrix
            pl.BlockSpec((1, C), lambda b, r: (0, 0)),          # gamma
            pl.BlockSpec((1, C), lambda b, r: (0, 0)),          # beta
        ],
        out_specs=(
            pl.BlockSpec((1, 1, C), lambda b, r: (b, 0, 0)),
            pl.BlockSpec((1, 1, C), lambda b, r: (b, 0, 0)),
        ),
        compiler_params=pltpu.CompilerParams(
            dimension_semantics=("parallel", "arbitrary"),
            vmem_limit_bytes=_clamp_limit(_stats_est(TR, C), budget)),
    )(x, gmat, gamma, beta)

    # ---- 1b) GN apply + fused QKV -> one (B, HW, 3C) bf16 slab -------------
    qkv = pl.pallas_call(
        gn_qkv_kernel,
        out_shape=jax.ShapeDtypeStruct((B, HW, 3 * C), jnp.bfloat16),
        grid=(B, nr),
        in_specs=[
            pl.BlockSpec((1, TR, C), lambda b, r: (b, r, 0)),   # x rows
            pl.BlockSpec((1, 1, C), lambda b, r: (b, 0, 0)),    # scale
            pl.BlockSpec((1, 1, C), lambda b, r: (b, 0, 0)),    # bias
            pl.BlockSpec((C, 3 * C), lambda b, r: (0, 0)),      # fused wqkv (bf16)
            pl.BlockSpec((1, 3 * C), lambda b, r: (0, 0)),      # fused bqkv (f32)
        ],
        out_specs=pl.BlockSpec((1, TR, 3 * C), lambda b, r: (b, r, 0)),
        compiler_params=pltpu.CompilerParams(
            dimension_semantics=("parallel", "parallel"),
            vmem_limit_bytes=_clamp_limit(_qkv_est(TR, C), budget)),
    )(x, scale, bias, wqkv, bqkv)

    # ---- 2) attention + output projection + residual -----------------------
    TQ, TK, single_pass = _pick_attn_tiles(HW, C, budget)
    nq = HW // TQ

    if single_pass:
        out = pl.pallas_call(
            attn_single_pass_kernel,
            out_shape=jax.ShapeDtypeStruct((B, HW, C), jnp.float32),
            grid=(B, nq),
            in_specs=[
                pl.BlockSpec((1, TQ, C), lambda b, qi: (b, qi, 0)),  # q cols
                pl.BlockSpec((1, HW, C), lambda b, qi: (b, 0, 1)),   # k cols
                pl.BlockSpec((1, HW, C), lambda b, qi: (b, 0, 2)),   # v cols
                pl.BlockSpec((1, TQ, C), lambda b, qi: (b, qi, 0)),  # x (residual)
                pl.BlockSpec((C, C), lambda b, qi: (0, 0)),          # wp (bf16)
                pl.BlockSpec((1, C), lambda b, qi: (0, 0)),          # bp (f32)
            ],
            out_specs=pl.BlockSpec((1, TQ, C), lambda b, qi: (b, qi, 0)),
            input_output_aliases={3: 0},        # reuse x's HBM buffer for output
            compiler_params=pltpu.CompilerParams(
                dimension_semantics=("parallel", "parallel"),
                vmem_limit_bytes=_clamp_limit(_attn_single_est(TQ, HW, C), budget)),
        )(qkv, qkv, qkv, x, wp, bp)
    else:
        nk = HW // TK
        out = pl.pallas_call(
            flash_attn_proj_kernel,
            out_shape=jax.ShapeDtypeStruct((B, HW, C), jnp.float32),
            grid=(B, nq, nk),
            in_specs=[
                pl.BlockSpec((1, TQ, C), lambda b, qi, ki: (b, qi, 0)),
                pl.BlockSpec((1, TK, C), lambda b, qi, ki: (b, ki, 1)),
                pl.BlockSpec((1, TK, C), lambda b, qi, ki: (b, ki, 2)),
                pl.BlockSpec((1, TQ, C), lambda b, qi, ki: (b, qi, 0)),
                pl.BlockSpec((C, C), lambda b, qi, ki: (0, 0)),
                pl.BlockSpec((1, C), lambda b, qi, ki: (0, 0)),
            ],
            out_specs=pl.BlockSpec((1, TQ, C), lambda b, qi, ki: (b, qi, 0)),
            scratch_shapes=[
                pltpu.VMEM((TQ, 1), jnp.float32),   # running row max
                pltpu.VMEM((TQ, 1), jnp.float32),   # running row sum
                pltpu.VMEM((TQ, C), jnp.float32),   # output accumulator
            ],
            input_output_aliases={3: 0},
            compiler_params=pltpu.CompilerParams(
                dimension_semantics=("parallel", "parallel", "arbitrary"),
                vmem_limit_bytes=_clamp_limit(_attn_flash_est(TQ, TK, C), budget)),
        )(qkv, qkv, qkv, x, wp, bp)

    return jnp.transpose(out.reshape(B, H, W, C), (0, 3, 1, 2))


attn_block = jax.jit(_attn_block_impl)


# -----------------------------------------------------------------------------
# Parameters (mirror AttnBlock.initialize()) and pure-JAX reference
# -----------------------------------------------------------------------------
def make_params(key, C, HW, num_groups=32, proj_gain=1e-5):
    """xavier_uniform conv weights, zero biases, GroupNorm affine = (1, 0).
    The C**-0.5 attention scale is folded into the q projection; wq/wk/wv are
    fused into one (C, 3C) bf16 weight (stored as (C_in, C_out))."""
    assert C % num_groups == 0
    gs = C // num_groups
    gid = jnp.arange(C) // gs
    gmat = (gid[:, None] == gid[None, :]).astype(jnp.float32) / float(HW * gs)

    gamma = jnp.ones((1, C), jnp.float32)
    beta = jnp.zeros((1, C), jnp.float32)

    def xavier_uniform(k, gain=1.0):
        bound = gain * math.sqrt(6.0 / (C + C))   # Conv2d(C, C, 1): fan_in = fan_out = C
        return jax.random.uniform(k, (C, C), jnp.float32, -bound, bound).T

    kq, kk, kv, kp = jax.random.split(key, 4)
    scale = float(C) ** (-0.5)
    wq = xavier_uniform(kq) * scale
    wk = xavier_uniform(kk)
    wv = xavier_uniform(kv)
    wp = xavier_uniform(kp, gain=proj_gain)
    bq = jnp.zeros((1, C), jnp.float32) * scale
    bk = jnp.zeros((1, C), jnp.float32)
    bv = jnp.zeros((1, C), jnp.float32)

    return dict(
        gmat=gmat, gamma=gamma, beta=beta,
        wqkv=jnp.concatenate([wq, wk, wv], axis=1).astype(jnp.bfloat16),
        bqkv=jnp.concatenate([bq, bk, bv], axis=1),
        wp=wp.astype(jnp.bfloat16),
        bp=jnp.zeros((1, C), jnp.float32),
    )


def attn_block_ref(x_nchw, params, num_groups=32):
    """Pure-JAX reference of AttnBlock.forward using the same stored params."""
    B, C, H, W = x_nchw.shape
    HW = H * W
    gs = C // num_groups
    x = jnp.transpose(x_nchw, (0, 2, 3, 1)).reshape(B, HW, C)
    xg = x.reshape(B, HW, num_groups, gs)
    mean = jnp.mean(xg, axis=(1, 3), keepdims=True)
    var = jnp.mean((xg - mean) ** 2, axis=(1, 3), keepdims=True)
    h = ((xg - mean) * lax.rsqrt(var + 1e-5)).reshape(B, HW, C)
    h = h * params["gamma"][None] + params["beta"][None]
    qkv = h @ params["wqkv"].astype(jnp.float32) + params["bqkv"]
    q, k, v = qkv[..., :C], qkv[..., C:2 * C], qkv[..., 2 * C:]
    w = jnp.einsum("bqc,bkc->bqk", q, k)          # scale already folded into q
    w = jax.nn.softmax(w, axis=-1)
    a = jnp.einsum("bqk,bkc->bqc", w, v)
    out = a @ params["wp"].astype(jnp.float32) + params["bp"]
    y = x + out
    return jnp.transpose(y.reshape(B, H, W, C), (0, 3, 1, 2))


if __name__ == "__main__":
    B, C, H, W = 2, 128, 16, 16       # GroupNorm(32, C) needs C % 32 == 0; C=128 is lane-dense
    key = jax.random.PRNGKey(0)
    kx, kp = jax.random.split(key)
    x = jax.random.normal(kx, (B, C, H, W), jnp.float32)

    # 1) Faithful init (proj gain = 1e-5, as in the PyTorch module).
    params = make_params(kp, C, H * W)
    y = jax.block_until_ready(attn_block(x, params))
    y_ref = attn_block_ref(x, params)
    assert y.shape == (B, C, H, W)
    assert bool(jnp.all(jnp.isfinite(y)))
    assert jnp.allclose(y, y_ref, rtol=2e-3, atol=2e-3), (
        float(jnp.max(jnp.abs(y - y_ref))))

    # 2) Stress init (proj gain = 1.0) so the attention path contributes
    #    significantly; compare with a bf16-appropriate relative-L2 tolerance.
    params_s = make_params(kp, C, H * W, proj_gain=1.0)
    y_s = jax.block_until_ready(attn_block(x, params_s))
    y_s_ref = attn_block_ref(x, params_s)
    rel = float(jnp.linalg.norm(y_s - y_s_ref) / jnp.linalg.norm(y_s_ref))
    assert rel < 5e-2, rel

    print("KERNEL_OK")
</pallas_src>

<mosaic_0001>
module attributes {stable_mosaic.version = 11 : i64} {
  func.func @attn_single_pass_kernel(%arg0: i32, %arg1: i32, %arg2: memref<1x256x128xbf16, #tpu.memory_space<vmem>>, %arg3: memref<1x256x128xbf16, #tpu.memory_space<vmem>>, %arg4: memref<1x256x128xbf16, #tpu.memory_space<vmem>>, %arg5: memref<1x256x128xf32, #tpu.memory_space<vmem>>, %arg6: memref<128x128xbf16, #tpu.memory_space<vmem>>, %arg7: memref<1x128xf32, #tpu.memory_space<vmem>>, %arg8: memref<1x256x128xf32, #tpu.memory_space<vmem>>) attributes {dimension_semantics = [#tpu.dimension_semantics<parallel>, #tpu.dimension_semantics<parallel>], iteration_bounds = array<i64: 2, 1>, scalar_prefetch = 0 : i64, scratch_operands = 0 : i64, tpu.core_type = #tpu.core_type<tc>, window_params = [{transform_indices = @transform_0, window_bounds = array<i64: 1, 256, 128>}, {transform_indices = @transform_1, window_bounds = array<i64: 1, 256, 128>}, {transform_indices = @transform_2, window_bounds = array<i64: 1, 256, 128>}, {transform_indices = @transform_3, window_bounds = array<i64: 1, 256, 128>}, {pipeline_mode = #tpu.pipeline_mode<synchronous>, transform_indices = @transform_4, window_bounds = array<i64: 128, 128>}, {pipeline_mode = #tpu.pipeline_mode<synchronous>, transform_indices = @transform_5, window_bounds = array<i64: 1, 128>}, {transform_indices = @transform_6, window_bounds = array<i64: 1, 256, 128>}]} {
    %c0 = arith.constant 0 : index
    %c0_0 = arith.constant 0 : index
    %c0_1 = arith.constant 0 : index
    %0 = vector.load %arg2[%c0, %c0_0, %c0_1] : memref<1x256x128xbf16, #tpu.memory_space<vmem>>, vector<1x256x128xbf16>
    %1 = vector.shape_cast %0 : vector<1x256x128xbf16> to vector<256x128xbf16>
    %c0_2 = arith.constant 0 : index
    %c0_3 = arith.constant 0 : index
    %c0_4 = arith.constant 0 : index
    %2 = vector.load %arg3[%c0_2, %c0_3, %c0_4] : memref<1x256x128xbf16, #tpu.memory_space<vmem>>, vector<1x256x128xbf16>
    %3 = vector.shape_cast %2 : vector<1x256x128xbf16> to vector<256x128xbf16>
    %cst = arith.constant dense<0.000000e+00> : vector<256x256xf32>
    %4 = tpu.matmul %1, %3, %cst {dimension_numbers = #tpu.dot_dimension_numbers<[1], [1], [0], [0], [0, 0, 1, 0], [], []>} : vector<256x128xbf16>, vector<256x128xbf16>, vector<256x256xf32> -> vector<256x256xf32>
    %cst_5 = arith.constant dense<0xFF800000> : vector<256xf32>
    %5 = vector.multi_reduction <maximumf>, %4, %cst_5 [1] : vector<256x256xf32> to vector<256xf32>
    %6 = vector.shape_cast %5 : vector<256xf32> to vector<256x1xf32>
    %7 = vector.broadcast %6 : vector<256x1xf32> to vector<256x256xf32>
    %8 = arith.subf %4, %7 : vector<256x256xf32>
    %9 = math.exp %8 : vector<256x256xf32>
    %cst_6 = arith.constant dense<0.000000e+00> : vector<256xf32>
    %10 = vector.multi_reduction <add>, %9, %cst_6 [1] : vector<256x256xf32> to vector<256xf32>
    %11 = vector.shape_cast %10 : vector<256xf32> to vector<256x1xf32>
    %12 = arith.truncf %9 : vector<256x256xf32> to vector<256x256xbf16>
    %c0_7 = arith.constant 0 : index
    %c0_8 = arith.constant 0 : index
    %c0_9 = arith.constant 0 : index
    %13 = vector.load %arg4[%c0_7, %c0_8, %c0_9] : memref<1x256x128xbf16, #tpu.memory_space<vmem>>, vector<1x256x128xbf16>
    %14 = vector.shape_cast %13 : vector<1x256x128xbf16> to vector<256x128xbf16>
    %cst_10 = arith.constant dense<0.000000e+00> : vector<256x128xf32>
    %15 = tpu.matmul %12, %14, %cst_10 {dimension_numbers = #tpu.dot_dimension_numbers<[1], [0], [0], [1], [0, 0, 1, 1], [], []>} : vector<256x256xbf16>, vector<256x128xbf16>, vector<256x128xf32> -> vector<256x128xf32>
    %16 = tpu.reciprocal %11 {approx = true} : vector<256x1xf32> -> vector<256x1xf32>
    %17 = vector.broadcast %16 : vector<256x1xf32> to vector<256x128xf32>
    %18 = arith.mulf %15, %17 : vector<256x128xf32>
    %19 = arith.truncf %18 : vector<256x128xf32> to vector<256x128xbf16>
    %c0_11 = arith.constant 0 : index
    %c0_12 = arith.constant 0 : index
    %20 = vector.load %arg6[%c0_11, %c0_12] : memref<128x128xbf16, #tpu.memory_space<vmem>>, vector<128x128xbf16>
    %cst_13 = arith.constant dense<0.000000e+00> : vector<256x128xf32>
    %21 = tpu.matmul %19, %20, %cst_13 {dimension_numbers = #tpu.dot_dimension_numbers<[1], [0], [0], [1], [0, 0, 1, 1], [], []>} : vector<256x128xbf16>, vector<128x128xbf16>, vector<256x128xf32> -> vector<256x128xf32>
    %c0_14 = arith.constant 0 : index
    %c0_15 = arith.constant 0 : index
    %22 = vector.load %arg7[%c0_14, %c0_15] : memref<1x128xf32, #tpu.memory_space<vmem>>, vector<1x128xf32>
    %23 = vector.broadcast %22 : vector<1x128xf32> to vector<256x128xf32>
    %24 = arith.addf %21, %23 : vector<256x128xf32>
    %c0_16 = arith.constant 0 : index
    %c0_17 = arith.constant 0 : index
    %c0_18 = arith.constant 0 : index
    %25 = vector.load %arg5[%c0_16, %c0_17, %c0_18] : memref<1x256x128xf32, #tpu.memory_space<vmem>>, vector<1x256x128xf32>
    %26 = vector.shape_cast %25 : vector<1x256x128xf32> to vector<256x128xf32>
    %27 = arith.addf %26, %24 : vector<256x128xf32>
    %c0_19 = arith.constant 0 : index
    %c0_20 = arith.constant 0 : index
    %c0_21 = arith.constant 0 : index
    %28 = vector.load %arg8[%c0_19, %c0_20, %c0_21] : memref<1x256x128xf32, #tpu.memory_space<vmem>>, vector<1x256x128xf32>
    %29 = vector.shape_cast %28 : vector<1x256x128xf32> to vector<256x128xf32>
    %30 = vector.shape_cast %27 : vector<256x128xf32> to vector<1x256x128xf32>
    tpu.vector_store %arg8[%c0_19, %c0_20, %c0_21], %30 {strides = array<i32>} : memref<1x256x128xf32, #tpu.memory_space<vmem>>, vector<1x256x128xf32>,
    return
  }
  func.func @transform_0(%arg0: i32, %arg1: i32) -> (i32, i32, i32) {
    %c0_i32 = arith.constant 0 : i32
    %c0_i32_0 = arith.constant 0 : i32
    return %arg0, %arg1, %c0_i32 : i32, i32, i32
  }
  func.func @transform_1(%arg0: i32, %arg1: i32) -> (i32, i32, i32) {
    %c0_i32 = arith.constant 0 : i32
    %c1_i32 = arith.constant 1 : i32
    %c0_i32_0 = arith.constant 0 : i32
    return %arg0, %c0_i32, %c1_i32 : i32, i32, i32
  }
  func.func @transform_2(%arg0: i32, %arg1: i32) -> (i32, i32, i32) {
    %c0_i32 = arith.constant 0 : i32
    %c2_i32 = arith.constant 2 : i32
    %c0_i32_0 = arith.constant 0 : i32
    return %arg0, %c0_i32, %c2_i32 : i32, i32, i32
  }
  func.func @transform_3(%arg0: i32, %arg1: i32) -> (i32, i32, i32) {
    %c0_i32 = arith.constant 0 : i32
    %c0_i32_0 = arith.constant 0 : i32
    return %arg0, %arg1, %c0_i32 : i32, i32, i32
  }
  func.func @transform_4(%arg0: i32, %arg1: i32) -> (i32, i32) {
    %c0_i32 = arith.constant 0 : i32
    %c0_i32_0 = arith.constant 0 : i32
    %c0_i32_1 = arith.constant 0 : i32
    return %c0_i32, %c0_i32_0 : i32, i32
  }
  func.func @transform_5(%arg0: i32, %arg1: i32) -> (i32, i32) {
    %c0_i32 = arith.constant 0 : i32
    %c0_i32_0 = arith.constant 0 : i32
    %c0_i32_1 = arith.constant 0 : i32
    return %c0_i32, %c0_i32_0 : i32, i32
  }
  func.func @transform_6(%arg0: i32, %arg1: i32) -> (i32, i32, i32) {
    %c0_i32 = arith.constant 0 : i32
    %c0_i32_0 = arith.constant 0 : i32
    return %arg0, %arg1, %c0_i32 : i32, i32, i32
  }
}

module attributes {stable_mosaic.version = 11 : i64} {
  func.func @gn_qkv_kernel(%arg0: i32, %arg1: i32, %arg2: memref<1x256x128xf32, #tpu.memory_space<vmem>>, %arg3: memref<1x1x128xf32, #tpu.memory_space<vmem>>, %arg4: memref<1x1x128xf32, #tpu.memory_space<vmem>>, %arg5: memref<128x384xbf16, #tpu.memory_space<vmem>>, %arg6: memref<1x384xf32, #tpu.memory_space<vmem>>, %arg7: memref<1x256x384xbf16, #tpu.memory_space<vmem>>) attributes {dimension_semantics = [#tpu.dimension_semantics<parallel>, #tpu.dimension_semantics<parallel>], iteration_bounds = array<i64: 2, 1>, scalar_prefetch = 0 : i64, scratch_operands = 0 : i64, tpu.core_type = #tpu.core_type<tc>, window_params = [{transform_indices = @transform_0, window_bounds = array<i64: 1, 256, 128>}, {transform_indices = @transform_1, window_bounds = array<i64: 1, 1, 128>}, {transform_indices = @transform_2, window_bounds = array<i64: 1, 1, 128>}, {pipeline_mode = #tpu.pipeline_mode<synchronous>, transform_indices = @transform_3, window_bounds = array<i64: 128, 384>}, {pipeline_mode = #tpu.pipeline_mode<synchronous>, transform_indices = @transform_4, window_bounds = array<i64: 1, 384>}, {transform_indices = @transform_5, window_bounds = array<i64: 1, 256, 384>}]} {
    %c0 = arith.constant 0 : index
    %c0_0 = arith.constant 0 : index
    %c0_1 = arith.constant 0 : index
    %0 = vector.load %arg2[%c0, %c0_0, %c0_1] : memref<1x256x128xf32, #tpu.memory_space<vmem>>, vector<1x256x128xf32>
    %1 = vector.shape_cast %0 : vector<1x256x128xf32> to vector<256x128xf32>
    %c0_2 = arith.constant 0 : index
    %c0_3 = arith.constant 0 : index
    %c0_4 = arith.constant 0 : index
    %2 = vector.load %arg3[%c0_2, %c0_3, %c0_4] : memref<1x1x128xf32, #tpu.memory_space<vmem>>, vector<1x1x128xf32>
    %3 = vector.shape_cast %2 : vector<1x1x128xf32> to vector<1x128xf32>
    %4 = vector.broadcast %3 : vector<1x128xf32> to vector<256x128xf32>
    %5 = arith.mulf %1, %4 : vector<256x128xf32>
    %c0_5 = arith.constant 0 : index
    %c0_6 = arith.constant 0 : index
    %c0_7 = arith.constant 0 : index
    %6 = vector.load %arg4[%c0_5, %c0_6, %c0_7] : memref<1x1x128xf32, #tpu.memory_space<vmem>>, vector<1x1x128xf32>
    %7 = vector.shape_cast %6 : vector<1x1x128xf32> to vector<1x128xf32>
    %8 = vector.broadcast %7 : vector<1x128xf32> to vector<256x128xf32>
    %9 = arith.addf %5, %8 : vector<256x128xf32>
    %10 = arith.truncf %9 : vector<256x128xf32> to vector<256x128xbf16>
    %c0_8 = arith.constant 0 : index
    %c0_9 = arith.constant 0 : index
    %11 = vector.load %arg5[%c0_8, %c0_9] : memref<128x384xbf16, #tpu.memory_space<vmem>>, vector<128x384xbf16>
    %cst = arith.constant dense<0.000000e+00> : vector<256x384xf32>
    %12 = tpu.matmul %10, %11, %cst {dimension_numbers = #tpu.dot_dimension_numbers<[1], [0], [0], [1], [0, 0, 1, 1], [], []>} : vector<256x128xbf16>, vector<128x384xbf16>, vector<256x384xf32> -> vector<256x384xf32>
    %c0_10 = arith.constant 0 : index
    %c0_11 = arith.constant 0 : index
    %13 = vector.load %arg6[%c0_10, %c0_11] : memref<1x384xf32, #tpu.memory_space<vmem>>, vector<1x384xf32>
    %14 = vector.broadcast %13 : vector<1x384xf32> to vector<256x384xf32>
    %15 = arith.addf %12, %14 : vector<256x384xf32>
    %16 = arith.truncf %15 : vector<256x384xf32> to vector<256x384xbf16>
    %c0_12 = arith.constant 0 : index
    %c0_13 = arith.constant 0 : index
    %c0_14 = arith.constant 0 : index
    %17 = vector.load %arg7[%c0_12, %c0_13, %c0_14] : memref<1x256x384xbf16, #tpu.memory_space<vmem>>, vector<1x256x384xbf16>
    %18 = vector.shape_cast %17 : vector<1x256x384xbf16> to vector<256x384xbf16>
    %19 = vector.shape_cast %16 : vector<256x384xbf16> to vector<1x256x384xbf16>
    tpu.vector_store %arg7[%c0_12, %c0_13, %c0_14], %19 {strides = array<i32>} : memref<1x256x384xbf16, #tpu.memory_space<vmem>>, vector<1x256x384xbf16>,
    return
  }
  func.func @transform_0(%arg0: i32, %arg1: i32) -> (i32, i32, i32) {
    %c0_i32 = arith.constant 0 : i32
    %c0_i32_0 = arith.constant 0 : i32
    return %arg0, %arg1, %c0_i32 : i32, i32, i32
  }
  func.func @transform_1(%arg0: i32, %arg1: i32) -> (i32, i32, i32) {
    %c0_i32 = arith.constant 0 : i32
    %c0_i32_0 = arith.constant 0 : i32
    %c0_i32_1 = arith.constant 0 : i32
    return %arg0, %c0_i32, %c0_i32_0 : i32, i32, i32
  }
  func.func @transform_2(%arg0: i32, %arg1: i32) -> (i32, i32, i32) {
    %c0_i32 = arith.constant 0 : i32
    %c0_i32_0 = arith.constant 0 : i32
    %c0_i32_1 = arith.constant 0 : i32
    return %arg0, %c0_i32, %c0_i32_0 : i32, i32, i32
  }
  func.func @transform_3(%arg0: i32, %arg1: i32) -> (i32, i32) {
    %c0_i32 = arith.constant 0 : i32
    %c0_i32_0 = arith.constant 0 : i32
    %c0_i32_1 = arith.constant 0 : i32
    return %c0_i32, %c0_i32_0 : i32, i32
  }
  func.func @transform_4(%arg0: i32, %arg1: i32) -> (i32, i32) {
    %c0_i32 = arith.constant 0 : i32
    %c0_i32_0 = arith.constant 0 : i32
    %c0_i32_1 = arith.constant 0 : i32
    return %c0_i32, %c0_i32_0 : i32, i32
  }
  func.func @transform_5(%arg0: i32, %arg1: i32) -> (i32, i32, i32) {
    %c0_i32 = arith.constant 0 : i32
    %c0_i32_0 = arith.constant 0 : i32
    return %arg0, %arg1, %c0_i32 : i32, i32, i32
  }
}

module attributes {stable_mosaic.version = 11 : i64} {
  func.func @gn_stats_kernel(%arg0: i32, %arg1: i32, %arg2: memref<1x256x128xf32, #tpu.memory_space<vmem>>, %arg3: memref<128x128xf32, #tpu.memory_space<vmem>>, %arg4: memref<1x128xf32, #tpu.memory_space<vmem>>, %arg5: memref<1x128xf32, #tpu.memory_space<vmem>>, %arg6: memref<1x1x128xf32, #tpu.memory_space<vmem>>, %arg7: memref<1x1x128xf32, #tpu.memory_space<vmem>>) attributes {dimension_semantics = [#tpu.dimension_semantics<parallel>, #tpu.dimension_semantics<arbitrary>], iteration_bounds = array<i64: 2, 1>, scalar_prefetch = 0 : i64, scratch_operands = 0 : i64, tpu.core_type = #tpu.core_type<tc>, window_params = [{transform_indices = @transform_0, window_bounds = array<i64: 1, 256, 128>}, {pipeline_mode = #tpu.pipeline_mode<synchronous>, transform_indices = @transform_1, window_bounds = array<i64: 128, 128>}, {pipeline_mode = #tpu.pipeline_mode<synchronous>, transform_indices = @transform_2, window_bounds = array<i64: 1, 128>}, {pipeline_mode = #tpu.pipeline_mode<synchronous>, transform_indices = @transform_3, window_bounds = array<i64: 1, 128>}, {transform_indices = @transform_4, window_bounds = array<i64: 1, 1, 128>}, {transform_indices = @transform_5, window_bounds = array<i64: 1, 1, 128>}]} {
    %c0_i32 = arith.constant 0 : i32
    %0 = arith.cmpi eq, %arg1, %c0_i32 : i32
    %1 = arith.extui %0 : i1 to i32
    %c0_i32_0 = arith.constant 0 : i32
    %2 = arith.cmpi ne, %1, %c0_i32_0 : i32
    scf.if %2 {
      %cst_18 = arith.constant 0.000000e+00 : f32
      %25 = vector.broadcast %cst_18 : f32 to vector<1x128xf32>
      %c0_19 = arith.constant 0 : index
      %c0_20 = arith.constant 0 : index
      %c0_21 = arith.constant 0 : index
      %26 = vector.load %arg6[%c0_19, %c0_20, %c0_21] : memref<1x1x128xf32, #tpu.memory_space<vmem>>, vector<1x1x128xf32>
      %27 = vector.shape_cast %26 : vector<1x1x128xf32> to vector<1x128xf32>
      %28 = vector.shape_cast %25 : vector<1x128xf32> to vector<1x1x128xf32>
      tpu.vector_store %arg6[%c0_19, %c0_20, %c0_21], %28 {strides = array<i32>} : memref<1x1x128xf32, #tpu.memory_space<vmem>>, vector<1x1x128xf32>,
      %cst_22 = arith.constant 0.000000e+00 : f32
      %29 = vector.broadcast %cst_22 : f32 to vector<1x128xf32>
      %c0_23 = arith.constant 0 : index
      %c0_24 = arith.constant 0 : index
      %c0_25 = arith.constant 0 : index
      %30 = vector.load %arg7[%c0_23, %c0_24, %c0_25] : memref<1x1x128xf32, #tpu.memory_space<vmem>>, vector<1x1x128xf32>
      %31 = vector.shape_cast %30 : vector<1x1x128xf32> to vector<1x128xf32>
      %32 = vector.shape_cast %29 : vector<1x128xf32> to vector<1x1x128xf32>
      tpu.vector_store %arg7[%c0_23, %c0_24, %c0_25], %32 {strides = array<i32>} : memref<1x1x128xf32, #tpu.memory_space<vmem>>, vector<1x1x128xf32>,
    } else {
    }
    %c0 = arith.constant 0 : index
    %c0_1 = arith.constant 0 : index
    %c0_2 = arith.constant 0 : index
    %3 = vector.load %arg2[%c0, %c0_1, %c0_2] : memref<1x256x128xf32, #tpu.memory_space<vmem>>, vector<1x256x128xf32>
    %4 = vector.shape_cast %3 : vector<1x256x128xf32> to vector<256x128xf32>
    %c0_3 = arith.constant 0 : index
    %c0_4 = arith.constant 0 : index
    %c0_5 = arith.constant 0 : index
    %5 = vector.load %arg6[%c0_3, %c0_4, %c0_5] : memref<1x1x128xf32, #tpu.memory_space<vmem>>, vector<1x1x128xf32>
    %6 = vector.shape_cast %5 : vector<1x1x128xf32> to vector<1x128xf32>
    %cst = arith.constant dense<0.000000e+00> : vector<128xf32>
    %7 = vector.multi_reduction <add>, %4, %cst [0] : vector<256x128xf32> to vector<128xf32>
    %8 = vector.shape_cast %7 : vector<128xf32> to vector<1x128xf32>
    %9 = arith.addf %6, %8 : vector<1x128xf32>
    %c0_6 = arith.constant 0 : index
    %c0_7 = arith.constant 0 : index
    %c0_8 = arith.constant 0 : index
    %10 = vector.load %arg6[%c0_6, %c0_7, %c0_8] : memref<1x1x128xf32, #tpu.memory_space<vmem>>, vector<1x1x128xf32>
    %11 = vector.shape_cast %10 : vector<1x1x128xf32> to vector<1x128xf32>
    %12 = vector.shape_cast %9 : vector<1x128xf32> to vector<1x1x128xf32>
    tpu.vector_store %arg6[%c0_6, %c0_7, %c0_8], %12 {strides = array<i32>} : memref<1x1x128xf32, #tpu.memory_space<vmem>>, vector<1x1x128xf32>,
    %c0_9 = arith.constant 0 : index
    %c0_10 = arith.constant 0 : index
    %c0_11 = arith.constant 0 : index
    %13 = vector.load %arg7[%c0_9, %c0_10, %c0_11] : memref<1x1x128xf32, #tpu.memory_space<vmem>>, vector<1x1x128xf32>
    %14 = vector.shape_cast %13 : vector<1x1x128xf32> to vector<1x128xf32>
    %15 = arith.mulf %4, %4 : vector<256x128xf32>
    %cst_12 = arith.constant dense<0.000000e+00> : vector<128xf32>
    %16 = vector.multi_reduction <add>, %15, %cst_12 [0] : vector<256x128xf32> to vector<128xf32>
    %17 = vector.shape_cast %16 : vector<128xf32> to vector<1x128xf32>
    %18 = arith.addf %14, %17 : vector<1x128xf32>
    %c0_13 = arith.constant 0 : index
    %c0_14 = arith.constant 0 : index
    %c0_15 = arith.constant 0 : index
    %19 = vector.load %arg7[%c0_13, %c0_14, %c0_15] : memref<1x1x128xf32, #tpu.memory_space<vmem>>, vector<1x1x128xf32>
    %20 = vector.shape_cast %19 : vector<1x1x128xf32> to vector<1x128xf32>
    %21 = vector.shape_cast %18 : vector<1x128xf32> to vector<1x1x128xf32>
    tpu.vector_store %arg7[%c0_13, %c0_14, %c0_15], %21 {strides = array<i32>} : memref<1x1x128xf32, #tpu.memory_space<vmem>>, vector<1x1x128xf32>,
    %c0_i32_16 = arith.constant 0 : i32
    %22 = arith.cmpi eq, %arg1, %c0_i32_16 : i32
    %23 = arith.extui %22 : i1 to i32
    %c0_i32_17 = arith.constant 0 : i32
    %24 = arith.cmpi ne, %23, %c0_i32_17 : i32
    scf.if %24 {
      %c0_18 = arith.constant 0 : index
      %c0_19 = arith.constant 0 : index
      %c0_20 = arith.constant 0 : index
      %25 = vector.load %arg6[%c0_18, %c0_19, %c0_20] : memref<1x1x128xf32, #tpu.memory_space<vmem>>, vector<1x1x128xf32>
      %26 = vector.shape_cast %25 : vector<1x1x128xf32> to vector<1x128xf32>
      %c0_21 = arith.constant 0 : index
      %c0_22 = arith.constant 0 : index
      %c0_23 = arith.constant 0 : index
      %27 = vector.load %arg7[%c0_21, %c0_22, %c0_23] : memref<1x1x128xf32, #tpu.memory_space<vmem>>, vector<1x1x128xf32>
      %28 = vector.shape_cast %27 : vector<1x1x128xf32> to vector<1x128xf32>
      %c0_24 = arith.constant 0 : index
      %c0_25 = arith.constant 0 : index
      %29 = vector.load %arg3[%c0_24, %c0_25] : memref<128x128xf32, #tpu.memory_space<vmem>>, vector<128x128xf32>
      %cst_26 = arith.constant dense<0.000000e+00> : vector<1x128xf32>
      %30 = tpu.matmul %26, %29, %cst_26 {dimension_numbers = #tpu.dot_dimension_numbers<[1], [0], [0], [1], [0, 0, 1, 1], [], []>} : vector<1x128xf32>, vector<128x128xf32>, vector<1x128xf32> -> vector<1x128xf32>
      %c0_27 = arith.constant 0 : index
      %c0_28 = arith.constant 0 : index
      %31 = vector.load %arg3[%c0_27, %c0_28] : memref<128x128xf32, #tpu.memory_space<vmem>>, vector<128x128xf32>
      %cst_29 = arith.constant dense<0.000000e+00> : vector<1x128xf32>
      %32 = tpu.matmul %28, %31, %cst_29 {dimension_numbers = #tpu.dot_dimension_numbers<[1], [0], [0], [1], [0, 0, 1, 1], [], []>} : vector<1x128xf32>, vector<128x128xf32>, vector<1x128xf32> -> vector<1x128xf32>
      %33 = arith.mulf %30, %30 : vector<1x128xf32>
      %34 = arith.subf %32, %33 : vector<1x128xf32>
      %cst_30 = arith.constant 0.000000e+00 : f32
      %35 = vector.broadcast %cst_30 : f32 to vector<1x128xf32>
      %36 = arith.maximumf %34, %35 : vector<1x128xf32>
      %cst_31 = arith.constant 9.99999974E-6 : f32
      %37 = vector.broadcast %cst_31 : f32 to vector<1x128xf32>
      %38 = arith.addf %36, %37 : vector<1x128xf32>
      %39 = math.rsqrt %38 : vector<1x128xf32>
      %c0_32 = arith.constant 0 : index
      %c0_33 = arith.constant 0 : index
      %40 = vector.load %arg4[%c0_32, %c0_33] : memref<1x128xf32, #tpu.memory_space<vmem>>, vector<1x128xf32>
      %41 = arith.mulf %40, %39 : vector<1x128xf32>
      %c0_34 = arith.constant 0 : index
      %c0_35 = arith.constant 0 : index
      %c0_36 = arith.constant 0 : index
      %42 = vector.load %arg6[%c0_34, %c0_35, %c0_36] : memref<1x1x128xf32, #tpu.memory_space<vmem>>, vector<1x1x128xf32>
      %43 = vector.shape_cast %42 : vector<1x1x128xf32> to vector<1x128xf32>
      %44 = vector.shape_cast %41 : vector<1x128xf32> to vector<1x1x128xf32>
      tpu.vector_store %arg6[%c0_34, %c0_35, %c0_36], %44 {strides = array<i32>} : memref<1x1x128xf32, #tpu.memory_space<vmem>>, vector<1x1x128xf32>,
      %c0_37 = arith.constant 0 : index
      %c0_38 = arith.constant 0 : index
      %45 = vector.load %arg5[%c0_37, %c0_38] : memref<1x128xf32, #tpu.memory_space<vmem>>, vector<1x128xf32>
      %46 = arith.mulf %30, %41 : vector<1x128xf32>
      %47 = arith.subf %45, %46 : vector<1x128xf32>
      %c0_39 = arith.constant 0 : index
      %c0_40 = arith.constant 0 : index
      %c0_41 = arith.constant 0 : index
      %48 = vector.load %arg7[%c0_39, %c0_40, %c0_41] : memref<1x1x128xf32, #tpu.memory_space<vmem>>, vector<1x1x128xf32>
      %49 = vector.shape_cast %48 : vector<1x1x128xf32> to vector<1x128xf32>
      %50 = vector.shape_cast %47 : vector<1x128xf32> to vector<1x1x128xf32>
      tpu.vector_store %arg7[%c0_39, %c0_40, %c0_41], %50 {strides = array<i32>} : memref<1x1x128xf32, #tpu.memory_space<vmem>>, vector<1x1x128xf32>,
    } else {
    }
    return
  }
  func.func @transform_0(%arg0: i32, %arg1: i32) -> (i32, i32, i32) {
    %c0_i32 = arith.constant 0 : i32
    %c0_i32_0 = arith.constant 0 : i32
    return %arg0, %arg1, %c0_i32 : i32, i32, i32
  }
  func.func @transform_1(%arg0: i32, %arg1: i32) -> (i32, i32) {
    %c0_i32 = arith.constant 0 : i32
    %c0_i32_0 = arith.constant 0 : i32
    %c0_i32_1 = arith.constant 0 : i32
    return %c0_i32, %c0_i32_0 : i32, i32
  }
  func.func @transform_2(%arg0: i32, %arg1: i32) -> (i32, i32) {
    %c0_i32 = arith.constant 0 : i32
    %c0_i32_0 = arith.constant 0 : i32
    %c0_i32_1 = arith.constant 0 : i32
    return %c0_i32, %c0_i32_0 : i32, i32
  }
  func.func @transform_3(%arg0: i32, %arg1: i32) -> (i32, i32) {
    %c0_i32 = arith.constant 0 : i32
    %c0_i32_0 = arith.constant 0 : i32
    %c0_i32_1 = arith.constant 0 : i32
    return %c0_i32, %c0_i32_0 : i32, i32
  }
  func.func @transform_4(%arg0: i32, %arg1: i32) -> (i32, i32, i32) {
    %c0_i32 = arith.constant 0 : i32
    %c0_i32_0 = arith.constant 0 : i32
    %c0_i32_1 = arith.constant 0 : i32
    return %arg0, %c0_i32, %c0_i32_0 : i32, i32, i32
  }
  func.func @transform_5(%arg0: i32, %arg1: i32) -> (i32, i32, i32) {
    %c0_i32 = arith.constant 0 : i32
    %c0_i32_0 = arith.constant 0 : i32
    %c0_i32_1 = arith.constant 0 : i32
    return %arg0, %c0_i32, %c0_i32_0 : i32, i32, i32
  }
}

</mosaic_0001>

<bundles_post_ra>
// kernel: _attn_block_impl.3
= control target key start
LH: loop header
LB: loop body
LE: loop exit
PB: predicated region body
PF: predicated region fallthrough
CT: control target
= control target key end

     0   :  { %s915_s18 = smov 0   ;;  %s917_s19 = smov 0   ;;  %s1069_s0 = inlined_call_operand.vmem [shape: f32[2,256,128], index: 0, kind: input, shape index: {}]   ;;  %s1070_s1 = inlined_call_operand.vmem [shape: f32[128,128], index: 1, kind: input, shape index: {}]   ;;  %s1071_s2 = inlined_call_operand.vmem [shape: f32[1,128], index: 2, kind: input, shape index: {}]   ;;  %s1072_s3 = inlined_call_operand.vmem [shape: f32[1,128], index: 3, kind: input, shape index: {}]   ;;  %s1073_s4 = inlined_call_operand.vmem [shape: f32[2,1,128], index: 4, kind: output, shape index: {0}]   ;;  %s1074_s5 = inlined_call_operand.vmem [shape: f32[2,1,128], index: 5, kind: output, shape index: {1}]  }
   0x1   :  { %s919_s20 = smov 0  }
   0x2 LB: > { %s28_s21 = sadd.s32 1, %s876_s19  ;;  %p671_p0 = scmp.ge.s32.totalorder %s880_s20, 1  ;;  %s880_s20 = sphi %s919_s20, %s16_s20   ;;  %s876_s19 = sphi %s917_s19, %s1076_s19   ;;  %s872_s18 = sphi %s915_s18, %s1075_s18  }
   0x3   : > { %p30_p1 = scmp.ge.s32.totalorder %s28_s21, 2  ;;  %p209_p2 = scmp.lt.s32.totalorder %s880_s20, 3 }
   0x5   : > { %s1078_s21 = smov (%p30_p1, %s28_s21), 0  ;;  %p210_p3 = pnand %p671_p0, %p209_p2 }
   0x6   : > { %v413_v0 = vld [vmem:[%s1070_s1] sm:$0xff] (!%p210_p3)  ;;  %v414_v1 = vld [vmem:[%s1070_s1 + $0x8] sm:$0xff] (!%p210_p3)  ;;  %v415_v2 = vld [vmem:[%s1070_s1 + $0x10] sm:$0xff] (!%p210_p3)  ;;  %p243_p4 = scmp.lt.s32.totalorder (!%p210_p3), %s872_s18, 1  ;;  %v882_v3 = vmov (!%p210_p3), 0.0|0.0   ;;  %vm883_vm0 = vmmov (!%p210_p3), 0  }
   0x7   : > { %213 = sbr.rel (%p210_p3) target bundleno = 340 (0x154), region = 36  ;;  %781 = vmatprep.subr.bf16.mxu0 (!%p210_p3), %v882_v3  ;;  %v782_v4 = vpack.c.bf16 (!%p210_p3), %v414_v1, %v413_v0  ;;  %805 = vmatprep.subr.bf16.mxu1 (!%p210_p3), %v882_v3  ;;  %v416_v5 = vld [vmem:[%s1070_s1 + $0x18] sm:$0xff] (!%p210_p3)  ;;  %v884_v6 = vmov (!%p210_p3), 0.0   ;;  %v417_v8 = vld [vmem:[%s1070_s1 + $0x20] sm:$0xff] (!%p210_p3)  ;;  %v418_v9 = vld [vmem:[%s1070_s1 + $0x28] sm:$0xff] (!%p210_p3) }
   0x8   : > { %743 = vmatprep.mubr.msk.f32.mxu0 (!%p210_p3), %vm883_vm0, %v884_v6  ;;  %778 = vmatprep.mubr.msk.f32.mxu1 (!%p210_p3), %vm883_vm0, %v884_v6  ;;  %v785_v7 = vpack.c.bf16 (!%p210_p3), %v416_v5, %v415_v2  ;;  %v788_v13 = vpack.c.bf16 (!%p210_p3), %v418_v9, %v417_v8  ;;  %v419_v15 = vld [vmem:[%s1070_s1 + $0x30] sm:$0xff] (!%p210_p3)  ;;  %v420_v16 = vld [vmem:[%s1070_s1 + $0x38] sm:$0xff] (!%p210_p3)  ;;  %v421_v22 = vld [vmem:[%s1070_s1 + $0x40] sm:$0xff] (!%p210_p3) }
   0x9   : > { %783 = vmatpush3.bf16.msra.mxu0 (!%p210_p3), %v782_v4  ;;  %807 = vmatpush3.bf16.msra.mxu1 (!%p210_p3), %v782_v4  ;;  %v791_v20 = vpack.c.bf16 (!%p210_p3), %v420_v16, %v419_v15  ;;  %v422_v23 = vld [vmem:[%s1070_s1 + $0x48] sm:$0xff] (!%p210_p3)  ;;  %v423_v31 = vld [vmem:[%s1070_s1 + $0x50] sm:$0xff] (!%p210_p3)  ;;  %v424_v32 = vld [vmem:[%s1070_s1 + $0x58] sm:$0xff] (!%p210_p3) }
   0xa   : > { %784 = vmatprep.subr.bf16.mxu0 (!%p210_p3), %v882_v3  ;;  %808 = vmatprep.subr.bf16.mxu1 (!%p210_p3), %v882_v3  ;;  %v794_v29 = vpack.c.bf16 (!%p210_p3), %v422_v23, %v421_v22  ;;  %v797_v39 = vpack.c.bf16 (!%p210_p3), %v424_v32, %v423_v31  ;;  %v425_v41 = vld [vmem:[%s1070_s1 + $0x60] sm:$0xff] (!%p210_p3)  ;;  %v426_v42 = vld [vmem:[%s1070_s1 + $0x68] sm:$0xff] (!%p210_p3)  ;;  %v427_v52 = vld [vmem:[%s1070_s1 + $0x70] sm:$0xff] (!%p210_p3) }
   0xb   : > { %v800_v50 = vpack.c.bf16 (!%p210_p3), %v426_v42, %v425_v41  ;;  %v428_v53 = vld [vmem:[%s1070_s1 + $0x78] sm:$0xff] (!%p210_p3) }
   0xc   : > { %v803_v61 = vpack.c.bf16 (!%p210_p3), %v428_v53, %v427_v52 }
   0xd   : > { %786 = vmatpush3.bf16.msra.mxu0 (!%p210_p3), %v785_v7  ;;  %810 = vmatpush3.bf16.msra.mxu1 (!%p210_p3), %v785_v7 }
   0xe   : > { %s1080_s18 = smov (!%p243_p4, %s872_s18), 1  ;;  %787 = vmatprep.subr.bf16.mxu0 %v882_v3  ;;  %811 = vmatprep.subr.bf16.mxu1 %v882_v3 }
   0xf   : > { %s676_s9 = sshll.u32 %s1080_s18, 8  ;;  %s958_s12 = scalar_lea.vmem %s1073_s4, %s1080_s18 }
  0x10   : > { %s963_s15 = scalar_lea.vmem %s1069_s0, %s676_s9  ;;  %s968_s22 = scalar_lea.vmem %s1074_s5, %s1080_s18  ;;  %262 = vst [vmem:[%s958_s12] sm:$0x1] %v884_v6 }
  0x11   : > { %263 = vst [vmem:[%s968_s22] sm:$0x1] %v884_v6  ;;  %v264_v10 = vld [vmem:[%s963_s15] sm:$0xff]  ;;  %v265_v11 = vld [vmem:[%s963_s15 + $0x8] sm:$0xff]  ;;  %v266_v12 = vld [vmem:[%s963_s15 + $0x10] sm:$0xff]  ;;  %789 = vmatpush3.bf16.msra.mxu0 %v788_v13  ;;  %813 = vmatpush3.bf16.msra.mxu1 %v788_v13 }
  0x12   : > { %v297_v14 = vadd.f32 %v265_v11, %v264_v10  ;;  %v267_v17 = vld [vmem:[%s963_s15 + $0x18] sm:$0xff]  ;;  %v268_v19 = vld [vmem:[%s963_s15 + $0x20] sm:$0xff]  ;;  %790 = vmatprep.subr.bf16.mxu0 %v882_v3  ;;  %814 = vmatprep.subr.bf16.mxu1 %v882_v3  ;;  %v269_v24 = vld [vmem:[%s963_s15 + $0x28] sm:$0xff]  ;;  %v337_v27 = vmul.f32 %v264_v10, %v264_v10  ;;  %v338_v28 = vmul.f32 %v265_v11, %v265_v11 }
  0x13   : > { %v270_v26 = vld [vmem:[%s963_s15 + $0x30] sm:$0xff]  ;;  %v271_v33 = vld [vmem:[%s963_s15 + $0x38] sm:$0xff]  ;;  %v339_v34 = vmul.f32 %v266_v12, %v266_v12  ;;  %v272_v36 = vld [vmem:[%s963_s15 + $0x40] sm:$0xff]  ;;  %v340_v37 = vmul.f32 %v267_v17, %v267_v17  ;;  %v341_v44 = vmul.f32 %v268_v19, %v268_v19  ;;  %v342_v48 = vmul.f32 %v269_v24, %v269_v24 }
  0x14   : > { %v298_v18 = vadd.f32 %v297_v14, %v266_v12  ;;  %v369_v38 = vadd.f32 %v338_v28, %v337_v27  ;;  %v273_v43 = vld [vmem:[%s963_s15 + $0x48] sm:$0xff]  ;;  %v274_v47 = vld [vmem:[%s963_s15 + $0x50] sm:$0xff]  ;;  %v275_v54 = vld [vmem:[%s963_s15 + $0x58] sm:$0xff]  ;;  %v343_v55 = vmul.f32 %v270_v26, %v270_v26  ;;  %v344_v59 = vmul.f32 %v271_v33, %v271_v33 }
  0x15   : > { %792 = vmatpush3.bf16.msra.mxu0 %v791_v20  ;;  %816 = vmatpush3.bf16.msra.mxu1 %v791_v20  ;;  %v276_v58 = vld [vmem:[%s963_s15 + $0x60] sm:$0xff]  ;;  %v277_v63 = vld [vmem:[%s963_s15 + $0x68] sm:$0xff]  ;;  %v345_v0 = vmul.f32 %v272_v36, %v272_v36  ;;  %v278_v4 = vld [vmem:[%s963_s15 + $0x70] sm:$0xff]  ;;  %v346_v5 = vmul.f32 %v273_v43, %v273_v43  ;;  %v347_v9 = vmul.f32 %v274_v47, %v274_v47 }
  0x16   : > { %v299_v21 = vadd.f32 %v298_v18, %v267_v17  ;;  %793 = vmatprep.subr.bf16.mxu0 %v882_v3  ;;  %817 = vmatprep.subr.bf16.mxu1 %v882_v3  ;;  %v370_v45 = vadd.f32 %v369_v38, %v339_v34  ;;  %v279_v8 = vld [vmem:[%s963_s15 + $0x78] sm:$0xff]  ;;  %v280_v12 = vld [vmem:[%s963_s15 + $0x80] sm:$0xff]  ;;  %v281_v15 = vld [vmem:[%s963_s15 + $0x88] sm:$0xff]  ;;  %v349_v16 = vmul.f32 %v276_v58, %v276_v58 }
  0x17   : > { %v350_v20 = vmul.f32 %v277_v63, %v277_v63  ;;  %v283_v23 = vld [vmem:[%s963_s15 + $0x98] sm:$0xff]  ;;  %v284_v27 = vld [vmem:[%s963_s15 + $0xa0] sm:$0xff]  ;;  %v352_v28 = vmul.f32 %v279_v8, %v279_v8  ;;  %v285_v31 = vld [vmem:[%s963_s15 + $0xa8] sm:$0xff]  ;;  %v353_v32 = vmul.f32 %v280_v12, %v280_v12 }
  0x18   : > { %v300_v25 = vadd.f32 %v299_v21, %v268_v19  ;;  %v371_v49 = vadd.f32 %v370_v45, %v340_v37  ;;  %v282_v19 = vld [vmem:[%s963_s15 + $0x90] sm:$0xff]  ;;  %v358_v52 = vmul.f32 %v285_v31, %v285_v31 }
  0x19   : > { %795 = vmatpush3.bf16.msra.mxu0 %v794_v29  ;;  %819 = vmatpush3.bf16.msra.mxu1 %v794_v29 }
  0x1a   : > { %v301_v30 = vadd.f32 %v300_v25, %v269_v24  ;;  %796 = vmatprep.subr.bf16.mxu0 %v882_v3  ;;  %820 = vmatprep.subr.bf16.mxu1 %v882_v3  ;;  %v372_v56 = vadd.f32 %v371_v49, %v341_v44  ;;  %v351_v24 = vmul.f32 %v278_v4, %v278_v4 }
  0x1b   : > { %v356_v44 = vmul.f32 %v283_v23, %v283_v23 }
  0x1c   : > { %v302_v35 = vadd.f32 %v301_v30, %v270_v26  ;;  %v373_v60 = vadd.f32 %v372_v56, %v342_v48  ;;  %v357_v48 = vmul.f32 %v284_v27, %v284_v27 }
  0x1d   : > { %798 = vmatpush3.bf16.msra.mxu0 %v797_v39  ;;  %822 = vmatpush3.bf16.msra.mxu1 %v797_v39  ;;  %v287_v39 = vld [vmem:[%s963_s15 + $0xb8] sm:$0xff] }
  0x1e   : > { %v303_v40 = vadd.f32 %v302_v35, %v271_v33  ;;  %799 = vmatprep.subr.bf16.mxu0 %v882_v3  ;;  %823 = vmatprep.subr.bf16.mxu1 %v882_v3  ;;  %v374_v1 = vadd.f32 %v373_v60, %v343_v55  ;;  %v286_v35 = vld [vmem:[%s963_s15 + $0xb0] sm:$0xff]  ;;  %v291_v55 = vld [vmem:[%s963_s15 + $0xd8] sm:$0xff]  ;;  %v360_v60 = vmul.f32 %v287_v39, %v287_v39 }
  0x1f   : > { %v359_v56 = vmul.f32 %v286_v35, %v286_v35 }
  0x20   : > { %v304_v46 = vadd.f32 %v303_v40, %v272_v36  ;;  %v375_v6 = vadd.f32 %v374_v1, %v344_v59  ;;  %v354_v36 = vmul.f32 %v281_v15, %v281_v15  ;;  %v355_v40 = vmul.f32 %v282_v19, %v282_v19  ;;  %v292_v59 = vld [vmem:[%s963_s15 + $0xe0] sm:$0xff] }
  0x21   : > { %801 = vmatpush3.bf16.msra.mxu0 %v800_v50  ;;  %825 = vmatpush3.bf16.msra.mxu1 %v800_v50 }
  0x22   : > { %v305_v51 = vadd.f32 %v304_v46, %v273_v43  ;;  %802 = vmatprep.subr.bf16.mxu0 %v882_v3  ;;  %826 = vmatprep.subr.bf16.mxu1 %v882_v3  ;;  %v376_v10 = vadd.f32 %v375_v6, %v345_v0  ;;  %v348_v3 = vmul.f32 %v275_v54, %v275_v54  ;;  %v288_v43 = vld [vmem:[%s963_s15 + $0xc0] sm:$0xff] }
  0x23   : > { %v361_v0 = vmul.f32 %v288_v43, %v288_v43 }
  0x24   : > { %v306_v57 = vadd.f32 %v305_v51, %v274_v47  ;;  %v377_v13 = vadd.f32 %v376_v10, %v346_v5  ;;  %v289_v47 = vld [vmem:[%s963_s15 + $0xc8] sm:$0xff]  ;;  %v290_v51 = vld [vmem:[%s963_s15 + $0xd0] sm:$0xff] }
  0x25   : > { %804 = vmatpush3.bf16.msra.mxu0 %v803_v61  ;;  %828 = vmatpush3.bf16.msra.mxu1 %v803_v61  ;;  %v362_v5 = vmul.f32 %v289_v47, %v289_v47 }
  0x26   : > { %v307_v62 = vadd.f32 %v306_v57, %v275_v54  ;;  %v378_v17 = vadd.f32 %v377_v13, %v347_v9  ;;  %v363_v9 = vmul.f32 %v290_v51, %v290_v51 }
  0x28   : > { %v308_v2 = vadd.f32 %v307_v62, %v276_v58  ;;  %v379_v21 = vadd.f32 %v378_v17, %v348_v3 }
  0x2a   : > { %v309_v7 = vadd.f32 %v308_v2, %v277_v63  ;;  %v380_v25 = vadd.f32 %v379_v21, %v349_v16  ;;  %v293_v63 = vld [vmem:[%s963_s15 + $0xe8] sm:$0xff] }
  0x2b   : > { %v366_v17 = vmul.f32 %v293_v63, %v293_v63 }
  0x2c   : > { %v310_v11 = vadd.f32 %v309_v7, %v278_v4  ;;  %v381_v29 = vadd.f32 %v380_v25, %v350_v20  ;;  %v294_v4 = vld [vmem:[%s963_s15 + $0xf0] sm:$0xff] }
  0x2d   : > { %v367_v20 = vmul.f32 %v294_v4, %v294_v4 }
  0x2e   : > { %v311_v14 = vadd.f32 %v310_v11, %v279_v8  ;;  %v382_v33 = vadd.f32 %v381_v29, %v351_v24  ;;  %v295_v8 = vld [vmem:[%s963_s15 + $0xf8] sm:$0xff] }
  0x30   : > { %v312_v18 = vadd.f32 %v311_v14, %v280_v12  ;;  %v383_v37 = vadd.f32 %v382_v33, %v352_v28  ;;  %v364_v12 = vmul.f32 %v291_v55, %v291_v55  ;;  %v365_v14 = vmul.f32 %v292_v59, %v292_v59  ;;  %v296_v28 = vld [vmem:[%s958_s12] sm:$0x1] }
  0x32   : > { %v313_v22 = vadd.f32 %v312_v18, %v281_v15  ;;  %v384_v41 = vadd.f32 %v383_v37, %v353_v32  ;;  %v336_v37 = vld [vmem:[%s968_s22] sm:$0x1] }
  0x34   : > { %v314_v26 = vadd.f32 %v313_v22, %v282_v19  ;;  %v385_v45 = vadd.f32 %v384_v41, %v354_v36 }
  0x36   : > { %v315_v30 = vadd.f32 %v314_v26, %v283_v23  ;;  %v386_v49 = vadd.f32 %v385_v45, %v355_v40  ;;  %v368_v23 = vmul.f32 %v295_v8, %v295_v8 }
  0x38   : > { %v316_v34 = vadd.f32 %v315_v30, %v284_v27  ;;  %v387_v53 = vadd.f32 %v386_v49, %v356_v44 }
  0x3a   : > { %v317_v38 = vadd.f32 %v316_v34, %v285_v31  ;;  %v388_v57 = vadd.f32 %v387_v53, %v357_v48  ;;  %v577_v53 = vld [vmem:[%s1072_s3] sm:$0x1] }
  0x3c   : > { %v318_v42 = vadd.f32 %v317_v38, %v286_v35  ;;  %v389_v61 = vadd.f32 %v388_v57, %v358_v52 }
  0x3e   : > { %v319_v46 = vadd.f32 %v318_v42, %v287_v39  ;;  %v390_v1 = vadd.f32 %v389_v61, %v359_v56 }
  0x40   : > { %v320_v50 = vadd.f32 %v319_v46, %v288_v43  ;;  %v391_v6 = vadd.f32 %v390_v1, %v360_v60 }
  0x42   : > { %v321_v54 = vadd.f32 %v320_v50, %v289_v47  ;;  %v392_v10 = vadd.f32 %v391_v6, %v361_v0  ;;  %v574_v50 = vld [vmem:[%s1071_s2] sm:$0x1] }
  0x44   : > { %v322_v58 = vadd.f32 %v321_v54, %v290_v51  ;;  %v393_v3 = vadd.f32 %v392_v10, %v362_v5 }
  0x46   : > { %v323_v62 = vadd.f32 %v322_v58, %v291_v55  ;;  %v394_v15 = vadd.f32 %v393_v3, %v363_v9 }
  0x48   : > { %v324_v2 = vadd.f32 %v323_v62, %v292_v59  ;;  %v395_v18 = vadd.f32 %v394_v15, %v364_v12 }
  0x4a   : > { %v325_v7 = vadd.f32 %v324_v2, %v293_v63  ;;  %v396_v21 = vadd.f32 %v395_v18, %v365_v14 }
  0x4c   : > { %v326_v11 = vadd.f32 %v325_v7, %v294_v4  ;;  %v397_v24 = vadd.f32 %v396_v21, %v366_v17 }
  0x4e   : > { %v327_v13 = vadd.f32 %v326_v11, %v295_v8  ;;  %v398_v26 = vadd.f32 %v397_v24, %v367_v20 }
  0x50   : > { %v328_v16 = vrot.slane %v327_v13, 4  ;;  %v399_v29 = vadd.f32 %v398_v26, %v368_v23 }
  0x52   : > { %v329_v19 = vadd.f32 %v328_v16, %v327_v13  ;;  %v400_v31 = vrot.slane %v399_v29, 4 }
  0x54   : > { %v330_v22 = vrot.slane %v329_v19, 2  ;;  %v401_v33 = vadd.f32 %v400_v31, %v399_v29 }
  0x56   : > { %v331_v25 = vadd.f32 %v330_v22, %v329_v19  ;;  %v402_v34 = vrot.slane %v401_v33, 2 }
  0x58   : > { %v332_v27 = vrot.slane %v331_v25, 1  ;;  %v403_v35 = vadd.f32 %v402_v34, %v401_v33 }
  0x5a   : > { %v333_v30 = vadd.f32 %v332_v27, %v331_v25  ;;  %v404_v36 = vrot.slane %v403_v35, 1 }
  0x5c   : > { %v334_v32 = vadd.f32 %v333_v30, %v296_v28  ;;  %v405_v38 = vadd.f32 %v404_v36, %v403_v35 }
  0x5e   : > { %335 = vst [vmem:[%s958_s12] sm:$0x1] %v334_v32  ;;  %v406_v40 = vadd.f32 %v405_v38, %v336_v37 }
  0x60   : > { %407 = vst [vmem:[%s968_s22] sm:$0x1] %v406_v40 }
  0x65   : > { %v411_v39 = vld [vmem:[%s958_s12] sm:$0x1] }
  0x66   : > { %744 = vmatmul.mubr.f32.vlgmr.msra.gmra.mrb[0].mxu0 %v411_v39 }
  0x67   : > { %v412_v41 = vld [vmem:[%s968_s22] sm:$0x1] }
  0x68   : > { %779 = vmatmul.mubr.f32.vlgmr.msra.gmra.mrb[0].mxu1 %v412_v41 }
 0x139   : > { %v495_v42 = vpop.f32.mrb[0].mxu0 }
 0x13a   : > { %v745_v43 = vpop.f32.mrb[1].mxu0  ;;  %v569_v44 = vmul.f32 %v495_v42, %v495_v42 }
 0x13b   : > { %v565_v45 = vpop.f32.mrb[0].mxu1 }
 0x13c   : > { %v570_v46 = vsub.f32 %v565_v45, %v569_v44  ;;  %v780_v47 = vpop.f32.mrb[1].mxu1 }
 0x13e   : > { %v571_v48 = vmax.f32 %v570_v46, 0.0 }
 0x140   : > { %v572_v49 = vadd.f32 1e-05, %v571_v48 }
 0x142   : > { %856 = vrsqrt.f32 %v572_v49 }
 0x14c   : > { %v857_v51 = vpop.eup %856 }
 0x14d   : > { %v575_v52 = vmul.f32 %v857_v51, %v574_v50 }
 0x14f   : > { %576 = vst [vmem:[%s958_s12] sm:$0x1] %v575_v52  ;;  %v578_v54 = vmul.f32 %v575_v52, %v495_v42 }
 0x151   : > { %v579_v55 = vsub.f32 %v577_v53, %v578_v54 }
 0x153   : > { %580 = vst [vmem:[%s968_s22] sm:$0x1] %v579_v55 }
 0x154 PF: > { %s16_s20 = sadd.s32 1, %s880_s20   ;;  %s1075_s18 = smov %s876_s19 }
 0x155   : > { %p13_p5 = scmp.ge.s32.totalorder %s16_s20, 4   ;;  %s1076_s19 = smov %s1078_s21 }
 0x157   :  { %15 = sbr.rel (!%p13_p5) target bundleno = 2 (0x2), region = 86 }

// kernel: _attn_block_impl.4
= control target key start
LH: loop header
LB: loop body
LE: loop exit
PB: predicated region body
PF: predicated region fallthrough
CT: control target
= control target key end

     0   :  { %s1813_s18 = smov 0   ;;  %s1815_s19 = smov 0   ;;  %s2265_s0 = inlined_call_operand.vmem [shape: f32[2,256,128], index: 0, kind: input, shape index: {}]   ;;  %s2266_s1 = inlined_call_operand.vmem [shape: f32[2,1,128], index: 1, kind: input, shape index: {}]   ;;  %s2267_s2 = inlined_call_operand.vmem [shape: f32[2,1,128], index: 2, kind: input, shape index: {}]   ;;  %s2268_s3 = inlined_call_operand.vmem [shape: bf16[128,384], index: 3, kind: input, shape index: {}]   ;;  %s2269_s4 = inlined_call_operand.vmem [shape: f32[1,384], index: 4, kind: input, shape index: {}]   ;;  %s2270_s5 = inlined_call_operand.vmem [shape: bf16[2,256,384], index: 5, kind: output, shape index: {}]  }
   0x1   :  { %s1817_s20 = smov 0  }
   0x2 LB: > { %s27_s21 = sadd.s32 1, %s1776_s19  ;;  %p1451_p0 = scmp.ge.s32.totalorder %s1780_s20, 1  ;;  %s1780_s20 = sphi %s1817_s20, %s15_s20   ;;  %s1776_s19 = sphi %s1815_s19, %s2272_s19   ;;  %s1772_s18 = sphi %s1813_s18, %s2271_s18  }
   0x3   : > { %p29_p1 = scmp.ge.s32.totalorder %s27_s21, 2  ;;  %p224_p2 = scmp.lt.s32.totalorder %s1780_s20, 3 }
   0x5   : > { %s2274_s21 = smov (%p29_p1, %s27_s21), 0  ;;  %p225_p3 = pnand %p1451_p0, %p224_p2 }
   0x6   : > { %v1726_v0 = vld [vmem:[%s2268_s3 + $0x4] ss:$12 sps:$4 sm:$0xff] (!%p225_p3)   ;;  %v1728_v1 = vld [vmem:[%s2268_s3] ss:$12 sps:$4 sm:$0xff] (!%p225_p3)   ;;  %v1782_v2 = vmov (!%p225_p3), 0   ;;  %p268_p4 = scmp.lt.s32.totalorder (!%p225_p3), %s1772_s18, 1 }
   0x7   : > { %228 = sbr.rel (%p225_p3) target bundleno = 348 (0x15c), region = 40  ;;  %630 = vmatprep.mubr.bf16.mxu0 (!%p225_p3), %v1782_v2  ;;  %750 = vmatprep.mubr.bf16.mxu1 (!%p225_p3), %v1782_v2  ;;  %v1729_v3 = vld [vmem:[%s2268_s3 + $0x1c] ss:$12 sps:$4 sm:$0xff] (!%p225_p3)   ;;  %v1731_v4 = vld [vmem:[%s2268_s3 + $0x18] ss:$12 sps:$4 sm:$0xff] (!%p225_p3)  }
   0x8   : > { %598 = vmatprep.subr.bf16.mxu0 (!%p225_p3), %v1726_v0  ;;  %1684 = vmatprep.subr.bf16.mxu1 (!%p225_p3), %v1726_v0  ;;  %v1732_v5 = vld [vmem:[%s2268_s3 + $0x34] ss:$12 sps:$4 sm:$0xff] (!%p225_p3)   ;;  %v1734_v6 = vld [vmem:[%s2268_s3 + $0x30] ss:$12 sps:$4 sm:$0xff] (!%p225_p3)   ;;  %v1735_v7 = vld [vmem:[%s2268_s3 + $0x4c] ss:$12 sps:$4 sm:$0xff] (!%p225_p3)  }
   0x9   : > { %599 = vmatpush1.bf16.msra.mxu0 (!%p225_p3), %v1728_v1  ;;  %1692 = vmatpush1.bf16.msra.mxu1 (!%p225_p3), %v1728_v1  ;;  %v1737_v8 = vld [vmem:[%s2268_s3 + $0x48] ss:$12 sps:$4 sm:$0xff] (!%p225_p3)   ;;  %v1738_v9 = vld [vmem:[%s2268_s3 + $0x64] ss:$12 sps:$4 sm:$0xff] (!%p225_p3)   ;;  %v1740_v10 = vld [vmem:[%s2268_s3 + $0x60] ss:$12 sps:$4 sm:$0xff] (!%p225_p3)  }
   0xa   : > { %600 = vmatprep.subr.bf16.mxu0 (!%p225_p3), %v1729_v3  ;;  %1685 = vmatprep.subr.bf16.mxu1 (!%p225_p3), %v1729_v3  ;;  %v1741_v11 = vld [vmem:[%s2268_s3 + $0x7c] ss:$12 sps:$4 sm:$0xff] (!%p225_p3)   ;;  %v1743_v12 = vld [vmem:[%s2268_s3 + $0x78] ss:$12 sps:$4 sm:$0xff] (!%p225_p3)   ;;  %v1744_v18 = vld [vmem:[%s2268_s3 + $0x94] ss:$12 sps:$4 sm:$0xff] (!%p225_p3)  }
   0xb   : > { %v1746_v19 = vld [vmem:[%s2268_s3 + $0x90] ss:$12 sps:$4 sm:$0xff] (!%p225_p3)   ;;  %v1747_v25 = vld [vmem:[%s2268_s3 + $0xac] ss:$12 sps:$4 sm:$0xff] (!%p225_p3)   ;;  %v1749_v33 = vld [vmem:[%s2268_s3 + $0xa8] ss:$12 sps:$4 sm:$0xff] (!%p225_p3)  }
   0xc   : > { %v1750_v35 = vld [vmem:[%s2268_s3 + $0x8] ss:$12 sps:$4 sm:$0xff] (!%p225_p3)   ;;  %v1751_v46 = vld [vmem:[%s2268_s3 + $0x20] ss:$12 sps:$4 sm:$0xff] (!%p225_p3)   ;;  %v1752_v3 = vld [vmem:[%s2268_s3 + $0x38] ss:$12 sps:$4 sm:$0xff] (!%p225_p3)  }
   0xd   : > { %601 = vmatpush1.bf16.msra.mxu0 (!%p225_p3), %v1731_v4  ;;  %1693 = vmatpush1.bf16.msra.mxu1 (!%p225_p3), %v1731_v4 }
   0xe   : > { %s2276_s18 = smov (!%p268_p4, %s1772_s18), 1  ;;  %602 = vmatprep.subr.bf16.mxu0 %v1732_v5  ;;  %1686 = vmatprep.subr.bf16.mxu1 %v1732_v5 }
   0xf   : > { %s1547_s13 = sshll.u32 %s2276_s18, 8  ;;  %s279_s27 = scalar_lea.vmem %s2266_s1, %s2276_s18 }
  0x10   : > { %s1866_s22 = scalar_lea.vmem %s2265_s0, %s1547_s13  ;;  %v1883_v15 = vld [vmem:[%s279_s27] ss:$0 sm:$0xff]  ;;  %s282_s11 = scalar_lea.vmem %s2267_s2, %s2276_s18 }
  0x11   : > { %603 = vmatpush1.bf16.msra.mxu0 %v1734_v6  ;;  %1694 = vmatpush1.bf16.msra.mxu1 %v1734_v6  ;;  %v295_v13 = vld [vmem:[%s1866_s22] sm:$0xff]  ;;  %v296_v14 = vld [vmem:[%s1866_s22 + $0x8] sm:$0xff]  ;;  %v297_v26 = vld [vmem:[%s1866_s22 + $0x10] sm:$0xff]  ;;  %s1700_s15 = smul.u32 384, %s2276_s18 }
  0x12   : > { %604 = vmatprep.subr.bf16.mxu0 %v1735_v7  ;;  %1687 = vmatprep.subr.bf16.mxu1 %v1735_v7  ;;  %v319_v16 = vld [vmem:[%s1866_s22 + $0xc0] sm:$0xff]  ;;  %v320_v17 = vld [vmem:[%s1866_s22 + $0xc8] sm:$0xff]  ;;  %v334_v20 = vmul.f32 %v1883_v15, %v295_v13  ;;  %v335_v21 = vmul.f32 %v1883_v15, %v296_v14  ;;  %v298_v31 = vld [vmem:[%s1866_s22 + $0x18] sm:$0xff]  ;;  %v336_v36 = vmul.f32 %v1883_v15, %v297_v26 }
  0x13   : > { %v358_v22 = vmul.f32 %v1883_v15, %v319_v16  ;;  %v359_v23 = vmul.f32 %v1883_v15, %v320_v17  ;;  %v1901_v24 = vld [vmem:[%s282_s11] ss:$0 sm:$0xff]  ;;  %v321_v32 = vld [vmem:[%s1866_s22 + $0xd0] sm:$0xff]  ;;  %v322_v34 = vld [vmem:[%s1866_s22 + $0xd8] sm:$0xff]  ;;  %v337_v37 = vmul.f32 %v1883_v15, %v298_v31  ;;  %s2094_s23 = scalar_lea.vmem %s2270_s5, %s1700_s15 }
  0x14   : > { %v373_v27 = vadd.f32 %v1901_v24, %v334_v20  ;;  %v374_v28 = vadd.f32 %v1901_v24, %v335_v21  ;;  %v360_v38 = vmul.f32 %v1883_v15, %v321_v32  ;;  %v313_v39 = vld [vmem:[%s1866_s22 + $0x90] sm:$0xff]  ;;  %v314_v40 = vld [vmem:[%s1866_s22 + $0x98] sm:$0xff]  ;;  %v361_v43 = vmul.f32 %v1883_v15, %v322_v34  ;;  %v315_v44 = vld [vmem:[%s1866_s22 + $0xa0] sm:$0xff] }
  0x15   : > { %605 = vmatpush1.bf16.msra.mxu0 %v1737_v8  ;;  %1695 = vmatpush1.bf16.msra.mxu1 %v1737_v8  ;;  %v397_v29 = vadd.f32 %v1901_v24, %v358_v22  ;;  %v398_v30 = vadd.f32 %v1901_v24, %v359_v23  ;;  %v316_v45 = vld [vmem:[%s1866_s22 + $0xa8] sm:$0xff]  ;;  %v375_v47 = vadd.f32 %v1901_v24, %v336_v36  ;;  %v317_v50 = vld [vmem:[%s1866_s22 + $0xb0] sm:$0xff]  ;;  %v299_v53 = vld [vmem:[%s1866_s22 + $0x20] sm:$0xff] }
  0x16   : > { %606 = vmatprep.subr.bf16.mxu0 %v1738_v9  ;;  %1688 = vmatprep.subr.bf16.mxu1 %v1738_v9  ;;  %v1925_v41 = vpack.c.bf16 %v374_v28, %v373_v27  ;;  %v352_v48 = vmul.f32 %v1883_v15, %v313_v39  ;;  %v353_v49 = vmul.f32 %v1883_v15, %v314_v40  ;;  %v318_v56 = vld [vmem:[%s1866_s22 + $0xb8] sm:$0xff]  ;;  %v300_v58 = vld [vmem:[%s1866_s22 + $0x28] sm:$0xff]  ;;  %v323_v61 = vld [vmem:[%s1866_s22 + $0xe0] sm:$0xff] }
  0x17   : > { %v1927_v42 = vpack.c.bf16 %v398_v30, %v397_v29  ;;  %v376_v51 = vadd.f32 %v1901_v24, %v337_v37  ;;  %v399_v52 = vadd.f32 %v1901_v24, %v360_v38  ;;  %v354_v54 = vmul.f32 %v1883_v15, %v315_v44  ;;  %v324_v62 = vld [vmem:[%s1866_s22 + $0xe8] sm:$0xff]  ;;  %v1753_v16 = vld [vmem:[%s2268_s3 + $0x50] ss:$12 sps:$4 sm:$0xff]   ;;  %v303_v39 = vld [vmem:[%s1866_s22 + $0x40] sm:$0xff] }
  0x18   : > { %v355_v55 = vmul.f32 %v1883_v15, %v316_v45  ;;  %v400_v57 = vadd.f32 %v1901_v24, %v361_v43  ;;  %v391_v59 = vadd.f32 %v1901_v24, %v352_v48  ;;  %v392_v60 = vadd.f32 %v1901_v24, %v353_v49  ;;  %v301_v22 = vld [vmem:[%s1866_s22 + $0x30] sm:$0xff]  ;;  %v302_v23 = vld [vmem:[%s1866_s22 + $0x38] sm:$0xff]  ;;  %v1755_v34 = vld [vmem:[%s2268_s3 + $0x80] ss:$12 sps:$4 sm:$0xff]  }
  0x19   : > { %607 = vmatpush1.bf16.msra.mxu0 %v1740_v10  ;;  %1696 = vmatpush1.bf16.msra.mxu1 %v1740_v10  ;;  %v393_v63 = vadd.f32 %v1901_v24, %v354_v54  ;;  %v356_v1 = vmul.f32 %v1883_v15, %v317_v50  ;;  %v338_v4 = vmul.f32 %v1883_v15, %v299_v53  ;;  %v326_v26 = vld [vmem:[%s1866_s22 + $0xf8] sm:$0xff]  ;;  %v1754_v27 = vld [vmem:[%s2268_s3 + $0x68] ss:$12 sps:$4 sm:$0xff]  }
  0x1a   : > { %608 = vmatprep.subr.bf16.mxu0 %v1741_v11  ;;  %1689 = vmatprep.subr.bf16.mxu1 %v1741_v11  ;;  %v394_v0 = vadd.f32 %v1901_v24, %v355_v55  ;;  %v1962_v5 = vpack.c.bf16 %v392_v60, %v391_v59  ;;  %v357_v6 = vmul.f32 %v1883_v15, %v318_v56  ;;  %v304_v40 = vld [vmem:[%s1866_s22 + $0x48] sm:$0xff]  ;;  %v1756_v43 = vld [vmem:[%s2268_s3 + $0x98] ss:$12 sps:$4 sm:$0xff]   ;;  %v1757_v48 = vld [vmem:[%s2268_s3 + $0xb0] ss:$12 sps:$4 sm:$0xff]  }
  0x1b   : > { %v1965_v7 = vpack.c.bf16 %v376_v51, %v375_v47  ;;  %v339_v8 = vmul.f32 %v1883_v15, %v300_v58  ;;  %v395_v10 = vadd.f32 %v1901_v24, %v356_v1  ;;  %v1971_v11 = vpack.c.bf16 %v400_v57, %v399_v52  ;;  %v305_v51 = vld [vmem:[%s1866_s22 + $0x50] sm:$0xff]  ;;  %v306_v52 = vld [vmem:[%s1866_s22 + $0x58] sm:$0xff]  ;;  %v308_v58 = vld [vmem:[%s1866_s22 + $0x68] sm:$0xff] }
  0x1c   : > { %v1968_v9 = vpack.c.bf16 %v394_v0, %v393_v63  ;;  %v363_v13 = vmul.f32 %v1883_v15, %v324_v62  ;;  %v396_v14 = vadd.f32 %v1901_v24, %v357_v6  ;;  %v340_v28 = vmul.f32 %v1883_v15, %v301_v22  ;;  %v309_v0 = vld [vmem:[%s1866_s22 + $0x70] sm:$0xff]  ;;  %v310_v1 = vld [vmem:[%s1866_s22 + $0x78] sm:$0xff] }
  0x1d   : > { %609 = vmatpush1.bf16.msra.mxu0 %v1743_v12  ;;  %1697 = vmatpush1.bf16.msra.mxu1 %v1743_v12  ;;  %v362_v12 = vmul.f32 %v1883_v15, %v323_v61  ;;  %v341_v29 = vmul.f32 %v1883_v15, %v302_v23  ;;  %v343_v47 = vmul.f32 %v1883_v15, %v304_v40 }
  0x1e   : > { %610 = vmatprep.subr.bf16.mxu0 %v1744_v18  ;;  %1690 = vmatprep.subr.bf16.mxu1 %v1744_v18  ;;  %v1979_v17 = vpack.c.bf16 %v396_v14, %v395_v10  ;;  %v377_v18 = vadd.f32 %v1901_v24, %v338_v4  ;;  %v402_v21 = vadd.f32 %v1901_v24, %v363_v13  ;;  %v312_v4 = vld [vmem:[%s1866_s22 + $0x88] sm:$0xff] }
  0x1f   : > { %v401_v20 = vadd.f32 %v1901_v24, %v362_v12  ;;  %v380_v36 = vadd.f32 %v1901_v24, %v341_v29  ;;  %v382_v50 = vadd.f32 %v1901_v24, %v343_v47  ;;  %v344_v54 = vmul.f32 %v1883_v15, %v305_v51 }
  0x20   : > { %v345_v55 = vmul.f32 %v1883_v15, %v306_v52  ;;  %v347_v61 = vmul.f32 %v1883_v15, %v308_v58  ;;  %v351_v12 = vmul.f32 %v1883_v15, %v312_v4 }
  0x21   : > { %611 = vmatpush1.bf16.msra.mxu0 %v1746_v19  ;;  %1698 = vmatpush1.bf16.msra.mxu1 %v1746_v19  ;;  %v378_v19 = vadd.f32 %v1901_v24, %v339_v8  ;;  %v1998_v31 = vpack.c.bf16 %v402_v21, %v401_v20  ;;  %v383_v56 = vadd.f32 %v1901_v24, %v344_v54 }
  0x22   : > { %612 = vmatprep.subr.bf16.mxu0 %v1747_v25  ;;  %1691 = vmatprep.subr.bf16.mxu1 %v1747_v25  ;;  %v325_v25 = vld [vmem:[%s1866_s22 + $0xf0] sm:$0xff]  ;;  %v384_v57 = vadd.f32 %v1901_v24, %v345_v55  ;;  %v386_v63 = vadd.f32 %v1901_v24, %v347_v61  ;;  %v349_v8 = vmul.f32 %v1883_v15, %v310_v1 }
  0x23   : > { %v407_v30 = vpack.c.bf16 %v378_v19, %v377_v18  ;;  %v364_v32 = vmul.f32 %v1883_v15, %v325_v25  ;;  %v390_v18 = vadd.f32 %v1901_v24, %v351_v12 }
  0x24   : > { %v410_v59 = vpack.c.bf16 %v384_v57, %v383_v56  ;;  %v388_v14 = vadd.f32 %v1901_v24, %v349_v8 }
  0x25   : > { %613 = vmatpush1.bf16.msra.mxu0 %v1749_v33  ;;  %1699 = vmatpush1.bf16.msra.mxu1 %v1749_v33  ;;  %v365_v33 = vmul.f32 %v1883_v15, %v326_v26  ;;  %v403_v37 = vadd.f32 %v1901_v24, %v364_v32 }
  0x26   : > { %1636 = vmatprep.subr.bf16.mxu1 %v1750_v35 }
  0x27   : > { %v404_v38 = vadd.f32 %v1901_v24, %v365_v33 }
  0x28   : > { %631 = vmatmul.mubr.bf16.vlgmr.msra.gmra.mrb[0].mxu0 %v1925_v41  ;;  %751 = vmatmul.mubr.bf16.vlgmr.msra.gmra.mrb[0].mxu1 %v1927_v42 }
  0x29   : > { %1637 = vmatpush3.bf16.msra.mxu1 %v1750_v35  ;;  %640 = vmatprep.mubr.bf16.mxu0 %v1782_v2  ;;  %v379_v35 = vadd.f32 %v1901_v24, %v340_v28  ;;  %v2017_v45 = vpack.c.bf16 %v404_v38, %v403_v37 }
  0x2a   : > { %1638 = vmatprep.subr.bf16.mxu1 %v1751_v46  ;;  %760 = vmatprep.mubr.bf16.mxu1 %v1782_v2 }
  0x2b   : > { %v408_v44 = vpack.c.bf16 %v380_v36, %v379_v35 }
  0x2d   : > { %1639 = vmatpush3.bf16.msra.mxu1 %v1751_v46  ;;  %v342_v46 = vmul.f32 %v1883_v15, %v303_v39 }
  0x2e   : > { %1640 = vmatprep.subr.bf16.mxu1 %v1752_v3 }
  0x2f   : > { %v381_v49 = vadd.f32 %v1901_v24, %v342_v46 }
  0x30   : > { %641 = vmatmul.mubr.bf16.gmra.mrb[4].mxu0 %v1965_v7  ;;  %761 = vmatmul.mubr.bf16.gmra.mrb[4].mxu1 %v1971_v11 }
  0x31   : > { %1641 = vmatpush3.bf16.msra.mxu1 %v1752_v3  ;;  %650 = vmatprep.mubr.bf16.mxu0 %v1782_v2  ;;  %v409_v53 = vpack.c.bf16 %v382_v50, %v381_v49  ;;  %v311_v3 = vld [vmem:[%s1866_s22 + $0x80] sm:$0xff] }
  0x32   : > { %1642 = vmatprep.subr.bf16.mxu1 %v1753_v16  ;;  %770 = vmatprep.mubr.bf16.mxu1 %v1782_v2  ;;  %v350_v10 = vmul.f32 %v1883_v15, %v311_v3 }
  0x35   : > { %1643 = vmatpush3.bf16.msra.mxu1 %v1753_v16  ;;  %v389_v16 = vadd.f32 %v1901_v24, %v350_v10 }
  0x36   : > { %1644 = vmatprep.subr.bf16.mxu1 %v1754_v27 }
  0x37   : > { %v413_v20 = vpack.c.bf16 %v390_v18, %v389_v16 }
  0x38   : > { %651 = vmatmul.mubr.bf16.gmra.mrb[8].mxu0 %v407_v30  ;;  %771 = vmatmul.mubr.bf16.gmra.mrb[8].mxu1 %v1998_v31 }
  0x39   : > { %1645 = vmatpush3.bf16.msra.mxu1 %v1754_v27  ;;  %660 = vmatprep.mubr.bf16.mxu0 %v1782_v2 }
  0x3a   : > { %1646 = vmatprep.subr.bf16.mxu1 %v1755_v34  ;;  %780 = vmatprep.mubr.bf16.mxu1 %v1782_v2 }
  0x3d   : > { %1647 = vmatpush3.bf16.msra.mxu1 %v1755_v34 }
  0x3e   : > { %1648 = vmatprep.subr.bf16.mxu1 %v1756_v43 }
  0x40   : > { %661 = vmatmul.mubr.bf16.gmra.mrb[12].mxu0 %v408_v44  ;;  %781 = vmatmul.mubr.bf16.gmra.mrb[12].mxu1 %v2017_v45 }
  0x41   : > { %1649 = vmatpush3.bf16.msra.mxu1 %v1756_v43  ;;  %670 = vmatprep.mubr.bf16.mxu0 %v1782_v2 }
  0x42   : > { %1650 = vmatprep.subr.bf16.mxu1 %v1757_v48  ;;  %1652 = vmatprep.mubr.bf16.mxu1 %v1925_v41  ;;  %v307_v41 = vld [vmem:[%s1866_s22 + $0x60] sm:$0xff] }
  0x43   : > { %v346_v60 = vmul.f32 %v1883_v15, %v307_v41 }
  0x45   : > { %1651 = vmatpush3.bf16.msra.mxu1 %v1757_v48  ;;  %v385_v62 = vadd.f32 %v1901_v24, %v346_v60 }
  0x47   : > { %v411_v6 = vpack.c.bf16 %v386_v63, %v385_v62 }
  0x48   : > { %671 = vmatmul.mubr.bf16.gmra.mrb[16].mxu0 %v409_v53  ;;  %1653 = vmatmul.mubr.bf16.vlgmr.msra.gmra.mrb[16].mxu1 %v1965_v7  ;;  %v348_v7 = vmul.f32 %v1883_v15, %v309_v0  ;;  %v455_v15 = vlaneseq }
  0x49   : > { %680 = vmatprep.mubr.bf16.mxu0 %v1782_v2  ;;  %1656 = vmatprep.mubr.bf16.mxu1 %v407_v30 }
  0x4a   : > { %v387_v13 = vadd.f32 %v1901_v24, %v348_v7  ;;  %v2071_v24 = vshrl.u32 %v455_v15, 7 }
  0x4c   : > { %v412_v19 = vpack.c.bf16 %v388_v14, %v387_v13 }
  0x50   : > { %681 = vmatmul.mubr.bf16.gmra.mrb[20].mxu0 %v410_v59  ;;  %1657 = vmatmul.mubr.bf16.gmra.mrb[20].mxu1 %v408_v44 }
  0x51   : > { %690 = vmatprep.mubr.bf16.mxu0 %v1782_v2  ;;  %1660 = vmatprep.mubr.bf16.mxu1 %v409_v53 }
  0x58   : > { %691 = vmatmul.mubr.bf16.gmra.mrb[24].mxu0 %v411_v6  ;;  %1661 = vmatmul.mubr.bf16.gmra.mrb[24].mxu1 %v410_v59 }
  0x59   : > { %700 = vmatprep.mubr.bf16.mxu0 %v1782_v2  ;;  %1664 = vmatprep.mubr.bf16.mxu1 %v411_v6 }
  0x60   : > { %701 = vmatmul.mubr.bf16.gmra.mrb[28].mxu0 %v412_v19  ;;  %1665 = vmatmul.mubr.bf16.gmra.mrb[28].mxu1 %v412_v19 }
  0x61   : > { %710 = vmatprep.mubr.bf16.mxu0 %v1782_v2  ;;  %1668 = vmatprep.mubr.bf16.mxu1 %v413_v20 }
  0x68   : > { %711 = vmatmul.mubr.bf16.gmra.mrb[32].mxu0 %v413_v20  ;;  %1669 = vmatmul.mubr.bf16.gmra.mrb[32].mxu1 %v1962_v5 }
  0x69   : > { %720 = vmatprep.mubr.bf16.mxu0 %v1782_v2  ;;  %1672 = vmatprep.mubr.bf16.mxu1 %v1968_v9 }
  0x70   : > { %721 = vmatmul.mubr.bf16.gmra.mrb[36].mxu0 %v1962_v5  ;;  %1673 = vmatmul.mubr.bf16.gmra.mrb[36].mxu1 %v1979_v17  ;;  %v457_v5 = vsub.s32 0, %v2071_v24 }
  0x71   : > { %730 = vmatprep.mubr.bf16.mxu0 %v1782_v2  ;;  %1676 = vmatprep.mubr.bf16.mxu1 %v1927_v42  ;;  %v2077_v42 = vld [vmem:[%s2269_s4] sm:$0x7] }
  0x78   : > { %731 = vmatmul.mubr.bf16.gmra.mrb[40].mxu0 %v1968_v9  ;;  %1677 = vmatmul.mubr.bf16.gmra.mrb[40].mxu1 %v1971_v11  ;;  %v461_v9 = vsub.s32 1, %v2071_v24 }
  0x79   : > { %740 = vmatprep.mubr.bf16.mxu0 %v1782_v2  ;;  %1680 = vmatprep.mubr.bf16.mxu1 %v1998_v31  ;;  %v2081_v2 = vrot.slane %v2077_v42, %v457_v5 }
  0x7a   : > { %v2084_v11 = vrot.slane %v2077_v42, %v461_v9 }
  0x80   : > { %741 = vmatmul.mubr.bf16.gmra.mrb[44].mxu0 %v1979_v17  ;;  %1681 = vmatmul.mubr.bf16.gmra.mrb[44].mxu1 %v2017_v45 }
  0xfb   : > { %v632_v17 = vpop.f32.mrb[0].mxu0  ;;  %v752_v21 = vpop.f32.mrb[0].mxu1 }
  0xfc   : > { %v633_v22 = vadd.f32 %v632_v17, %v2081_v2  ;;  %v753_v23 = vadd.f32 %v752_v21, %v2081_v2  ;;  %v634_v25 = vpop.f32.mrb[1].mxu0  ;;  %v754_v26 = vpop.f32.mrb[1].mxu1 }
  0xfd   : > { %v635_v27 = vadd.f32 %v634_v25, %v2084_v11  ;;  %v755_v28 = vadd.f32 %v754_v26, %v2084_v11  ;;  %v636_v29 = vpop.f32.mrb[2].mxu0  ;;  %v756_v30 = vpop.f32.mrb[2].mxu1 }
  0xfe   : > { %v637_v31 = vadd.f32 %v636_v29, %v2081_v2  ;;  %v757_v32 = vadd.f32 %v756_v30, %v2081_v2  ;;  %v638_v33 = vpop.f32.mrb[3].mxu0  ;;  %v758_v34 = vpop.f32.mrb[3].mxu1 }
  0xff   : > { %v1548_v35 = vpack.c.bf16 %v635_v27, %v633_v22  ;;  %v1596_v36 = vpack.c.bf16 %v755_v28, %v753_v23  ;;  %v639_v37 = vadd.f32 %v638_v33, %v2084_v11  ;;  %v759_v38 = vadd.f32 %v758_v34, %v2084_v11 }
 0x100   : > { %v465_v27 = vsub.s32 2, %v2071_v24 }
 0x101   : > { %1272 = vst [vmem:[%s2094_s23] sm:$0xff] %v1548_v35  ;;  %1320 = vst [vmem:[%s2094_s23 + $0x120] sm:$0xff] %v1596_v36  ;;  %v1550_v39 = vpack.c.bf16 %v639_v37, %v637_v31  ;;  %v1598_v40 = vpack.c.bf16 %v759_v38, %v757_v32 }
 0x103   : > { %1274 = vst [vmem:[%s2094_s23 + $0xc] sm:$0xff] %v1550_v39  ;;  %1322 = vst [vmem:[%s2094_s23 + $0x12c] sm:$0xff] %v1598_v40  ;;  %v642_v43 = vpop.f32.mrb[4].mxu0  ;;  %v762_v44 = vpop.f32.mrb[4].mxu1  ;;  %v2138_v39 = vrot.slane %v2077_v42, %v465_v27 }
 0x104   : > { %v643_v45 = vadd.f32 %v642_v43, %v2081_v2  ;;  %v763_v46 = vadd.f32 %v762_v44, %v2081_v2  ;;  %v644_v47 = vpop.f32.mrb[5].mxu0  ;;  %v764_v48 = vpop.f32.mrb[5].mxu1 }
 0x105   : > { %v645_v49 = vadd.f32 %v644_v47, %v2084_v11  ;;  %v765_v50 = vadd.f32 %v764_v48, %v2084_v11  ;;  %v646_v51 = vpop.f32.mrb[6].mxu0  ;;  %v766_v52 = vpop.f32.mrb[6].mxu1 }
 0x106   : > { %v647_v53 = vadd.f32 %v646_v51, %v2081_v2  ;;  %v767_v54 = vadd.f32 %v766_v52, %v2081_v2  ;;  %v648_v55 = vpop.f32.mrb[7].mxu0  ;;  %v768_v56 = vpop.f32.mrb[7].mxu1 }
 0x107   : > { %v1552_v57 = vpack.c.bf16 %v645_v49, %v643_v45  ;;  %v1600_v41 = vpack.c.bf16 %v765_v50, %v763_v46  ;;  %v649_v58 = vadd.f32 %v648_v55, %v2084_v11  ;;  %v769_v59 = vadd.f32 %v768_v56, %v2084_v11 }
 0x109   : > { %1276 = vst [vmem:[%s2094_s23 + $0x18] sm:$0xff] %v1552_v57  ;;  %1324 = vst [vmem:[%s2094_s23 + $0x138] sm:$0xff] %v1600_v41  ;;  %v1554_v60 = vpack.c.bf16 %v649_v58, %v647_v53  ;;  %v1602_v61 = vpack.c.bf16 %v769_v59, %v767_v54 }
 0x10b   : > { %1278 = vst [vmem:[%s2094_s23 + $0x24] sm:$0xff] %v1554_v60  ;;  %1326 = vst [vmem:[%s2094_s23 + $0x144] sm:$0xff] %v1602_v61  ;;  %v652_v62 = vpop.f32.mrb[8].mxu0  ;;  %v772_v63 = vpop.f32.mrb[8].mxu1 }
 0x10c   : > { %v653_v0 = vadd.f32 %v652_v62, %v2081_v2  ;;  %v773_v1 = vadd.f32 %v772_v63, %v2081_v2  ;;  %v654_v3 = vpop.f32.mrb[9].mxu0  ;;  %v774_v4 = vpop.f32.mrb[9].mxu1 }
 0x10d   : > { %v655_v6 = vadd.f32 %v654_v3, %v2084_v11  ;;  %v775_v7 = vadd.f32 %v774_v4, %v2084_v11  ;;  %v656_v8 = vpop.f32.mrb[10].mxu0  ;;  %v776_v10 = vpop.f32.mrb[10].mxu1 }
 0x10e   : > { %v657_v12 = vadd.f32 %v656_v8, %v2081_v2  ;;  %v777_v13 = vadd.f32 %v776_v10, %v2081_v2  ;;  %v658_v14 = vpop.f32.mrb[11].mxu0  ;;  %v778_v16 = vpop.f32.mrb[11].mxu1 }
 0x10f   : > { %v1556_v18 = vpack.c.bf16 %v655_v6, %v653_v0  ;;  %v1604_v19 = vpack.c.bf16 %v775_v7, %v773_v1  ;;  %v659_v20 = vadd.f32 %v658_v14, %v2084_v11  ;;  %v779_v15 = vadd.f32 %v778_v16, %v2084_v11 }
 0x111   : > { %1280 = vst [vmem:[%s2094_s23 + $0x30] sm:$0xff] %v1556_v18  ;;  %1328 = vst [vmem:[%s2094_s23 + $0x150] sm:$0xff] %v1604_v19  ;;  %v1558_v5 = vpack.c.bf16 %v659_v20, %v657_v12  ;;  %v1606_v9 = vpack.c.bf16 %v779_v15, %v777_v13 }
 0x113   : > { %1282 = vst [vmem:[%s2094_s23 + $0x3c] sm:$0xff] %v1558_v5  ;;  %1330 = vst [vmem:[%s2094_s23 + $0x15c] sm:$0xff] %v1606_v9  ;;  %v662_v17 = vpop.f32.mrb[12].mxu0  ;;  %v782_v21 = vpop.f32.mrb[12].mxu1 }
 0x114   : > { %v663_v22 = vadd.f32 %v662_v17, %v2081_v2  ;;  %v783_v23 = vadd.f32 %v782_v21, %v2081_v2  ;;  %v664_v25 = vpop.f32.mrb[13].mxu0  ;;  %v784_v26 = vpop.f32.mrb[13].mxu1 }
 0x115   : > { %v665_v28 = vadd.f32 %v664_v25, %v2084_v11  ;;  %v785_v29 = vadd.f32 %v784_v26, %v2084_v11  ;;  %v666_v30 = vpop.f32.mrb[14].mxu0  ;;  %v786_v31 = vpop.f32.mrb[14].mxu1 }
 0x116   : > { %v667_v32 = vadd.f32 %v666_v30, %v2081_v2  ;;  %v787_v33 = vadd.f32 %v786_v31, %v2081_v2  ;;  %v668_v34 = vpop.f32.mrb[15].mxu0  ;;  %v788_v35 = vpop.f32.mrb[15].mxu1 }
 0x117   : > { %v1560_v36 = vpack.c.bf16 %v665_v28, %v663_v22  ;;  %v1608_v37 = vpack.c.bf16 %v785_v29, %v783_v23  ;;  %v669_v38 = vadd.f32 %v668_v34, %v2084_v11  ;;  %v789_v24 = vadd.f32 %v788_v35, %v2084_v11 }
 0x119   : > { %1284 = vst [vmem:[%s2094_s23 + $0x48] sm:$0xff] %v1560_v36  ;;  %1332 = vst [vmem:[%s2094_s23 + $0x168] sm:$0xff] %v1608_v37  ;;  %v1562_v40 = vpack.c.bf16 %v669_v38, %v667_v32  ;;  %v1610_v43 = vpack.c.bf16 %v789_v24, %v787_v33 }
 0x11b   : > { %1286 = vst [vmem:[%s2094_s23 + $0x54] sm:$0xff] %v1562_v40  ;;  %1334 = vst [vmem:[%s2094_s23 + $0x174] sm:$0xff] %v1610_v43  ;;  %v672_v44 = vpop.f32.mrb[16].mxu0  ;;  %v1654_v45 = vpop.f32.mrb[16].mxu1 }
 0x11c   : > { %v673_v46 = vadd.f32 %v672_v44, %v2081_v2  ;;  %v834_v47 = vadd.f32 %v1654_v45, %v2138_v39  ;;  %v674_v48 = vpop.f32.mrb[17].mxu0  ;;  %v825_v49 = vpop.f32.mrb[17].mxu1 }
 0x11d   : > { %v675_v50 = vadd.f32 %v674_v48, %v2084_v11  ;;  %v826_v42 = vadd.f32 %v825_v49, %v2138_v39  ;;  %v676_v51 = vpop.f32.mrb[18].mxu0  ;;  %v1655_v52 = vpop.f32.mrb[18].mxu1 }
 0x11e   : > { %v1553_v53 = vpack.c.bf16 %v834_v47, %v834_v47  ;;  %v677_v54 = vadd.f32 %v676_v51, %v2081_v2  ;;  %v837_v55 = vadd.f32 %v1655_v52, %v2138_v39  ;;  %v678_v56 = vpop.f32.mrb[19].mxu0  ;;  %v828_v57 = vpop.f32.mrb[19].mxu1 }
 0x11f   : > { %v1564_v41 = vpack.c.bf16 %v675_v50, %v673_v46  ;;  %v1549_v58 = vpack.c.bf16 %v826_v42, %v826_v42  ;;  %v679_v59 = vadd.f32 %v678_v56, %v2084_v11  ;;  %v829_v60 = vadd.f32 %v828_v57, %v2138_v39 }
 0x120   : > { %1277 = vst [vmem:[%s2094_s23 + $0x20] sm:$0xf] %v1553_v53  ;;  %v1555_v61 = vpack.c.bf16 %v837_v55, %v837_v55 }
 0x121   : > { %1288 = vst [vmem:[%s2094_s23 + $0x60] sm:$0xff] %v1564_v41  ;;  %1273 = vst [vmem:[%s2094_s23 + $0x8] sm:$0xf] %v1549_v58  ;;  %v1566_v62 = vpack.c.bf16 %v679_v59, %v677_v54  ;;  %v1551_v63 = vpack.c.bf16 %v829_v60, %v829_v60 }
 0x122   : > { %1279 = vst [vmem:[%s2094_s23 + $0x2c] sm:$0xf] %v1555_v61 }
 0x123   : > { %1290 = vst [vmem:[%s2094_s23 + $0x6c] sm:$0xff] %v1566_v62  ;;  %1275 = vst [vmem:[%s2094_s23 + $0x14] sm:$0xf] %v1551_v63  ;;  %v682_v0 = vpop.f32.mrb[20].mxu0  ;;  %v1658_v1 = vpop.f32.mrb[20].mxu1 }
 0x124   : > { %v683_v3 = vadd.f32 %v682_v0, %v2081_v2  ;;  %v850_v4 = vadd.f32 %v1658_v1, %v2138_v39  ;;  %v684_v6 = vpop.f32.mrb[21].mxu0  ;;  %v841_v7 = vpop.f32.mrb[21].mxu1 }
 0x125   : > { %v685_v8 = vadd.f32 %v684_v6, %v2084_v11  ;;  %v842_v10 = vadd.f32 %v841_v7, %v2138_v39  ;;  %v686_v12 = vpop.f32.mrb[22].mxu0  ;;  %v1659_v13 = vpop.f32.mrb[22].mxu1 }
 0x126   : > { %v1561_v14 = vpack.c.bf16 %v850_v4, %v850_v4  ;;  %v687_v16 = vadd.f32 %v686_v12, %v2081_v2  ;;  %v853_v18 = vadd.f32 %v1659_v13, %v2138_v39  ;;  %v688_v19 = vpop.f32.mrb[23].mxu0  ;;  %v844_v20 = vpop.f32.mrb[23].mxu1 }
 0x127   : > { %v1568_v15 = vpack.c.bf16 %v685_v8, %v683_v3  ;;  %v1557_v5 = vpack.c.bf16 %v842_v10, %v842_v10  ;;  %v689_v9 = vadd.f32 %v688_v19, %v2084_v11  ;;  %v845_v17 = vadd.f32 %v844_v20, %v2138_v39 }
 0x128   : > { %1285 = vst [vmem:[%s2094_s23 + $0x50] sm:$0xf] %v1561_v14  ;;  %v1563_v21 = vpack.c.bf16 %v853_v18, %v853_v18 }
 0x129   : > { %1292 = vst [vmem:[%s2094_s23 + $0x78] sm:$0xff] %v1568_v15  ;;  %1281 = vst [vmem:[%s2094_s23 + $0x38] sm:$0xf] %v1557_v5  ;;  %v1570_v22 = vpack.c.bf16 %v689_v9, %v687_v16  ;;  %v1559_v23 = vpack.c.bf16 %v845_v17, %v845_v17 }
 0x12a   : > { %1287 = vst [vmem:[%s2094_s23 + $0x5c] sm:$0xf] %v1563_v21 }
 0x12b   : > { %1294 = vst [vmem:[%s2094_s23 + $0x84] sm:$0xff] %v1570_v22  ;;  %1283 = vst [vmem:[%s2094_s23 + $0x44] sm:$0xf] %v1559_v23  ;;  %v692_v25 = vpop.f32.mrb[24].mxu0  ;;  %v1662_v26 = vpop.f32.mrb[24].mxu1 }
 0x12c   : > { %v693_v27 = vadd.f32 %v692_v25, %v2081_v2  ;;  %v866_v28 = vadd.f32 %v1662_v26, %v2138_v39  ;;  %v694_v29 = vpop.f32.mrb[25].mxu0  ;;  %v857_v30 = vpop.f32.mrb[25].mxu1 }
 0x12d   : > { %v695_v31 = vadd.f32 %v694_v29, %v2084_v11  ;;  %v858_v32 = vadd.f32 %v857_v30, %v2138_v39  ;;  %v696_v33 = vpop.f32.mrb[26].mxu0  ;;  %v1663_v34 = vpop.f32.mrb[26].mxu1 }
 0x12e   : > { %v1569_v35 = vpack.c.bf16 %v866_v28, %v866_v28  ;;  %v697_v36 = vadd.f32 %v696_v33, %v2081_v2  ;;  %v869_v37 = vadd.f32 %v1663_v34, %v2138_v39  ;;  %v698_v38 = vpop.f32.mrb[27].mxu0  ;;  %v860_v24 = vpop.f32.mrb[27].mxu1 }
 0x12f   : > { %v1572_v40 = vpack.c.bf16 %v695_v31, %v693_v27  ;;  %v1565_v43 = vpack.c.bf16 %v858_v32, %v858_v32  ;;  %v699_v44 = vadd.f32 %v698_v38, %v2084_v11  ;;  %v861_v45 = vadd.f32 %v860_v24, %v2138_v39 }
 0x130   : > { %1293 = vst [vmem:[%s2094_s23 + $0x80] sm:$0xf] %v1569_v35  ;;  %v1571_v46 = vpack.c.bf16 %v869_v37, %v869_v37 }
 0x131   : > { %1296 = vst [vmem:[%s2094_s23 + $0x90] sm:$0xff] %v1572_v40  ;;  %1289 = vst [vmem:[%s2094_s23 + $0x68] sm:$0xf] %v1565_v43  ;;  %v1574_v47 = vpack.c.bf16 %v699_v44, %v697_v36  ;;  %v1567_v48 = vpack.c.bf16 %v861_v45, %v861_v45 }
 0x132   : > { %1295 = vst [vmem:[%s2094_s23 + $0x8c] sm:$0xf] %v1571_v46 }
 0x133   : > { %1298 = vst [vmem:[%s2094_s23 + $0x9c] sm:$0xff] %v1574_v47  ;;  %1291 = vst [vmem:[%s2094_s23 + $0x74] sm:$0xf] %v1567_v48  ;;  %v702_v49 = vpop.f32.mrb[28].mxu0  ;;  %v1666_v50 = vpop.f32.mrb[28].mxu1 }
 0x134   : > { %v703_v42 = vadd.f32 %v702_v49, %v2081_v2  ;;  %v882_v51 = vadd.f32 %v1666_v50, %v2138_v39  ;;  %v704_v52 = vpop.f32.mrb[29].mxu0  ;;  %v873_v53 = vpop.f32.mrb[29].mxu1 }
 0x135   : > { %v705_v54 = vadd.f32 %v704_v52, %v2084_v11  ;;  %v874_v55 = vadd.f32 %v873_v53, %v2138_v39  ;;  %v706_v56 = vpop.f32.mrb[30].mxu0  ;;  %v1667_v57 = vpop.f32.mrb[30].mxu1 }
 0x136   : > { %v1577_v41 = vpack.c.bf16 %v882_v51, %v882_v51  ;;  %v707_v58 = vadd.f32 %v706_v56, %v2081_v2  ;;  %v885_v59 = vadd.f32 %v1667_v57, %v2138_v39  ;;  %v708_v60 = vpop.f32.mrb[31].mxu0  ;;  %v876_v61 = vpop.f32.mrb[31].mxu1 }
 0x137   : > { %v1576_v62 = vpack.c.bf16 %v705_v54, %v703_v42  ;;  %v1573_v63 = vpack.c.bf16 %v874_v55, %v874_v55  ;;  %v709_v0 = vadd.f32 %v708_v60, %v2084_v11  ;;  %v877_v1 = vadd.f32 %v876_v61, %v2138_v39 }
 0x138   : > { %1301 = vst [vmem:[%s2094_s23 + $0xb0] sm:$0xf] %v1577_v41  ;;  %v1579_v3 = vpack.c.bf16 %v885_v59, %v885_v59 }
 0x139   : > { %1300 = vst [vmem:[%s2094_s23 + $0xa8] sm:$0xff] %v1576_v62  ;;  %1297 = vst [vmem:[%s2094_s23 + $0x98] sm:$0xf] %v1573_v63  ;;  %v1578_v4 = vpack.c.bf16 %v709_v0, %v707_v58  ;;  %v1575_v6 = vpack.c.bf16 %v877_v1, %v877_v1 }
 0x13a   : > { %1303 = vst [vmem:[%s2094_s23 + $0xbc] sm:$0xf] %v1579_v3 }
 0x13b   : > { %1302 = vst [vmem:[%s2094_s23 + $0xb4] sm:$0xff] %v1578_v4  ;;  %1299 = vst [vmem:[%s2094_s23 + $0xa4] sm:$0xf] %v1575_v6  ;;  %v712_v7 = vpop.f32.mrb[32].mxu0  ;;  %v1670_v8 = vpop.f32.mrb[32].mxu1 }
 0x13c   : > { %v713_v10 = vadd.f32 %v712_v7, %v2081_v2  ;;  %v898_v12 = vadd.f32 %v1670_v8, %v2138_v39  ;;  %v714_v13 = vpop.f32.mrb[33].mxu0  ;;  %v889_v14 = vpop.f32.mrb[33].mxu1 }
 0x13d   : > { %v715_v16 = vadd.f32 %v714_v13, %v2084_v11  ;;  %v890_v18 = vadd.f32 %v889_v14, %v2138_v39  ;;  %v716_v19 = vpop.f32.mrb[34].mxu0  ;;  %v1671_v20 = vpop.f32.mrb[34].mxu1 }
 0x13e   : > { %v1585_v15 = vpack.c.bf16 %v898_v12, %v898_v12  ;;  %v717_v5 = vadd.f32 %v716_v19, %v2081_v2  ;;  %v901_v9 = vadd.f32 %v1671_v20, %v2138_v39  ;;  %v718_v17 = vpop.f32.mrb[35].mxu0  ;;  %v892_v21 = vpop.f32.mrb[35].mxu1 }
 0x13f   : > { %v1580_v22 = vpack.c.bf16 %v715_v16, %v713_v10  ;;  %v1581_v23 = vpack.c.bf16 %v890_v18, %v890_v18  ;;  %v719_v25 = vadd.f32 %v718_v17, %v2084_v11  ;;  %v893_v26 = vadd.f32 %v892_v21, %v2138_v39 }
 0x140   : > { %1309 = vst [vmem:[%s2094_s23 + $0xe0] sm:$0xf] %v1585_v15  ;;  %v1587_v27 = vpack.c.bf16 %v901_v9, %v901_v9 }
 0x141   : > { %1304 = vst [vmem:[%s2094_s23 + $0xc0] sm:$0xff] %v1580_v22  ;;  %1305 = vst [vmem:[%s2094_s23 + $0xc8] sm:$0xf] %v1581_v23  ;;  %v1582_v28 = vpack.c.bf16 %v719_v25, %v717_v5  ;;  %v1583_v29 = vpack.c.bf16 %v893_v26, %v893_v26 }
 0x142   : > { %1311 = vst [vmem:[%s2094_s23 + $0xec] sm:$0xf] %v1587_v27 }
 0x143   : > { %1306 = vst [vmem:[%s2094_s23 + $0xcc] sm:$0xff] %v1582_v28  ;;  %1307 = vst [vmem:[%s2094_s23 + $0xd4] sm:$0xf] %v1583_v29  ;;  %v722_v30 = vpop.f32.mrb[36].mxu0  ;;  %v1674_v31 = vpop.f32.mrb[36].mxu1 }
 0x144   : > { %v723_v32 = vadd.f32 %v722_v30, %v2081_v2  ;;  %v914_v33 = vadd.f32 %v1674_v31, %v2138_v39  ;;  %v724_v34 = vpop.f32.mrb[37].mxu0  ;;  %v905_v35 = vpop.f32.mrb[37].mxu1 }
 0x145   : > { %v725_v36 = vadd.f32 %v724_v34, %v2084_v11  ;;  %v906_v37 = vadd.f32 %v905_v35, %v2138_v39  ;;  %v726_v38 = vpop.f32.mrb[38].mxu0  ;;  %v1675_v24 = vpop.f32.mrb[38].mxu1 }
 0x146   : > { %v1593_v40 = vpack.c.bf16 %v914_v33, %v914_v33  ;;  %v727_v43 = vadd.f32 %v726_v38, %v2081_v2  ;;  %v917_v44 = vadd.f32 %v1675_v24, %v2138_v39  ;;  %v728_v45 = vpop.f32.mrb[39].mxu0  ;;  %v908_v46 = vpop.f32.mrb[39].mxu1 }
 0x147   : > { %v1584_v47 = vpack.c.bf16 %v725_v36, %v723_v32  ;;  %v1589_v48 = vpack.c.bf16 %v906_v37, %v906_v37  ;;  %v729_v49 = vadd.f32 %v728_v45, %v2084_v11  ;;  %v909_v50 = vadd.f32 %v908_v46, %v2138_v39 }
 0x148   : > { %1317 = vst [vmem:[%s2094_s23 + $0x110] sm:$0xf] %v1593_v40  ;;  %v1595_v42 = vpack.c.bf16 %v917_v44, %v917_v44 }
 0x149   : > { %1308 = vst [vmem:[%s2094_s23 + $0xd8] sm:$0xff] %v1584_v47  ;;  %1313 = vst [vmem:[%s2094_s23 + $0xf8] sm:$0xf] %v1589_v48  ;;  %v1586_v51 = vpack.c.bf16 %v729_v49, %v727_v43  ;;  %v1591_v52 = vpack.c.bf16 %v909_v50, %v909_v50 }
 0x14a   : > { %1319 = vst [vmem:[%s2094_s23 + $0x11c] sm:$0xf] %v1595_v42 }
 0x14b   : > { %1310 = vst [vmem:[%s2094_s23 + $0xe4] sm:$0xff] %v1586_v51  ;;  %1315 = vst [vmem:[%s2094_s23 + $0x104] sm:$0xf] %v1591_v52  ;;  %v732_v53 = vpop.f32.mrb[40].mxu0  ;;  %v1678_v54 = vpop.f32.mrb[40].mxu1 }
 0x14c   : > { %v733_v55 = vadd.f32 %v732_v53, %v2081_v2  ;;  %v930_v56 = vadd.f32 %v1678_v54, %v2138_v39  ;;  %v734_v57 = vpop.f32.mrb[41].mxu0  ;;  %v921_v41 = vpop.f32.mrb[41].mxu1 }
 0x14d   : > { %v735_v58 = vadd.f32 %v734_v57, %v2084_v11  ;;  %v922_v59 = vadd.f32 %v921_v41, %v2138_v39  ;;  %v736_v60 = vpop.f32.mrb[42].mxu0  ;;  %v1679_v61 = vpop.f32.mrb[42].mxu1 }
 0x14e   : > { %v1601_v62 = vpack.c.bf16 %v930_v56, %v930_v56  ;;  %v737_v63 = vadd.f32 %v736_v60, %v2081_v2  ;;  %v933_v0 = vadd.f32 %v1679_v61, %v2138_v39  ;;  %v738_v1 = vpop.f32.mrb[43].mxu0  ;;  %v924_v3 = vpop.f32.mrb[43].mxu1 }
 0x14f   : > { %v1588_v4 = vpack.c.bf16 %v735_v58, %v733_v55  ;;  %v1597_v6 = vpack.c.bf16 %v922_v59, %v922_v59  ;;  %v739_v7 = vadd.f32 %v738_v1, %v2084_v11  ;;  %v925_v8 = vadd.f32 %v924_v3, %v2138_v39 }
 0x150   : > { %1325 = vst [vmem:[%s2094_s23 + $0x140] sm:$0xf] %v1601_v62  ;;  %v1603_v10 = vpack.c.bf16 %v933_v0, %v933_v0 }
 0x151   : > { %1312 = vst [vmem:[%s2094_s23 + $0xf0] sm:$0xff] %v1588_v4  ;;  %1321 = vst [vmem:[%s2094_s23 + $0x128] sm:$0xf] %v1597_v6  ;;  %v1590_v12 = vpack.c.bf16 %v739_v7, %v737_v63  ;;  %v1599_v13 = vpack.c.bf16 %v925_v8, %v925_v8 }
 0x152   : > { %1327 = vst [vmem:[%s2094_s23 + $0x14c] sm:$0xf] %v1603_v10 }
 0x153   : > { %1314 = vst [vmem:[%s2094_s23 + $0xfc] sm:$0xff] %v1590_v12  ;;  %1323 = vst [vmem:[%s2094_s23 + $0x134] sm:$0xf] %v1599_v13  ;;  %v742_v14 = vpop.f32.mrb[44].mxu0  ;;  %v1682_v16 = vpop.f32.mrb[44].mxu1 }
 0x154   : > { %v743_v18 = vadd.f32 %v742_v14, %v2081_v2  ;;  %v946_v19 = vadd.f32 %v1682_v16, %v2138_v39  ;;  %v744_v20 = vpop.f32.mrb[45].mxu0  ;;  %v937_v15 = vpop.f32.mrb[45].mxu1 }
 0x155   : > { %v745_v5 = vadd.f32 %v744_v20, %v2084_v11  ;;  %v938_v9 = vadd.f32 %v937_v15, %v2138_v39  ;;  %v746_v17 = vpop.f32.mrb[46].mxu0  ;;  %v1683_v21 = vpop.f32.mrb[46].mxu1 }
 0x156   : > { %v1609_v22 = vpack.c.bf16 %v946_v19, %v946_v19  ;;  %v747_v23 = vadd.f32 %v746_v17, %v2081_v2  ;;  %v949_v25 = vadd.f32 %v1683_v21, %v2138_v39  ;;  %v748_v26 = vpop.f32.mrb[47].mxu0  ;;  %v940_v27 = vpop.f32.mrb[47].mxu1 }
 0x157   : > { %v1592_v28 = vpack.c.bf16 %v745_v5, %v743_v18  ;;  %v1605_v29 = vpack.c.bf16 %v938_v9, %v938_v9  ;;  %v749_v30 = vadd.f32 %v748_v26, %v2084_v11  ;;  %v941_v31 = vadd.f32 %v940_v27, %v2138_v39 }
 0x158   : > { %1333 = vst [vmem:[%s2094_s23 + $0x170] sm:$0xf] %v1609_v22  ;;  %v1611_v32 = vpack.c.bf16 %v949_v25, %v949_v25 }
 0x159   : > { %1316 = vst [vmem:[%s2094_s23 + $0x108] sm:$0xff] %v1592_v28  ;;  %1329 = vst [vmem:[%s2094_s23 + $0x158] sm:$0xf] %v1605_v29  ;;  %v1594_v33 = vpack.c.bf16 %v749_v30, %v747_v23  ;;  %v1607_v34 = vpack.c.bf16 %v941_v31, %v941_v31 }
 0x15a   : > { %1335 = vst [vmem:[%s2094_s23 + $0x17c] sm:$0xf] %v1611_v32 }
 0x15b   : > { %1318 = vst [vmem:[%s2094_s23 + $0x114] sm:$0xff] %v1594_v33  ;;  %1331 = vst [vmem:[%s2094_s23 + $0x164] sm:$0xf] %v1607_v34 }
 0x15c PF: > { %s15_s20 = sadd.s32 1, %s1780_s20   ;;  %s2271_s18 = smov %s1776_s19 }
 0x15d   : > { %p12_p5 = scmp.ge.s32.totalorder %s15_s20, 4   ;;  %s2272_s19 = smov %s2274_s21 }
 0x15f   :  { %14 = sbr.rel (!%p12_p5) target bundleno = 2 (0x2), region = 76 }

// kernel: _attn_block_impl.5
= control target key start
LH: loop header
LB: loop body
LE: loop exit
PB: predicated region body
PF: predicated region fallthrough
CT: control target
= control target key end

     0   :  { %s3323_s21 = smov 0   ;;  %s3325_s22 = smov 0   ;;  %s4259_s0 = inlined_call_operand.vmem [shape: bf16[2,256,384], index: 0, kind: input, shape index: {}, may-alias: {0,1,2}]   ;;  %s4260_s1 = inlined_call_operand.vmem [shape: bf16[2,256,384], index: 1, kind: input, shape index: {}, may-alias: {0,1,2}]   ;;  %s4261_s2 = inlined_call_operand.vmem [shape: bf16[2,256,384], index: 2, kind: input, shape index: {}, may-alias: {0,1,2}]   ;;  %s4262_s3 = inlined_call_operand.vmem [shape: f32[2,256,128], index: 3, kind: input, shape index: {}, may-alias: {3,6}]   ;;  %s4263_s4 = inlined_call_operand.vmem [shape: bf16[128,128], index: 4, kind: input, shape index: {}]   ;;  %s4264_s5 = inlined_call_operand.vmem [shape: f32[1,128], index: 5, kind: input, shape index: {}]   ;;  %s4265_s6 = inlined_call_operand.vmem [shape: f32[2,256,128], index: 6, kind: output, shape index: {}, may-alias: {3,6}]  }
   0x1   :  { %s3327_s23 = smov 0   ;;  %s3329_s24 = smov 0  }
   0x2   :  { %s3331_s25 = smov 0  }
   0x3 LB: > { %s28_s26 = sadd.s32 1, %s3282_s24  ;;  %p44_p1 = scmp.ne.s32.totalorder %s3274_s22, %s3270_s21  ;;  %s3286_s25 = sphi %s3331_s25, %s16_s25   ;;  %s3282_s24 = sphi %s3329_s24, %s4309_s24   ;;  %s3278_s23 = sphi %s3327_s23, %s4308_s23   ;;  %s3274_s22 = sphi %s3325_s22, %s4307_s22   ;;  %s3270_s21 = sphi %s3323_s21, %s4306_s21  }
   0x4   : > { %p30_p0 = scmp.ge.s32.totalorder %s28_s26, 2  ;;  %p45_p2 = scmp.eq.s32.totalorder %s3286_s25, 0 }
   0x5   : > { %s37_s29 = sadd.s32 1, %s3274_s22  ;;  %p2571_p5 = scmp.ge.s32.totalorder %s3286_s25, 2 }
   0x6   : > { %s4311_s26 = smov (%p30_p0, %s28_s26), 0  ;;  %p3354_p3 = por %p45_p2, %p44_p1 }
   0x7   : > { %s32_s28 = ssub.s32 %s3282_s24, %s4311_s26  ;;  %226 = sbr.rel (%p2571_p5) target bundleno = 92 (0x5c), region = 24 }
   0x8   : > { %p35_p4 = scmp.eq.s32.totalorder %s32_s28, 0 }
   0xa   : > { %s3362_s30 = scalar_select %p35_p4, %s3274_s22, %s37_s29  }
   0xe   : > { %229 = sbr.rel (!%p3354_p3) target bundleno = 40 (0x28), region = 28  ;;  %s231_s7 = sand.u32 (%p3354_p3), 1, %s3274_s22  }
   0xf   : > { %s2959_s8 = smul.u32 (%p3354_p3), 384, %s3282_s24  ;;  %s2572_s9 = sshll.u32 (%p3354_p3), %s231_s7, 7 }
  0x10   : > { %s3377_s13 = scalar_lea.vmem (%p3354_p3), [#allocation2], %s2572_s9 }
  0x11   : > { %s3372_s12 = scalar_lea.vmem (%p3354_p3), %s4259_s0, %s2959_s8 }
  0x12   : > { %v255_v0 = vld [vmem:[%s3372_s12] sm:$0xf] (%p3354_p3)  ;;  %v257_v1 = vld [vmem:[%s3372_s12 + $0xc] sm:$0xf] (%p3354_p3)  ;;  %v259_v2 = vld [vmem:[%s3372_s12 + $0x18] sm:$0xf] (%p3354_p3) }
  0x13   : > { %256 = vst [vmem:[%s3377_s13] sm:$0xf] (%p3354_p3), %v255_v0  ;;  %258 = vst [vmem:[%s3377_s13 + $0x4] sm:$0xf] (%p3354_p3), %v257_v1  ;;  %v261_v3 = vld [vmem:[%s3372_s12 + $0x24] sm:$0xf] (%p3354_p3) }
  0x14   : > { %260 = vst [vmem:[%s3377_s13 + $0x8] sm:$0xf] (%p3354_p3), %v259_v2  ;;  %v263_v4 = vld [vmem:[%s3372_s12 + $0x30] sm:$0xf] (%p3354_p3)  ;;  %v265_v5 = vld [vmem:[%s3372_s12 + $0x3c] sm:$0xf] (%p3354_p3) }
  0x15   : > { %262 = vst [vmem:[%s3377_s13 + $0xc] sm:$0xf] %v261_v3  ;;  %264 = vst [vmem:[%s3377_s13 + $0x10] sm:$0xf] %v263_v4  ;;  %v267_v6 = vld [vmem:[%s3372_s12 + $0x48] sm:$0xf] }
  0x16   : > { %266 = vst [vmem:[%s3377_s13 + $0x14] sm:$0xf] %v265_v5  ;;  %v269_v7 = vld [vmem:[%s3372_s12 + $0x54] sm:$0xf]  ;;  %v271_v8 = vld [vmem:[%s3372_s12 + $0x60] sm:$0xf] }
  0x17   : > { %268 = vst [vmem:[%s3377_s13 + $0x18] sm:$0xf] %v267_v6  ;;  %270 = vst [vmem:[%s3377_s13 + $0x1c] sm:$0xf] %v269_v7  ;;  %v273_v9 = vld [vmem:[%s3372_s12 + $0x6c] sm:$0xf] }
  0x18   : > { %272 = vst [vmem:[%s3377_s13 + $0x20] sm:$0xf] %v271_v8  ;;  %v275_v10 = vld [vmem:[%s3372_s12 + $0x78] sm:$0xf]  ;;  %v277_v11 = vld [vmem:[%s3372_s12 + $0x84] sm:$0xf] }
  0x19   : > { %274 = vst [vmem:[%s3377_s13 + $0x24] sm:$0xf] %v273_v9  ;;  %276 = vst [vmem:[%s3377_s13 + $0x28] sm:$0xf] %v275_v10  ;;  %v279_v12 = vld [vmem:[%s3372_s12 + $0x90] sm:$0xf] }
  0x1a   : > { %278 = vst [vmem:[%s3377_s13 + $0x2c] sm:$0xf] %v277_v11  ;;  %v281_v13 = vld [vmem:[%s3372_s12 + $0x9c] sm:$0xf]  ;;  %v283_v14 = vld [vmem:[%s3372_s12 + $0xa8] sm:$0xf] }
  0x1b   : > { %280 = vst [vmem:[%s3377_s13 + $0x30] sm:$0xf] %v279_v12  ;;  %282 = vst [vmem:[%s3377_s13 + $0x34] sm:$0xf] %v281_v13  ;;  %v285_v15 = vld [vmem:[%s3372_s12 + $0xb4] sm:$0xf] }
  0x1c   : > { %284 = vst [vmem:[%s3377_s13 + $0x38] sm:$0xf] %v283_v14  ;;  %v287_v16 = vld [vmem:[%s3372_s12 + $0xc0] sm:$0xf]  ;;  %v289_v17 = vld [vmem:[%s3372_s12 + $0xcc] sm:$0xf] }
  0x1d   : > { %286 = vst [vmem:[%s3377_s13 + $0x3c] sm:$0xf] %v285_v15  ;;  %288 = vst [vmem:[%s3377_s13 + $0x40] sm:$0xf] %v287_v16  ;;  %v291_v18 = vld [vmem:[%s3372_s12 + $0xd8] sm:$0xf] }
  0x1e   : > { %290 = vst [vmem:[%s3377_s13 + $0x44] sm:$0xf] %v289_v17  ;;  %v293_v19 = vld [vmem:[%s3372_s12 + $0xe4] sm:$0xf]  ;;  %v295_v20 = vld [vmem:[%s3372_s12 + $0xf0] sm:$0xf] }
  0x1f   : > { %292 = vst [vmem:[%s3377_s13 + $0x48] sm:$0xf] %v291_v18  ;;  %294 = vst [vmem:[%s3377_s13 + $0x4c] sm:$0xf] %v293_v19  ;;  %v297_v21 = vld [vmem:[%s3372_s12 + $0xfc] sm:$0xf] }
  0x20   : > { %296 = vst [vmem:[%s3377_s13 + $0x50] sm:$0xf] %v295_v20  ;;  %v299_v22 = vld [vmem:[%s3372_s12 + $0x108] sm:$0xf]  ;;  %v301_v23 = vld [vmem:[%s3372_s12 + $0x114] sm:$0xf] }
  0x21   : > { %298 = vst [vmem:[%s3377_s13 + $0x54] sm:$0xf] %v297_v21  ;;  %300 = vst [vmem:[%s3377_s13 + $0x58] sm:$0xf] %v299_v22  ;;  %v303_v24 = vld [vmem:[%s3372_s12 + $0x120] sm:$0xf] }
  0x22   : > { %302 = vst [vmem:[%s3377_s13 + $0x5c] sm:$0xf] %v301_v23  ;;  %v305_v25 = vld [vmem:[%s3372_s12 + $0x12c] sm:$0xf]  ;;  %v307_v26 = vld [vmem:[%s3372_s12 + $0x138] sm:$0xf] }
  0x23   : > { %304 = vst [vmem:[%s3377_s13 + $0x60] sm:$0xf] %v303_v24  ;;  %306 = vst [vmem:[%s3377_s13 + $0x64] sm:$0xf] %v305_v25  ;;  %v309_v27 = vld [vmem:[%s3372_s12 + $0x144] sm:$0xf] }
  0x24   : > { %308 = vst [vmem:[%s3377_s13 + $0x68] sm:$0xf] %v307_v26  ;;  %v311_v28 = vld [vmem:[%s3372_s12 + $0x150] sm:$0xf]  ;;  %v313_v29 = vld [vmem:[%s3372_s12 + $0x15c] sm:$0xf] }
  0x25   : > { %310 = vst [vmem:[%s3377_s13 + $0x6c] sm:$0xf] %v309_v27  ;;  %312 = vst [vmem:[%s3377_s13 + $0x70] sm:$0xf] %v311_v28  ;;  %v315_v30 = vld [vmem:[%s3372_s12 + $0x168] sm:$0xf] }
  0x26   : > { %314 = vst [vmem:[%s3377_s13 + $0x74] sm:$0xf] %v313_v29  ;;  %v317_v31 = vld [vmem:[%s3372_s12 + $0x174] sm:$0xf]  ;;  %316 = vst [vmem:[%s3377_s13 + $0x78] sm:$0xf] %v315_v30 }
  0x27   : > { %318 = vst [vmem:[%s3377_s13 + $0x7c] sm:$0xf] %v317_v31 }
  0x28 PF: > { %405 = sbr.rel (!%p3354_p3) target bundleno = 66 (0x42), region = 69  ;;  %s407_s14 = sand.u32 (%p3354_p3), 1, %s3274_s22  }
  0x29   : > { %s2575_s15 = smul.u32 (%p3354_p3), 384, %s3282_s24  ;;  %s2574_s16 = sshll.u32 (%p3354_p3), %s407_s14, 7 }
  0x2a   : > { %s3452_s20 = scalar_lea.vmem (%p3354_p3), [#allocation3], %s2574_s16 }
  0x2b   : > { %s3447_s19 = scalar_lea.vmem (%p3354_p3), %s4260_s1, %s2575_s15 }
  0x2c   : > { %v2576_v32 = vld [vmem:[%s3447_s19 + $0x4] sm:$0xf] (%p3354_p3)  ;;  %v2577_v33 = vld [vmem:[%s3447_s19 + $0x10] sm:$0xf] (%p3354_p3)  ;;  %v2578_v34 = vld [vmem:[%s3447_s19 + $0x1c] sm:$0xf] (%p3354_p3) }
  0x2d   : > { %430 = vst [vmem:[%s3452_s20] sm:$0xf] (%p3354_p3), %v2576_v32  ;;  %432 = vst [vmem:[%s3452_s20 + $0x4] sm:$0xf] (%p3354_p3), %v2577_v33  ;;  %v2579_v35 = vld [vmem:[%s3447_s19 + $0x28] sm:$0xf] (%p3354_p3) }
  0x2e   : > { %434 = vst [vmem:[%s3452_s20 + $0x8] sm:$0xf] (%p3354_p3), %v2578_v34  ;;  %v2580_v36 = vld [vmem:[%s3447_s19 + $0x34] sm:$0xf] (%p3354_p3)  ;;  %v2581_v37 = vld [vmem:[%s3447_s19 + $0x40] sm:$0xf] (%p3354_p3) }
  0x2f   : > { %436 = vst [vmem:[%s3452_s20 + $0xc] sm:$0xf] %v2579_v35  ;;  %438 = vst [vmem:[%s3452_s20 + $0x10] sm:$0xf] %v2580_v36  ;;  %v2582_v38 = vld [vmem:[%s3447_s19 + $0x4c] sm:$0xf] }
  0x30   : > { %440 = vst [vmem:[%s3452_s20 + $0x14] sm:$0xf] %v2581_v37  ;;  %v2583_v39 = vld [vmem:[%s3447_s19 + $0x58] sm:$0xf]  ;;  %v2584_v40 = vld [vmem:[%s3447_s19 + $0x64] sm:$0xf] }
  0x31   : > { %442 = vst [vmem:[%s3452_s20 + $0x18] sm:$0xf] %v2582_v38  ;;  %444 = vst [vmem:[%s3452_s20 + $0x1c] sm:$0xf] %v2583_v39  ;;  %v2585_v41 = vld [vmem:[%s3447_s19 + $0x70] sm:$0xf] }
  0x32   : > { %446 = vst [vmem:[%s3452_s20 + $0x20] sm:$0xf] %v2584_v40  ;;  %v2586_v42 = vld [vmem:[%s3447_s19 + $0x7c] sm:$0xf]  ;;  %v2587_v43 = vld [vmem:[%s3447_s19 + $0x88] sm:$0xf] }
  0x33   : > { %448 = vst [vmem:[%s3452_s20 + $0x24] sm:$0xf] %v2585_v41  ;;  %450 = vst [vmem:[%s3452_s20 + $0x28] sm:$0xf] %v2586_v42  ;;  %v2588_v44 = vld [vmem:[%s3447_s19 + $0x94] sm:$0xf] }
  0x34   : > { %452 = vst [vmem:[%s3452_s20 + $0x2c] sm:$0xf] %v2587_v43  ;;  %v2589_v45 = vld [vmem:[%s3447_s19 + $0xa0] sm:$0xf]  ;;  %v2590_v46 = vld [vmem:[%s3447_s19 + $0xac] sm:$0xf] }
  0x35   : > { %454 = vst [vmem:[%s3452_s20 + $0x30] sm:$0xf] %v2588_v44  ;;  %456 = vst [vmem:[%s3452_s20 + $0x34] sm:$0xf] %v2589_v45  ;;  %v2591_v47 = vld [vmem:[%s3447_s19 + $0xb8] sm:$0xf] }
  0x36   : > { %458 = vst [vmem:[%s3452_s20 + $0x38] sm:$0xf] %v2590_v46  ;;  %v2592_v48 = vld [vmem:[%s3447_s19 + $0xc4] sm:$0xf]  ;;  %v2593_v49 = vld [vmem:[%s3447_s19 + $0xd0] sm:$0xf] }
  0x37   : > { %460 = vst [vmem:[%s3452_s20 + $0x3c] sm:$0xf] %v2591_v47  ;;  %462 = vst [vmem:[%s3452_s20 + $0x40] sm:$0xf] %v2592_v48  ;;  %v2594_v50 = vld [vmem:[%s3447_s19 + $0xdc] sm:$0xf] }
  0x38   : > { %464 = vst [vmem:[%s3452_s20 + $0x44] sm:$0xf] %v2593_v49  ;;  %v2595_v51 = vld [vmem:[%s3447_s19 + $0xe8] sm:$0xf]  ;;  %v2596_v52 = vld [vmem:[%s3447_s19 + $0xf4] sm:$0xf] }
  0x39   : > { %466 = vst [vmem:[%s3452_s20 + $0x48] sm:$0xf] %v2594_v50  ;;  %468 = vst [vmem:[%s3452_s20 + $0x4c] sm:$0xf] %v2595_v51  ;;  %v2597_v53 = vld [vmem:[%s3447_s19 + $0x100] sm:$0xf] }
  0x3a   : > { %470 = vst [vmem:[%s3452_s20 + $0x50] sm:$0xf] %v2596_v52  ;;  %v2598_v54 = vld [vmem:[%s3447_s19 + $0x10c] sm:$0xf]  ;;  %v2599_v55 = vld [vmem:[%s3447_s19 + $0x118] sm:$0xf] }
  0x3b   : > { %472 = vst [vmem:[%s3452_s20 + $0x54] sm:$0xf] %v2597_v53  ;;  %474 = vst [vmem:[%s3452_s20 + $0x58] sm:$0xf] %v2598_v54  ;;  %v2600_v56 = vld [vmem:[%s3447_s19 + $0x124] sm:$0xf] }
  0x3c   : > { %476 = vst [vmem:[%s3452_s20 + $0x5c] sm:$0xf] %v2599_v55  ;;  %v2601_v57 = vld [vmem:[%s3447_s19 + $0x130] sm:$0xf]  ;;  %v2602_v58 = vld [vmem:[%s3447_s19 + $0x13c] sm:$0xf] }
  0x3d   : > { %478 = vst [vmem:[%s3452_s20 + $0x60] sm:$0xf] %v2600_v56  ;;  %480 = vst [vmem:[%s3452_s20 + $0x64] sm:$0xf] %v2601_v57  ;;  %v2603_v59 = vld [vmem:[%s3447_s19 + $0x148] sm:$0xf] }
  0x3e   : > { %482 = vst [vmem:[%s3452_s20 + $0x68] sm:$0xf] %v2602_v58  ;;  %v2604_v60 = vld [vmem:[%s3447_s19 + $0x154] sm:$0xf]  ;;  %v2605_v61 = vld [vmem:[%s3447_s19 + $0x160] sm:$0xf] }
  0x3f   : > { %484 = vst [vmem:[%s3452_s20 + $0x6c] sm:$0xf] %v2603_v59  ;;  %486 = vst [vmem:[%s3452_s20 + $0x70] sm:$0xf] %v2604_v60  ;;  %v2606_v62 = vld [vmem:[%s3447_s19 + $0x16c] sm:$0xf] }
  0x40   : > { %488 = vst [vmem:[%s3452_s20 + $0x74] sm:$0xf] %v2605_v61  ;;  %v2607_v63 = vld [vmem:[%s3447_s19 + $0x178] sm:$0xf]  ;;  %490 = vst [vmem:[%s3452_s20 + $0x78] sm:$0xf] %v2606_v62 }
  0x41   : > { %492 = vst [vmem:[%s3452_s20 + $0x7c] sm:$0xf] %v2607_v63 }
  0x42 PF: > { %579 = sbr.rel (!%p3354_p3) target bundleno = 92 (0x5c), region = 110  ;;  %s581_s28 = sand.u32 (%p3354_p3), 1, %s3274_s22  }
  0x43   : > { %s2609_s29 = smul.u32 (%p3354_p3), 384, %s3282_s24  ;;  %s2608_s7 = sshll.u32 (%p3354_p3), %s581_s28, 7 }
  0x44   : > { %s3527_s27 = scalar_lea.vmem (%p3354_p3), [#allocation4], %s2608_s7 }
  0x45   : > { %s3522_s10 = scalar_lea.vmem (%p3354_p3), %s4261_s2, %s2609_s29 }
  0x46   : > { %v2610_v0 = vld [vmem:[%s3522_s10 + $0x8] sm:$0xf] (%p3354_p3)  ;;  %v2611_v1 = vld [vmem:[%s3522_s10 + $0x14] sm:$0xf] (%p3354_p3)  ;;  %v2612_v2 = vld [vmem:[%s3522_s10 + $0x20] sm:$0xf] (%p3354_p3) }
  0x47   : > { %604 = vst [vmem:[%s3527_s27] sm:$0xf] (%p3354_p3), %v2610_v0  ;;  %606 = vst [vmem:[%s3527_s27 + $0x4] sm:$0xf] (%p3354_p3), %v2611_v1  ;;  %v2613_v3 = vld [vmem:[%s3522_s10 + $0x2c] sm:$0xf] (%p3354_p3) }
  0x48   : > { %608 = vst [vmem:[%s3527_s27 + $0x8] sm:$0xf] (%p3354_p3), %v2612_v2  ;;  %v2614_v4 = vld [vmem:[%s3522_s10 + $0x38] sm:$0xf] (%p3354_p3)  ;;  %v2615_v5 = vld [vmem:[%s3522_s10 + $0x44] sm:$0xf] (%p3354_p3) }
  0x49   : > { %610 = vst [vmem:[%s3527_s27 + $0xc] sm:$0xf] %v2613_v3  ;;  %612 = vst [vmem:[%s3527_s27 + $0x10] sm:$0xf] %v2614_v4  ;;  %v2616_v6 = vld [vmem:[%s3522_s10 + $0x50] sm:$0xf] }
  0x4a   : > { %614 = vst [vmem:[%s3527_s27 + $0x14] sm:$0xf] %v2615_v5  ;;  %v2617_v7 = vld [vmem:[%s3522_s10 + $0x5c] sm:$0xf]  ;;  %v2618_v8 = vld [vmem:[%s3522_s10 + $0x68] sm:$0xf] }
  0x4b   : > { %616 = vst [vmem:[%s3527_s27 + $0x18] sm:$0xf] %v2616_v6  ;;  %618 = vst [vmem:[%s3527_s27 + $0x1c] sm:$0xf] %v2617_v7  ;;  %v2619_v9 = vld [vmem:[%s3522_s10 + $0x74] sm:$0xf] }
  0x4c   : > { %620 = vst [vmem:[%s3527_s27 + $0x20] sm:$0xf] %v2618_v8  ;;  %v2620_v10 = vld [vmem:[%s3522_s10 + $0x80] sm:$0xf]  ;;  %v2621_v11 = vld [vmem:[%s3522_s10 + $0x8c] sm:$0xf] }
  0x4d   : > { %622 = vst [vmem:[%s3527_s27 + $0x24] sm:$0xf] %v2619_v9  ;;  %624 = vst [vmem:[%s3527_s27 + $0x28] sm:$0xf] %v2620_v10  ;;  %v2622_v12 = vld [vmem:[%s3522_s10 + $0x98] sm:$0xf] }
  0x4e   : > { %626 = vst [vmem:[%s3527_s27 + $0x2c] sm:$0xf] %v2621_v11  ;;  %v2623_v13 = vld [vmem:[%s3522_s10 + $0xa4] sm:$0xf]  ;;  %v2624_v14 = vld [vmem:[%s3522_s10 + $0xb0] sm:$0xf] }
  0x4f   : > { %628 = vst [vmem:[%s3527_s27 + $0x30] sm:$0xf] %v2622_v12  ;;  %630 = vst [vmem:[%s3527_s27 + $0x34] sm:$0xf] %v2623_v13  ;;  %v2625_v15 = vld [vmem:[%s3522_s10 + $0xbc] sm:$0xf] }
  0x50   : > { %632 = vst [vmem:[%s3527_s27 + $0x38] sm:$0xf] %v2624_v14  ;;  %v2626_v16 = vld [vmem:[%s3522_s10 + $0xc8] sm:$0xf]  ;;  %v2627_v17 = vld [vmem:[%s3522_s10 + $0xd4] sm:$0xf] }
  0x51   : > { %634 = vst [vmem:[%s3527_s27 + $0x3c] sm:$0xf] %v2625_v15  ;;  %636 = vst [vmem:[%s3527_s27 + $0x40] sm:$0xf] %v2626_v16  ;;  %v2628_v18 = vld [vmem:[%s3522_s10 + $0xe0] sm:$0xf] }
  0x52   : > { %638 = vst [vmem:[%s3527_s27 + $0x44] sm:$0xf] %v2627_v17  ;;  %v2629_v19 = vld [vmem:[%s3522_s10 + $0xec] sm:$0xf]  ;;  %v2630_v20 = vld [vmem:[%s3522_s10 + $0xf8] sm:$0xf] }
  0x53   : > { %640 = vst [vmem:[%s3527_s27 + $0x48] sm:$0xf] %v2628_v18  ;;  %642 = vst [vmem:[%s3527_s27 + $0x4c] sm:$0xf] %v2629_v19  ;;  %v2631_v21 = vld [vmem:[%s3522_s10 + $0x104] sm:$0xf] }
  0x54   : > { %644 = vst [vmem:[%s3527_s27 + $0x50] sm:$0xf] %v2630_v20  ;;  %v2632_v22 = vld [vmem:[%s3522_s10 + $0x110] sm:$0xf]  ;;  %v2633_v23 = vld [vmem:[%s3522_s10 + $0x11c] sm:$0xf] }
  0x55   : > { %646 = vst [vmem:[%s3527_s27 + $0x54] sm:$0xf] %v2631_v21  ;;  %648 = vst [vmem:[%s3527_s27 + $0x58] sm:$0xf] %v2632_v22  ;;  %v2634_v24 = vld [vmem:[%s3522_s10 + $0x128] sm:$0xf] }
  0x56   : > { %650 = vst [vmem:[%s3527_s27 + $0x5c] sm:$0xf] %v2633_v23  ;;  %v2635_v25 = vld [vmem:[%s3522_s10 + $0x134] sm:$0xf]  ;;  %v2636_v26 = vld [vmem:[%s3522_s10 + $0x140] sm:$0xf] }
  0x57   : > { %652 = vst [vmem:[%s3527_s27 + $0x60] sm:$0xf] %v2634_v24  ;;  %654 = vst [vmem:[%s3527_s27 + $0x64] sm:$0xf] %v2635_v25  ;;  %v2637_v27 = vld [vmem:[%s3522_s10 + $0x14c] sm:$0xf] }
  0x58   : > { %656 = vst [vmem:[%s3527_s27 + $0x68] sm:$0xf] %v2636_v26  ;;  %v2638_v28 = vld [vmem:[%s3522_s10 + $0x158] sm:$0xf]  ;;  %v2639_v29 = vld [vmem:[%s3522_s10 + $0x164] sm:$0xf] }
  0x59   : > { %658 = vst [vmem:[%s3527_s27 + $0x6c] sm:$0xf] %v2637_v27  ;;  %660 = vst [vmem:[%s3527_s27 + $0x70] sm:$0xf] %v2638_v28  ;;  %v2640_v30 = vld [vmem:[%s3522_s10 + $0x170] sm:$0xf] }
  0x5a   : > { %662 = vst [vmem:[%s3527_s27 + $0x74] sm:$0xf] %v2639_v29  ;;  %v2641_v31 = vld [vmem:[%s3522_s10 + $0x17c] sm:$0xf]  ;;  %664 = vst [vmem:[%s3527_s27 + $0x78] sm:$0xf] %v2640_v30 }
  0x5b   : > { %666 = vst [vmem:[%s3527_s27 + $0x7c] sm:$0xf] %v2641_v31 }
  0x5c PF: > { %p2642_p6 = scmp.ge.s32.totalorder %s3286_s25, 1  ;;  %p765_p7 = scmp.lt.s32.totalorder %s3286_s25, 3 }
  0x5e   : > { %p766_p8 = pnand %p2642_p6, %p765_p7 }
  0x60   : > { %769 = sbr.rel (%p766_p8) target bundleno = 1112 (0x458), region = 155 }
  0x67   : > { %s772_s11 = sand.u32 1, %s3270_s21   ;;  %p838_p9 = scmp.lt.s32.totalorder %s3278_s23, 1 }
  0x68   : > { %s3593_s12 = sshll.u32 %s772_s11, 7 }
  0x69   : > { %s3596_s13 = scalar_lea.vmem [#allocation3], %s3593_s12  ;;  %s3606_s21 = scalar_lea.vmem [#allocation2], %s3593_s12 }
  0x6a   : > { %v3000_v32 = vld [vmem:[%s3596_s13 + $0x40] sm:$0xff]   ;;  %v3002_v34 = vld [vmem:[%s3596_s13 + $0x48] sm:$0xff]   ;;  %v3004_v36 = vld [vmem:[%s3596_s13 + $0x50] sm:$0xff]   ;;  %s3634_s14 = scalar_lea.vmem [#allocation4], %s3593_s12  ;;  %s4313_s23 = smov (!%p838_p9, %s3278_s23), 1 }
  0x6b   : > { %v3001_v33 = vld [vmem:[%s3596_s13] sm:$0xff]   ;;  %2711 = vmatprep.subr.bf16.mxu0 %v3000_v32  ;;  %v3003_v35 = vld [vmem:[%s3596_s13 + $0x8] sm:$0xff]   ;;  %v3005_v37 = vld [vmem:[%s3596_s13 + $0x10] sm:$0xff]  }
  0x6c   : > { %2712 = vmatpush3.bf16.xpose.msra.mxu0 %v3001_v33  ;;  %v3006_v38 = vld [vmem:[%s3596_s13 + $0x58] sm:$0xff]   ;;  %v3016_v39 = vld [vmem:[%s3606_s21] sm:$0xff]   ;;  %v3010_v43 = vld [vmem:[%s3596_s13 + $0x68] sm:$0xff]  }
  0x6d   : > { %2713 = vmatprep.subr.bf16.mxu0 %v3002_v34  ;;  %2727 = vmatprep.mubr.bf16.mxu0 %v3016_v39  ;;  %v3007_v40 = vld [vmem:[%s3596_s13 + $0x18] sm:$0xff]   ;;  %v3008_v41 = vld [vmem:[%s3596_s13 + $0x60] sm:$0xff]   ;;  %v3011_v44 = vld [vmem:[%s3596_s13 + $0x28] sm:$0xff]  }
  0x6e   : > { %v3009_v42 = vld [vmem:[%s3596_s13 + $0x20] sm:$0xff]   ;;  %v3012_v45 = vld [vmem:[%s3596_s13 + $0x70] sm:$0xff]   ;;  %v3014_v47 = vld [vmem:[%s3596_s13 + $0x78] sm:$0xff]  }
  0x6f   : > { %v3013_v46 = vld [vmem:[%s3596_s13 + $0x30] sm:$0xff]   ;;  %v3015_v48 = vld [vmem:[%s3596_s13 + $0x38] sm:$0xff]   ;;  %v3017_v49 = vld [vmem:[%s3606_s21 + $0x8] sm:$0xff]  }
  0x70   : > { %v3018_v50 = vld [vmem:[%s3606_s21 + $0x10] sm:$0xff]   ;;  %v3019_v51 = vld [vmem:[%s3606_s21 + $0x18] sm:$0xff]   ;;  %v3020_v52 = vld [vmem:[%s3606_s21 + $0x20] sm:$0xff]  }
  0x71   : > { %v3021_v53 = vld [vmem:[%s3606_s21 + $0x28] sm:$0xff]   ;;  %v3022_v54 = vld [vmem:[%s3606_s21 + $0x30] sm:$0xff]   ;;  %v3023_v55 = vld [vmem:[%s3606_s21 + $0x38] sm:$0xff]  }
  0x72   : > { %v3024_v56 = vld [vmem:[%s3606_s21 + $0x40] sm:$0xff]   ;;  %v3025_v57 = vld [vmem:[%s3606_s21 + $0x48] sm:$0xff]   ;;  %v3026_v58 = vld [vmem:[%s3606_s21 + $0x50] sm:$0xff]  }
  0x73   : > { %v3027_v59 = vld [vmem:[%s3606_s21 + $0x58] sm:$0xff]   ;;  %v3028_v60 = vld [vmem:[%s3606_s21 + $0x60] sm:$0xff]   ;;  %v3029_v61 = vld [vmem:[%s3606_s21 + $0x68] sm:$0xff]  }
  0x74   : > { %2714 = vmatpush3.bf16.xpose.msra.mxu0 %v3003_v35  ;;  %v3030_v62 = vld [vmem:[%s3606_s21 + $0x70] sm:$0xff]   ;;  %v3031_v63 = vld [vmem:[%s3606_s21 + $0x78] sm:$0xff]   ;;  %v3032_v0 = vld [vmem:[%s3634_s14 + $0x40] sm:$0xff]   ;;  %s2709_s21 = sshll.u32 %s4313_s23, 8 }
  0x75   : > { %2715 = vmatprep.subr.bf16.mxu0 %v3004_v36  ;;  %v3033_v1 = vld [vmem:[%s3634_s14] sm:$0xff]   ;;  %2943 = vmatprep.subr.bf16.mxu1 %v3032_v0  ;;  %v3034_v2 = vld [vmem:[%s3634_s14 + $0x48] sm:$0xff]   ;;  %v3036_v4 = vld [vmem:[%s3634_s14 + $0x50] sm:$0xff]   ;;  %s4065_s16 = scalar_lea.vmem %s4262_s3, %s2709_s21  ;;  %s4147_s28 = scalar_lea.vmem %s4265_s6, %s2709_s21 }
  0x76   : > { %2951 = vmatpush3.bf16.msra.mxu1 %v3033_v1  ;;  %v3035_v3 = vld [vmem:[%s3634_s14 + $0x8] sm:$0xff]   ;;  %v3037_v5 = vld [vmem:[%s3634_s14 + $0x10] sm:$0xff]   ;;  %v3038_v6 = vld [vmem:[%s3634_s14 + $0x58] sm:$0xff]  }
  0x77   : > { %2944 = vmatprep.subr.bf16.mxu1 %v3034_v2  ;;  %v3039_v9 = vld [vmem:[%s3634_s14 + $0x18] sm:$0xff]   ;;  %v3040_v12 = vld [vmem:[%s3634_s14 + $0x60] sm:$0xff]  }
  0x78   : > { %v3041_v15 = vld [vmem:[%s3634_s14 + $0x20] sm:$0xff]  }
  0x7a   : > { %2952 = vmatpush3.bf16.msra.mxu1 %v3035_v3 }
  0x7b   : > { %2945 = vmatprep.subr.bf16.mxu1 %v3036_v4 }
  0x7c   : > { %2716 = vmatpush3.bf16.xpose.msra.mxu0 %v3005_v37 }
  0x7d   : > { %2717 = vmatprep.subr.bf16.mxu0 %v3006_v38 }
  0x7e   : > { %2953 = vmatpush3.bf16.msra.mxu1 %v3037_v5 }
  0x7f   : > { %2946 = vmatprep.subr.bf16.mxu1 %v3038_v6 }
  0x82   : > { %2954 = vmatpush3.bf16.msra.mxu1 %v3039_v9 }
  0x83   : > { %2947 = vmatprep.subr.bf16.mxu1 %v3040_v12 }
  0x84   : > { %2718 = vmatpush3.bf16.xpose.msra.mxu0 %v3007_v40 }
  0x85   : > { %2719 = vmatprep.subr.bf16.mxu0 %v3008_v41 }
  0x86   : > { %2955 = vmatpush3.bf16.msra.mxu1 %v3041_v15 }
  0x8c   : > { %2720 = vmatpush3.bf16.xpose.msra.mxu0 %v3009_v42 }
  0x8d   : > { %2721 = vmatprep.subr.bf16.mxu0 %v3010_v43 }
  0x94   : > { %2722 = vmatpush3.bf16.xpose.msra.mxu0 %v3011_v44 }
  0x95   : > { %2723 = vmatprep.subr.bf16.mxu0 %v3012_v45  ;;  %v3042_v45 = vld [vmem:[%s3634_s14 + $0x68] sm:$0xff]  }
  0x96   : > { %2948 = vmatprep.subr.bf16.mxu1 %v3042_v45 }
  0x9c   : > { %2724 = vmatpush3.bf16.xpose.msra.mxu0 %v3013_v46 }
  0x9d   : > { %2725 = vmatprep.subr.bf16.mxu0 %v3014_v47  ;;  %v3043_v47 = vld [vmem:[%s3634_s14 + $0x28] sm:$0xff]  }
  0x9e   : > { %2956 = vmatpush3.bf16.msra.mxu1 %v3043_v47 }
  0xa4   : > { %2726 = vmatpush3.bf16.xpose.msra.mxu0 %v3015_v48  ;;  %v3044_v48 = vld [vmem:[%s3634_s14 + $0x70] sm:$0xff]  }
  0xa5   : > { %2759 = vmatprep.subr.bf16.mxu0 %v3032_v0  ;;  %2949 = vmatprep.subr.bf16.mxu1 %v3044_v48 }
  0xab   : > { %2728 = vmatmul.mubr.bf16.vlgmr.msra.gmra.mrb[0].mxu0 %v3016_v39 }
  0xac   : > { %2729 = vmatprep.mubr.bf16.mxu0 %v3017_v49  ;;  %2760 = vmatpush3.bf16.msra.mxu0 %v3033_v1 }
  0xad   : > { %2761 = vmatprep.subr.bf16.mxu0 %v3034_v2 }
  0xb0   : > { %2762 = vmatpush3.bf16.msra.mxu0 %v3035_v3 }
  0xb1   : > { %2763 = vmatprep.subr.bf16.mxu0 %v3036_v4 }
  0xb3   : > { %2730 = vmatmul.mubr.bf16.gmra.mrb[4].mxu0 %v3017_v49 }
  0xb4   : > { %2731 = vmatprep.mubr.bf16.mxu0 %v3018_v50  ;;  %2764 = vmatpush3.bf16.msra.mxu0 %v3037_v5 }
  0xb5   : > { %2765 = vmatprep.subr.bf16.mxu0 %v3038_v6 }
  0xb8   : > { %2766 = vmatpush3.bf16.msra.mxu0 %v3039_v9 }
  0xb9   : > { %2767 = vmatprep.subr.bf16.mxu0 %v3040_v12 }
  0xbb   : > { %2732 = vmatmul.mubr.bf16.gmra.mrb[8].mxu0 %v3018_v50  ;;  %v3045_v50 = vld [vmem:[%s3634_s14 + $0x30] sm:$0xff]  }
  0xbc   : > { %2733 = vmatprep.mubr.bf16.mxu0 %v3019_v51  ;;  %2768 = vmatpush3.bf16.msra.mxu0 %v3041_v15 }
  0xbd   : > { %2769 = vmatprep.subr.bf16.mxu0 %v3042_v45  ;;  %2957 = vmatpush3.bf16.msra.mxu1 %v3045_v50 }
  0xc0   : > { %2770 = vmatpush3.bf16.msra.mxu0 %v3043_v47 }
  0xc1   : > { %2771 = vmatprep.subr.bf16.mxu0 %v3044_v48 }
  0xc3   : > { %2734 = vmatmul.mubr.bf16.gmra.mrb[12].mxu0 %v3019_v51 }
  0xc4   : > { %2735 = vmatprep.mubr.bf16.mxu0 %v3020_v52  ;;  %2772 = vmatpush3.bf16.msra.mxu0 %v3045_v50 }
  0xcb   : > { %2736 = vmatmul.mubr.bf16.gmra.mrb[16].mxu0 %v3020_v52 }
  0xcc   : > { %2737 = vmatprep.mubr.bf16.mxu0 %v3021_v53 }
  0xd3   : > { %2738 = vmatmul.mubr.bf16.gmra.mrb[20].mxu0 %v3021_v53 }
  0xd4   : > { %2739 = vmatprep.mubr.bf16.mxu0 %v3022_v54 }
  0xdb   : > { %2740 = vmatmul.mubr.bf16.gmra.mrb[24].mxu0 %v3022_v54 }
  0xdc   : > { %2741 = vmatprep.mubr.bf16.mxu0 %v3023_v55 }
  0xe3   : > { %2742 = vmatmul.mubr.bf16.gmra.mrb[28].mxu0 %v3023_v55  ;;  %v3046_v55 = vld [vmem:[%s3634_s14 + $0x78] sm:$0xff]  }
  0xe4   : > { %2743 = vmatprep.mubr.bf16.mxu0 %v3024_v56  ;;  %2950 = vmatprep.subr.bf16.mxu1 %v3046_v55 }
  0xe5   : > { %2773 = vmatprep.subr.bf16.mxu0 %v3046_v55 }
  0xeb   : > { %2744 = vmatmul.mubr.bf16.gmra.mrb[32].mxu0 %v3024_v56 }
  0xec   : > { %2745 = vmatprep.mubr.bf16.mxu0 %v3025_v57 }
  0xf3   : > { %2746 = vmatmul.mubr.bf16.gmra.mrb[36].mxu0 %v3025_v57  ;;  %v3047_v57 = vld [vmem:[%s3634_s14 + $0x38] sm:$0xff]  }
  0xf4   : > { %2747 = vmatprep.mubr.bf16.mxu0 %v3026_v58  ;;  %2958 = vmatpush3.bf16.msra.mxu1 %v3047_v57 }
  0xf5   : > { %2774 = vmatpush3.bf16.msra.mxu0 %v3047_v57 }
  0xfb   : > { %2748 = vmatmul.mubr.bf16.gmra.mrb[40].mxu0 %v3026_v58 }
  0xfc   : > { %2749 = vmatprep.mubr.bf16.mxu0 %v3027_v59 }
 0x103   : > { %2750 = vmatmul.mubr.bf16.gmra.mrb[44].mxu0 %v3027_v59 }
 0x104   : > { %2751 = vmatprep.mubr.bf16.mxu0 %v3028_v60 }
 0x10b   : > { %2752 = vmatmul.mubr.bf16.gmra.mrb[48].mxu0 %v3028_v60 }
 0x10c   : > { %2753 = vmatprep.mubr.bf16.mxu0 %v3029_v61 }
 0x113   : > { %2754 = vmatmul.mubr.bf16.gmra.mrb[52].mxu0 %v3029_v61 }
 0x114   : > { %2755 = vmatprep.mubr.bf16.mxu0 %v3030_v62 }
 0x11b   : > { %2756 = vmatmul.mubr.bf16.gmra.mrb[56].mxu0 %v3030_v62 }
 0x11c   : > { %2757 = vmatprep.mubr.bf16.mxu0 %v3031_v63 }
 0x123   : > { %2758 = vmatmul.mubr.bf16.gmra.mrb[60].mxu0 %v3031_v63 }
 0x17e   : > { %v3643_v7 = vpop.f32.mrb[0].mxu0 }
 0x17f   : > { %v3645_v8 = vpop.f32.mrb[1].mxu0 }
 0x180   : > { %v3648_v10 = vpop.f32.mrb[2].mxu0  ;;  %v1307_v11 = vmax.f32 %v3643_v7, %v3645_v8 }
 0x181   : > { %v3653_v13 = vpop.f32.mrb[3].mxu0 }
 0x182   : > { %v1310_v14 = vmax.f32 %v3648_v10, %v3653_v13 }
 0x186   : > { %v3658_v16 = vpop.f32.mrb[4].mxu0 }
 0x187   : > { %v3660_v17 = vpop.f32.mrb[5].mxu0 }
 0x188   : > { %v3662_v18 = vpop.f32.mrb[6].mxu0  ;;  %v1313_v19 = vmax.f32 %v3658_v16, %v3660_v17 }
 0x189   : > { %v3666_v20 = vpop.f32.mrb[7].mxu0 }
 0x18a   : > { %v1316_v21 = vmax.f32 %v3662_v18, %v3666_v20 }
 0x18e   : > { %v3670_v22 = vpop.f32.mrb[8].mxu0 }
 0x18f   : > { %v3672_v23 = vpop.f32.mrb[9].mxu0 }
 0x190   : > { %v3674_v24 = vpop.f32.mrb[10].mxu0  ;;  %v1319_v25 = vmax.f32 %v3670_v22, %v3672_v23 }
 0x191   : > { %v3678_v26 = vpop.f32.mrb[11].mxu0 }
 0x192   : > { %1320 = vmax.xlane.f32.xlu0 %v1319_v25  ;;  %v1322_v27 = vmax.f32 %v3674_v24, %v3678_v26 }
 0x196   : > { %1323 = vmax.xlane.f32.xlu0 %v1322_v27  ;;  %v3682_v28 = vpop.f32.mrb[12].mxu0 }
 0x197   : > { %v3684_v29 = vpop.f32.mrb[13].mxu0 }
 0x198   : > { %v3686_v30 = vpop.f32.mrb[14].mxu0  ;;  %v1325_v31 = vmax.f32 %v3682_v28, %v3684_v29 }
 0x199   : > { %v3690_v32 = vpop.f32.mrb[15].mxu0 }
 0x19a   : > { %1326 = vmax.xlane.f32.xlu1 %v1325_v31  ;;  %v1328_v33 = vmax.f32 %v3686_v30, %v3690_v32 }
 0x19e   : > { %1329 = vmax.xlane.f32.xlu1 %v1328_v33  ;;  %v3694_v34 = vpop.f32.mrb[16].mxu0 }
 0x19f   : > { %v3696_v35 = vpop.f32.mrb[17].mxu0 }
 0x1a0   : > { %v3698_v36 = vpop.f32.mrb[18].mxu0  ;;  %v1331_v37 = vmax.f32 %v3694_v34, %v3696_v35 }
 0x1a1   : > { %v3702_v38 = vpop.f32.mrb[19].mxu0 }
 0x1a2   : > { %1332 = vmax.xlane.f32.xlu0 %v1331_v37  ;;  %v1334_v39 = vmax.f32 %v3698_v36, %v3702_v38 }
 0x1a4   : > { %1335 = vmax.xlane.f32.xlu1 %v1334_v39 }
 0x1a6   : > { %v3706_v40 = vpop.f32.mrb[20].mxu0 }
 0x1a7   : > { %v3708_v41 = vpop.f32.mrb[21].mxu0 }
 0x1a8   : > { %v3710_v42 = vpop.f32.mrb[22].mxu0  ;;  %v1337_v43 = vmax.f32 %v3706_v40, %v3708_v41 }
 0x1a9   : > { %v3714_v44 = vpop.f32.mrb[23].mxu0 }
 0x1aa   : > { %1338 = vmax.xlane.f32.xlu0 %v1337_v43  ;;  %v1340_v46 = vmax.f32 %v3710_v42, %v3714_v44 }
 0x1ac   : > { %1341 = vmax.xlane.f32.xlu1 %v1340_v46 }
 0x1ae   : > { %v3721_v49 = vpop.f32.mrb[24].mxu0 }
 0x1af   : > { %v3724_v51 = vpop.f32.mrb[25].mxu0 }
 0x1b0   : > { %v3726_v52 = vpop.f32.mrb[26].mxu0  ;;  %v1343_v53 = vmax.f32 %v3721_v49, %v3724_v51 }
 0x1b1   : > { %v3730_v54 = vpop.f32.mrb[27].mxu0 }
 0x1b2   : > { %1344 = vmax.xlane.f32.xlu0 %v1343_v53  ;;  %v1346_v56 = vmax.f32 %v3726_v52, %v3730_v54 }
 0x1b4   : > { %1347 = vmax.xlane.f32.xlu1 %v1346_v56 }
 0x1b6   : > { %1308 = vmax.xlane.f32.xlu0 %v1307_v11  ;;  %v3739_v58 = vpop.f32.mrb[28].mxu0 }
 0x1b7   : > { %v3741_v59 = vpop.f32.mrb[29].mxu0 }
 0x1b8   : > { %1311 = vmax.xlane.f32.xlu1 %v1310_v14  ;;  %v3746_v60 = vpop.f32.mrb[30].mxu0  ;;  %v1349_v61 = vmax.f32 %v3739_v58, %v3741_v59 }
 0x1b9   : > { %v3750_v62 = vpop.f32.mrb[31].mxu0 }
 0x1ba   : > { %1350 = vmax.xlane.f32.xlu0 %v1349_v61  ;;  %v1352_v63 = vmax.f32 %v3746_v60, %v3750_v62 }
 0x1bc   : > { %1353 = vmax.xlane.f32.xlu1 %v1352_v63 }
 0x1be   : > { %1314 = vmax.xlane.f32.xlu0 %v1313_v19  ;;  %v3757_v0 = vpop.f32.mrb[32].mxu0 }
 0x1bf   : > { %v3759_v1 = vpop.f32.mrb[33].mxu0 }
 0x1c0   : > { %1317 = vmax.xlane.f32.xlu1 %v1316_v21  ;;  %v3764_v2 = vpop.f32.mrb[34].mxu0  ;;  %v1355_v3 = vmax.f32 %v3757_v0, %v3759_v1 }
 0x1c1   : > { %v3768_v4 = vpop.f32.mrb[35].mxu0 }
 0x1c2   : > { %1356 = vmax.xlane.f32.xlu0 %v1355_v3  ;;  %v1358_v5 = vmax.f32 %v3764_v2, %v3768_v4 }
 0x1c4   : > { %1359 = vmax.xlane.f32.xlu1 %v1358_v5 }
 0x1c6   : > { %v3772_v6 = vpop.f32.mrb[36].mxu0 }
 0x1c7   : > { %v3774_v9 = vpop.f32.mrb[37].mxu0 }
 0x1c8   : > { %v3776_v11 = vpop.f32.mrb[38].mxu0  ;;  %v1361_v12 = vmax.f32 %v3772_v6, %v3774_v9 }
 0x1c9   : > { %v3780_v14 = vpop.f32.mrb[39].mxu0 }
 0x1ca   : > { %1362 = vmax.xlane.f32.xlu0 %v1361_v12  ;;  %v1364_v15 = vmax.f32 %v3776_v11, %v3780_v14 }
 0x1cc   : > { %1365 = vmax.xlane.f32.xlu1 %v1364_v15 }
 0x1ce   : > { %v3784_v19 = vpop.f32.mrb[40].mxu0 }
 0x1cf   : > { %v3786_v21 = vpop.f32.mrb[41].mxu0 }
 0x1d0   : > { %v3788_v25 = vpop.f32.mrb[42].mxu0  ;;  %v1367_v27 = vmax.f32 %v3784_v19, %v3786_v21 }
 0x1d1   : > { %v3792_v31 = vpop.f32.mrb[43].mxu0 }
 0x1d2   : > { %1368 = vmax.xlane.f32.xlu0 %v1367_v27  ;;  %v1370_v33 = vmax.f32 %v3788_v25, %v3792_v31 }
 0x1d4   : > { %1371 = vmax.xlane.f32.xlu1 %v1370_v33 }
 0x1d6   : > { %v3796_v37 = vpop.f32.mrb[44].mxu0 }
 0x1d7   : > { %v3798_v39 = vpop.f32.mrb[45].mxu0 }
 0x1d8   : > { %v3800_v43 = vpop.f32.mrb[46].mxu0  ;;  %v1373_v45 = vmax.f32 %v3796_v37, %v3798_v39 }
 0x1d9   : > { %v3804_v46 = vpop.f32.mrb[47].mxu0 }
 0x1da   : > { %1374 = vmax.xlane.f32.xlu0 %v1373_v45  ;;  %v1376_v47 = vmax.f32 %v3800_v43, %v3804_v46 }
 0x1dc   : > { %1377 = vmax.xlane.f32.xlu1 %v1376_v47 }
 0x1de   : > { %v3808_v48 = vpop.f32.mrb[48].mxu0 }
 0x1df   : > { %v3810_v50 = vpop.f32.mrb[49].mxu0 }
 0x1e0   : > { %v3812_v53 = vpop.f32.mrb[50].mxu0  ;;  %v1379_v55 = vmax.f32 %v3808_v48, %v3810_v50 }
 0x1e1   : > { %v3816_v56 = vpop.f32.mrb[51].mxu0 }
 0x1e2   : > { %4280 = vst [vmem:[#allocation5_spill] sm:$0xff] %v3816_v56  ;;  %1380 = vmax.xlane.f32.xlu0 %v1379_v55  ;;  %v1382_v57 = vmax.f32 %v3812_v53, %v3816_v56 }
 0x1e4   : > { %1383 = vmax.xlane.f32.xlu1 %v1382_v57 }
 0x1e6   : > { %v3820_v61 = vpop.f32.mrb[52].mxu0 }
 0x1e7   : > { %4281 = vst [vmem:[#allocation6_spill] sm:$0xff] %v3820_v61  ;;  %v3822_v63 = vpop.f32.mrb[53].mxu0 }
 0x1e8   : > { %4282 = vst [vmem:[#allocation7_spill] sm:$0xff] %v3822_v63  ;;  %v3824_v3 = vpop.f32.mrb[54].mxu0  ;;  %v1385_v5 = vmax.f32 %v3820_v61, %v3822_v63 }
 0x1e9   : > { %4283 = vst [vmem:[#allocation8_spill] sm:$0xff] %v3824_v3  ;;  %v3828_v12 = vpop.f32.mrb[55].mxu0 }
 0x1ea   : > { %4284 = vst [vmem:[#allocation9_spill] sm:$0xff] %v3828_v12  ;;  %1386 = vmax.xlane.f32.xlu0 %v1385_v5  ;;  %v1388_v15 = vmax.f32 %v3824_v3, %v3828_v12 }
 0x1ec   : > { %1389 = vmax.xlane.f32.xlu1 %v1388_v15 }
 0x1ee   : > { %v3832_v27 = vpop.f32.mrb[56].mxu0 }
 0x1ef   : > { %4285 = vst [vmem:[#allocation10_spill] sm:$0xff] %v3832_v27  ;;  %v3834_v33 = vpop.f32.mrb[57].mxu0 }
 0x1f0   : > { %4286 = vst [vmem:[#allocation11_spill] sm:$0xff] %v3834_v33  ;;  %v3836_v45 = vpop.f32.mrb[58].mxu0  ;;  %v1391_v47 = vmax.f32 %v3832_v27, %v3834_v33 }
 0x1f1   : > { %4287 = vst [vmem:[#allocation12_spill] sm:$0xff] %v3836_v45  ;;  %v3840_v55 = vpop.f32.mrb[59].mxu0 }
 0x1f2   : > { %4288 = vst [vmem:[#allocation13_spill] sm:$0xff] %v3840_v55  ;;  %1392 = vmax.xlane.f32.xlu0 %v1391_v47  ;;  %v1394_v57 = vmax.f32 %v3836_v45, %v3840_v55 }
 0x1f4   : > { %1395 = vmax.xlane.f32.xlu1 %v1394_v57  ;;  %v3048_v57 = vld [vmem:[%s4263_s4] sm:$0xff]  }
 0x1f5   : > { %2895 = vmatprep.subr.bf16.mxu1 %v3048_v57 }
 0x1f6   : > { %v3844_v5 = vpop.f32.mrb[60].mxu0 }
 0x1f7   : > { %4289 = vst [vmem:[#allocation14_spill] sm:$0xff] %v3844_v5  ;;  %v3846_v12 = vpop.f32.mrb[61].mxu0 }
 0x1f8   : > { %4290 = vst [vmem:[#allocation15_spill] sm:$0xff] %v3846_v12  ;;  %v3848_v15 = vpop.f32.mrb[62].mxu0  ;;  %v1397_v3 = vmax.f32 %v3844_v5, %v3846_v12 }
 0x1f9   : > { %4291 = vst [vmem:[#allocation16_spill] sm:$0xff] %v3848_v15  ;;  %v3852_v63 = vpop.f32.mrb[63].mxu0 }
 0x1fa   : > { %4292 = vst [vmem:[#allocation17_spill] sm:$0xff] %v3852_v63  ;;  %1398 = vmax.xlane.f32.xlu0 %v1397_v3  ;;  %v1400_v33 = vmax.f32 %v3848_v15, %v3852_v63 }
 0x1fc   : > { %1401 = vmax.xlane.f32.xlu1 %v1400_v33 }
 0x21f   : > { %v1321_v47 = vpop.xlane.xlu0 %1320 }
 0x220   : > { %v1411_v55 = vsub.f32 %v3670_v22, %v1321_v47  ;;  %v1412_v45 = vsub.f32 %v3672_v23, %v1321_v47 }
 0x222   : > { %v1483_v27 = vmul.f32 1.442695, %v1411_v55  ;;  %v1485_v61 = vmul.f32 1.442695, %v1412_v45 }
 0x223   : > { %v1324_v12 = vpop.xlane.xlu0 %1323 }
 0x224   : > { %3056 = vpow2.f32 %v1483_v27  ;;  %v1413_v3 = vsub.f32 %v3674_v24, %v1324_v12  ;;  %v1414_v5 = vsub.f32 %v3678_v26, %v1324_v12 }
 0x225   : > { %3058 = vpow2.f32 %v1485_v61 }
 0x226   : > { %v1487_v33 = vmul.f32 1.442695, %v1413_v3  ;;  %v1489_v63 = vmul.f32 1.442695, %v1414_v5 }
 0x227   : > { %v1327_v15 = vpop.xlane.xlu1 %1326 }
 0x228   : > { %3060 = vpow2.f32 %v1487_v33  ;;  %v1415_v56 = vsub.f32 %v3682_v28, %v1327_v15  ;;  %v1416_v22 = vsub.f32 %v3684_v29, %v1327_v15 }
 0x229   : > { %3062 = vpow2.f32 %v1489_v63 }
 0x22a   : > { %v1491_v23 = vmul.f32 1.442695, %v1415_v56  ;;  %v1493_v47 = vmul.f32 1.442695, %v1416_v22 }
 0x22b   : > { %v1330_v55 = vpop.xlane.xlu1 %1329 }
 0x22c   : > { %3064 = vpow2.f32 %v1491_v23  ;;  %v1417_v27 = vsub.f32 %v3686_v30, %v1330_v55  ;;  %v1418_v24 = vsub.f32 %v3690_v32, %v1330_v55 }
 0x22d   : > { %3066 = vpow2.f32 %v1493_v47 }
 0x22e   : > { %v3057_v26 = vpop.eup %3056  ;;  %v1495_v61 = vmul.f32 1.442695, %v1417_v27  ;;  %v1497_v12 = vmul.f32 1.442695, %v1418_v24 }
 0x22f   : > { %v3059_v45 = vpop.eup %3058  ;;  %v1333_v5 = vpop.xlane.xlu0 %1332 }
 0x230   : > { %3068 = vpow2.f32 %v1495_v61  ;;  %v1419_v28 = vsub.f32 %v3694_v34, %v1333_v5  ;;  %v1420_v29 = vsub.f32 %v3696_v35, %v1333_v5  ;;  %v3869_v63 = vadd.f32 %v3059_v45, %v3057_v26  ;;  %v3049_v35 = vld [vmem:[%s4263_s4 + $0x8] sm:$0xff]  }
 0x231   : > { %3070 = vpow2.f32 %v1497_v12  ;;  %v1336_v56 = vpop.xlane.xlu1 %1335 }
 0x232   : > { %v3061_v15 = vpop.eup %3060  ;;  %v1499_v3 = vmul.f32 1.442695, %v1419_v28  ;;  %v1501_v30 = vmul.f32 1.442695, %v1420_v29  ;;  %v1421_v32 = vsub.f32 %v3698_v36, %v1336_v56  ;;  %v1422_v33 = vsub.f32 %v3702_v38, %v1336_v56 }
 0x233   : > { %v3063_v22 = vpop.eup %3062  ;;  %v1695_v23 = vpack.c.bf16 %v3061_v15, %v3057_v26 }
 0x234   : > { %3072 = vpow2.f32 %v1499_v3  ;;  %v1503_v47 = vmul.f32 1.442695, %v1421_v32  ;;  %v1505_v55 = vmul.f32 1.442695, %v1422_v33  ;;  %v1696_v27 = vpack.c.bf16 %v3063_v22, %v3059_v45 }
 0x235   : > { %3074 = vpow2.f32 %v1501_v30  ;;  %v3873_v34 = vadd.f32 %v3063_v22, %v3061_v15 }
 0x236   : > { %v3065_v24 = vpop.eup %3064  ;;  %3076 = vpow2.f32 %v1503_v47  ;;  %1899 = vmatprep.mubr.bf16.mxu1 %v1696_v27 }
 0x237   : > { %v3067_v61 = vpop.eup %3066  ;;  %3078 = vpow2.f32 %v1505_v55  ;;  %1900 = vmatmul.mubr.bf16.vlgmr.msra.gmra.mrb[0].mxu1 %v1695_v23  ;;  %v1339_v36 = vpop.xlane.xlu0 %1338 }
 0x238   : > { %v1423_v38 = vsub.f32 %v3706_v40, %v1339_v36  ;;  %v1424_v26 = vsub.f32 %v3708_v41, %v1339_v36  ;;  %v3880_v12 = vadd.f32 %v3067_v61, %v3065_v24  ;;  %2896 = vmatpush3.bf16.msra.mxu1 %v3048_v57 }
 0x239   : > { %v1342_v45 = vpop.xlane.xlu1 %1341  ;;  %2897 = vmatprep.subr.bf16.mxu1 %v3049_v35 }
 0x23a   : > { %v3069_v5 = vpop.eup %3068  ;;  %v1507_v28 = vmul.f32 1.442695, %v1423_v38  ;;  %v1509_v29 = vmul.f32 1.442695, %v1424_v26  ;;  %v1425_v56 = vsub.f32 %v3710_v42, %v1342_v45  ;;  %v1426_v15 = vsub.f32 %v3714_v44, %v1342_v45 }
 0x23b   : > { %v3071_v3 = vpop.eup %3070  ;;  %v1697_v30 = vpack.c.bf16 %v3069_v5, %v3065_v24 }
 0x23c   : > { %3080 = vpow2.f32 %v1507_v28  ;;  %v1511_v32 = vmul.f32 1.442695, %v1425_v56  ;;  %v1513_v33 = vmul.f32 1.442695, %v1426_v15  ;;  %v1698_v40 = vpack.c.bf16 %v3071_v3, %v3067_v61  ;;  %2898 = vmatpush3.bf16.msra.mxu1 %v3049_v35 }
 0x23d   : > { %3082 = vpow2.f32 %v1509_v29  ;;  %v3884_v41 = vadd.f32 %v3071_v3, %v3069_v5 }
 0x23e   : > { %v3073_v57 = vpop.eup %3072  ;;  %3084 = vpow2.f32 %v1511_v32  ;;  %1907 = vmatprep.mubr.bf16.mxu1 %v1698_v40 }
 0x23f   : > { %v3075_v22 = vpop.eup %3074  ;;  %3086 = vpow2.f32 %v1513_v33  ;;  %1908 = vmatmul.mubr.bf16.gmra.mrb[4].mxu1 %v1697_v30  ;;  %v1345_v23 = vpop.xlane.xlu0 %1344 }
 0x240   : > { %v3077_v42 = vpop.eup %3076  ;;  %v1427_v44 = vsub.f32 %v3721_v49, %v1345_v23  ;;  %v1428_v47 = vsub.f32 %v3724_v51, %v1345_v23  ;;  %v3888_v55 = vadd.f32 %v3075_v22, %v3073_v57 }
 0x241   : > { %v3079_v27 = vpop.eup %3078  ;;  %v1348_v24 = vpop.xlane.xlu1 %1347  ;;  %v1699_v35 = vpack.c.bf16 %v3077_v42, %v3073_v57 }
 0x242   : > { %v1515_v61 = vmul.f32 1.442695, %v1427_v44  ;;  %v1517_v36 = vmul.f32 1.442695, %v1428_v47  ;;  %v1429_v38 = vsub.f32 %v3726_v52, %v1348_v24  ;;  %v1430_v26 = vsub.f32 %v3730_v54, %v1348_v24 }
 0x243   : > { %v1700_v45 = vpack.c.bf16 %v3079_v27, %v3075_v22  ;;  %v1309_v5 = vpop.xlane.xlu0 %1308  ;;  %v3892_v28 = vadd.f32 %v3079_v27, %v3077_v42 }
 0x244   : > { %3088 = vpow2.f32 %v1515_v61  ;;  %v1519_v29 = vmul.f32 1.442695, %v1429_v38  ;;  %v1521_v49 = vmul.f32 1.442695, %v1430_v26  ;;  %v1403_v51 = vsub.f32 %v3643_v7, %v1309_v5 }
 0x245   : > { %3090 = vpow2.f32 %v1517_v36  ;;  %1915 = vmatprep.mubr.bf16.mxu1 %v1700_v45  ;;  %v1404_v56 = vsub.f32 %v3645_v8, %v1309_v5  ;;  %v1312_v15 = vpop.xlane.xlu1 %1311 }
 0x246   : > { %v3081_v3 = vpop.eup %3080  ;;  %3092 = vpow2.f32 %v1519_v29  ;;  %v1467_v30 = vmul.f32 1.442695, %v1403_v51  ;;  %v1405_v52 = vsub.f32 %v3648_v10, %v1312_v15  ;;  %v1406_v54 = vsub.f32 %v3653_v13, %v1312_v15 }
 0x247   : > { %v3083_v32 = vpop.eup %3082  ;;  %3094 = vpow2.f32 %v1521_v49  ;;  %v1469_v33 = vmul.f32 1.442695, %v1404_v56  ;;  %1916 = vmatmul.mubr.bf16.gmra.mrb[8].mxu1 %v1699_v35  ;;  %v1351_v40 = vpop.xlane.xlu0 %1350 }
 0x248   : > { %v3085_v57 = vpop.eup %3084  ;;  %3096 = vpow2.f32 %v1467_v30  ;;  %v1471_v7 = vmul.f32 1.442695, %v1405_v52  ;;  %v1473_v22 = vmul.f32 1.442695, %v1406_v54  ;;  %v1431_v23 = vsub.f32 %v3739_v58, %v1351_v40 }
 0x249   : > { %v3087_v8 = vpop.eup %3086  ;;  %3098 = vpow2.f32 %v1469_v33  ;;  %v1432_v42 = vsub.f32 %v3741_v59, %v1351_v40  ;;  %v1354_v44 = vpop.xlane.xlu1 %1353  ;;  %v1701_v47 = vpack.c.bf16 %v3085_v57, %v3081_v3  ;;  %v3900_v10 = vadd.f32 %v3083_v32, %v3081_v3 }
 0x24a   : > { %3100 = vpow2.f32 %v1471_v7  ;;  %v1523_v13 = vmul.f32 1.442695, %v1431_v23  ;;  %v1433_v27 = vsub.f32 %v3746_v60, %v1354_v44  ;;  %v1434_v24 = vsub.f32 %v3750_v62, %v1354_v44 }
 0x24b   : > { %3102 = vpow2.f32 %v1473_v22  ;;  %v1525_v35 = vmul.f32 1.442695, %v1432_v42  ;;  %v1702_v61 = vpack.c.bf16 %v3087_v8, %v3083_v32  ;;  %v1315_v36 = vpop.xlane.xlu0 %1314  ;;  %v3904_v38 = vadd.f32 %v3087_v8, %v3085_v57 }
 0x24c   : > { %3104 = vpow2.f32 %v1523_v13  ;;  %v1527_v58 = vmul.f32 1.442695, %v1433_v27  ;;  %v1529_v26 = vmul.f32 1.442695, %v1434_v24  ;;  %v1407_v59 = vsub.f32 %v3658_v16, %v1315_v36 }
 0x24d   : > { %3106 = vpow2.f32 %v1525_v35  ;;  %1923 = vmatprep.mubr.bf16.mxu1 %v1702_v61  ;;  %v1408_v45 = vsub.f32 %v3660_v17, %v1315_v36  ;;  %v1318_v5 = vpop.xlane.xlu1 %1317 }
 0x24e   : > { %v3089_v29 = vpop.eup %3088  ;;  %3108 = vpow2.f32 %v1527_v58  ;;  %v1475_v60 = vmul.f32 1.442695, %v1407_v59  ;;  %v1409_v62 = vsub.f32 %v3662_v18, %v1318_v5  ;;  %v1410_v49 = vsub.f32 %v3666_v20, %v1318_v5 }
 0x24f   : > { %v3091_v51 = vpop.eup %3090  ;;  %3110 = vpow2.f32 %v1529_v26  ;;  %v1477_v56 = vmul.f32 1.442695, %v1408_v45  ;;  %1924 = vmatmul.mubr.bf16.gmra.mrb[12].mxu1 %v1701_v47  ;;  %v1357_v15 = vpop.xlane.xlu0 %1356 }
 0x250   : > { %v3093_v3 = vpop.eup %3092  ;;  %3112 = vpow2.f32 %v1475_v60  ;;  %v1479_v16 = vmul.f32 1.442695, %v1409_v62  ;;  %v1481_v30 = vmul.f32 1.442695, %v1410_v49  ;;  %v1435_v52 = vsub.f32 %v3757_v0, %v1357_v15 }
 0x251   : > { %v3095_v17 = vpop.eup %3094  ;;  %3114 = vpow2.f32 %v1477_v56  ;;  %v1436_v54 = vsub.f32 %v3759_v1, %v1357_v15  ;;  %v1360_v32 = vpop.xlane.xlu1 %1359  ;;  %v1703_v33 = vpack.c.bf16 %v3093_v3, %v3089_v29  ;;  %v3912_v18 = vadd.f32 %v3091_v51, %v3089_v29 }
 0x252   : > { %v3097_v20 = vpop.eup %3096  ;;  %3116 = vpow2.f32 %v1479_v16  ;;  %v1531_v40 = vmul.f32 1.442695, %v1435_v52  ;;  %v1437_v57 = vsub.f32 %v3764_v2, %v1360_v32  ;;  %v1438_v7 = vsub.f32 %v3768_v4, %v1360_v32 }
 0x253   : > { %v3099_v22 = vpop.eup %3098  ;;  %3118 = vpow2.f32 %v1481_v30  ;;  %v1533_v23 = vmul.f32 1.442695, %v1436_v54  ;;  %v1704_v8 = vpack.c.bf16 %v3095_v17, %v3091_v51  ;;  %v3916_v0 = vadd.f32 %v3095_v17, %v3093_v3 }
 0x254   : > { %v3101_v42 = vpop.eup %3100  ;;  %3120 = vpow2.f32 %v1531_v40  ;;  %v1535_v1 = vmul.f32 1.442695, %v1437_v57  ;;  %v1537_v44 = vmul.f32 1.442695, %v1438_v7  ;;  %v1595_v47 = vadd.f32 %v3099_v22, %v3097_v20 }
 0x255   : > { %v3103_v13 = vpop.eup %3102  ;;  %3122 = vpow2.f32 %v1533_v23  ;;  %1931 = vmatprep.mubr.bf16.mxu1 %v1704_v8  ;;  %v1691_v27 = vpack.c.bf16 %v3101_v42, %v3097_v20 }
 0x256   : > { %v3105_v24 = vpop.eup %3104  ;;  %3124 = vpow2.f32 %v1535_v1  ;;  %1596 = vadd.xlane.f32.xlu0 %v1595_v47  ;;  %v1692_v2 = vpack.c.bf16 %v3103_v13, %v3099_v22  ;;  %v1598_v4 = vadd.f32 %v3103_v13, %v3101_v42 }
 0x257   : > { %v3107_v35 = vpop.eup %3106  ;;  %3126 = vpow2.f32 %v1537_v44  ;;  %1932 = vmatmul.mubr.bf16.gmra.mrb[16].mxu1 %v1703_v33  ;;  %v1363_v61 = vpop.xlane.xlu0 %1362 }
 0x258   : > { %v3109_v36 = vpop.eup %3108  ;;  %1883 = vmatprep.mubr.bf16.mxu0 %v1692_v2  ;;  %v1439_v58 = vsub.f32 %v3772_v6, %v1363_v61  ;;  %v1440_v26 = vsub.f32 %v3774_v9, %v1363_v61  ;;  %1599 = vadd.xlane.f32.xlu1 %v1598_v4  ;;  %v3920_v59 = vadd.f32 %v3107_v35, %v3105_v24 }
 0x259   : > { %v3111_v45 = vpop.eup %3110  ;;  %1884 = vmatmul.mubr.bf16.vlgmr.msra.gmra.mrb[64].mxu0 %v1691_v27  ;;  %v1366_v5 = vpop.xlane.xlu1 %1365  ;;  %v1705_v29 = vpack.c.bf16 %v3109_v36, %v3105_v24 }
 0x25a   : > { %v3113_v60 = vpop.eup %3112  ;;  %v1539_v62 = vmul.f32 1.442695, %v1439_v58  ;;  %v1541_v49 = vmul.f32 1.442695, %v1440_v26  ;;  %v1441_v51 = vsub.f32 %v3776_v11, %v1366_v5  ;;  %v1442_v56 = vsub.f32 %v3780_v14, %v1366_v5 }
 0x25b   : > { %v3115_v15 = vpop.eup %3114  ;;  %v1706_v3 = vpack.c.bf16 %v3111_v45, %v3107_v35  ;;  %v3924_v16 = vadd.f32 %v3111_v45, %v3109_v36 }
 0x25c   : > { %v3117_v6 = vpop.eup %3116  ;;  %3128 = vpow2.f32 %v1539_v62  ;;  %v1543_v9 = vmul.f32 1.442695, %v1441_v51  ;;  %v1545_v30 = vmul.f32 1.442695, %v1442_v56  ;;  %v1601_v52 = vadd.f32 %v3115_v15, %v3113_v60 }
 0x25d   : > { %v3119_v17 = vpop.eup %3118  ;;  %3130 = vpow2.f32 %v1541_v49  ;;  %1939 = vmatprep.mubr.bf16.mxu1 %v1706_v3  ;;  %v1693_v54 = vpack.c.bf16 %v3117_v6, %v3113_v60 }
 0x25e   : > { %v3121_v32 = vpop.eup %3120  ;;  %3132 = vpow2.f32 %v1543_v9  ;;  %1602 = vadd.xlane.f32.xlu0 %v1601_v52  ;;  %v1694_v33 = vpack.c.bf16 %v3119_v17, %v3115_v15  ;;  %v1604_v11 = vadd.f32 %v3119_v17, %v3117_v6 }
 0x25f   : > { %v3123_v20 = vpop.eup %3122  ;;  %3134 = vpow2.f32 %v1545_v30  ;;  %1940 = vmatmul.mubr.bf16.gmra.mrb[20].mxu1 %v1705_v29  ;;  %v1369_v14 = vpop.xlane.xlu0 %1368  ;;  %v4293_v30 = vld [vmem:[#allocation5_spill] sm:$0xff] }
 0x260   : > { %v3125_v40 = vpop.eup %3124  ;;  %1891 = vmatprep.mubr.bf16.mxu0 %v1694_v33  ;;  %v1443_v57 = vsub.f32 %v3784_v19, %v1369_v14  ;;  %v1444_v7 = vsub.f32 %v3786_v21, %v1369_v14  ;;  %1605 = vadd.xlane.f32.xlu1 %v1604_v11  ;;  %v3928_v22 = vadd.f32 %v3123_v20, %v3121_v32  ;;  %v4294_v11 = vld [vmem:[#allocation6_spill] sm:$0xff] }
 0x261   : > { %v3127_v23 = vpop.eup %3126  ;;  %1892 = vmatmul.mubr.bf16.gmra.mrb[68].mxu0 %v1693_v54  ;;  %v1372_v8 = vpop.xlane.xlu1 %1371  ;;  %v1707_v42 = vpack.c.bf16 %v3125_v40, %v3121_v32 }
 0x262   : > { %v1547_v1 = vmul.f32 1.442695, %v1443_v57  ;;  %v1549_v44 = vmul.f32 1.442695, %v1444_v7  ;;  %v1445_v47 = vsub.f32 %v3788_v25, %v1372_v8  ;;  %v1446_v13 = vsub.f32 %v3792_v31, %v1372_v8  ;;  %1608 = vadd.xlane.f32.xlu0 %v3869_v63 }
 0x263   : > { %v1708_v27 = vpack.c.bf16 %v3127_v23, %v3123_v20  ;;  %v3933_v24 = vadd.f32 %v3127_v23, %v3125_v40  ;;  %v4295_v20 = vld [vmem:[#allocation7_spill] sm:$0xff] }
 0x264   : > { %3136 = vpow2.f32 %v1547_v1  ;;  %v1551_v19 = vmul.f32 1.442695, %v1445_v47  ;;  %v1553_v21 = vmul.f32 1.442695, %v1446_v13  ;;  %1611 = vadd.xlane.f32.xlu1 %v3873_v34 }
 0x265   : > { %3138 = vpow2.f32 %v1549_v44  ;;  %1947 = vmatprep.mubr.bf16.mxu1 %v1708_v27 }
 0x266   : > { %v3129_v2 = vpop.eup %3128  ;;  %3140 = vpow2.f32 %v1551_v19  ;;  %1614 = vadd.xlane.f32.xlu0 %v3880_v12 }
 0x267   : > { %v3131_v4 = vpop.eup %3130  ;;  %3142 = vpow2.f32 %v1553_v21  ;;  %1948 = vmatmul.mubr.bf16.gmra.mrb[24].mxu1 %v1707_v42  ;;  %v1375_v25 = vpop.xlane.xlu0 %1374  ;;  %v4296_v42 = vld [vmem:[#allocation8_spill] sm:$0xff] }
 0x268   : > { %v3133_v31 = vpop.eup %3132  ;;  %v1447_v63 = vsub.f32 %v3796_v37, %v1375_v25  ;;  %v1448_v35 = vsub.f32 %v3798_v39, %v1375_v25  ;;  %1617 = vadd.xlane.f32.xlu1 %v3884_v41  ;;  %v3940_v61 = vadd.f32 %v3131_v4, %v3129_v2  ;;  %v4298_v25 = vld [vmem:[#allocation10_spill] sm:$0xff] }
 0x269   : > { %v3135_v34 = vpop.eup %3134  ;;  %v1378_v36 = vpop.xlane.xlu1 %1377  ;;  %v1709_v58 = vpack.c.bf16 %v3133_v31, %v3129_v2 }
 0x26a   : > { %v1555_v26 = vmul.f32 1.442695, %v1447_v63  ;;  %v1557_v45 = vmul.f32 1.442695, %v1448_v35  ;;  %v1449_v12 = vsub.f32 %v3800_v43, %v1378_v36  ;;  %v1450_v5 = vsub.f32 %v3804_v46, %v1378_v36  ;;  %1620 = vadd.xlane.f32.xlu0 %v3888_v55  ;;  %v3050_v43 = vld [vmem:[%s4263_s4 + $0x10] sm:$0xff]  }
 0x26b   : > { %v1710_v29 = vpack.c.bf16 %v3135_v34, %v3131_v4  ;;  %v3945_v60 = vadd.f32 %v3135_v34, %v3133_v31  ;;  %2899 = vmatprep.subr.bf16.mxu1 %v3050_v43  ;;  %v4299_v63 = vld [vmem:[#allocation11_spill] sm:$0xff] }
 0x26c   : > { %3144 = vpow2.f32 %v1555_v26  ;;  %v1559_v37 = vmul.f32 1.442695, %v1449_v12  ;;  %v1561_v39 = vmul.f32 1.442695, %v1450_v5  ;;  %1623 = vadd.xlane.f32.xlu1 %v3892_v28  ;;  %2900 = vmatpush3.bf16.msra.mxu1 %v3050_v43  ;;  %v4301_v5 = vld [vmem:[#allocation13_spill] sm:$0xff] }
 0x26d   : > { %3146 = vpow2.f32 %v1557_v45  ;;  %1955 = vmatprep.mubr.bf16.mxu1 %v1710_v29 }
 0x26e   : > { %v3137_v41 = vpop.eup %3136  ;;  %3148 = vpow2.f32 %v1559_v37  ;;  %1626 = vadd.xlane.f32.xlu0 %v3900_v10 }
 0x26f   : > { %v3139_v46 = vpop.eup %3138  ;;  %3150 = vpow2.f32 %v1561_v39  ;;  %1956 = vmatmul.mubr.bf16.gmra.mrb[28].mxu1 %v1709_v58  ;;  %v1381_v55 = vpop.xlane.xlu0 %1380 }
 0x270   : > { %v3141_v62 = vpop.eup %3140  ;;  %v1451_v49 = vsub.f32 %v3808_v48, %v1381_v55  ;;  %v1452_v51 = vsub.f32 %v3810_v50, %v1381_v55  ;;  %1629 = vadd.xlane.f32.xlu1 %v3904_v38  ;;  %v3955_v28 = vadd.f32 %v3139_v46, %v3137_v41 }
 0x271   : > { %v3143_v56 = vpop.eup %3142  ;;  %v1384_v10 = vpop.xlane.xlu1 %1383  ;;  %v1711_v15 = vpack.c.bf16 %v3141_v62, %v3137_v41 }
 0x272   : > { %v1563_v3 = vmul.f32 1.442695, %v1451_v49  ;;  %v1565_v6 = vmul.f32 1.442695, %v1452_v51  ;;  %v1453_v9 = vsub.f32 %v3812_v53, %v1384_v10  ;;  %v1454_v52 = vsub.f32 %v4293_v30, %v1384_v10  ;;  %1632 = vadd.xlane.f32.xlu0 %v3912_v18  ;;  %v4302_v49 = vld [vmem:[#allocation14_spill] sm:$0xff] }
 0x273   : > { %v1712_v48 = vpack.c.bf16 %v3143_v56, %v3139_v46  ;;  %v1658_v17 = vadd.f32 %v3143_v56, %v3141_v62  ;;  %v4303_v56 = vld [vmem:[#allocation15_spill] sm:$0xff] }
 0x274   : > { %3152 = vpow2.f32 %v1563_v3  ;;  %v1567_v50 = vmul.f32 1.442695, %v1453_v9  ;;  %v1569_v38 = vmul.f32 1.442695, %v1454_v52  ;;  %1635 = vadd.xlane.f32.xlu1 %v3916_v0  ;;  %v4304_v52 = vld [vmem:[#allocation16_spill] sm:$0xff] }
 0x275   : > { %3154 = vpow2.f32 %v1565_v6  ;;  %1963 = vmatprep.mubr.bf16.mxu1 %v1712_v48 }
 0x276   : > { %v3145_v54 = vpop.eup %3144  ;;  %3156 = vpow2.f32 %v1567_v50  ;;  %1638 = vadd.xlane.f32.xlu0 %v3920_v59  ;;  %v4297_v59 = vld [vmem:[#allocation9_spill] sm:$0xff] }
 0x277   : > { %v3147_v32 = vpop.eup %3146  ;;  %3158 = vpow2.f32 %v1569_v38  ;;  %1964 = vmatmul.mubr.bf16.gmra.mrb[32].mxu1 %v1711_v15  ;;  %v1387_v53 = vpop.xlane.xlu0 %1386 }
 0x278   : > { %v3149_v33 = vpop.eup %3148  ;;  %v1455_v18 = vsub.f32 %v4294_v11, %v1387_v53  ;;  %v1456_v14 = vsub.f32 %v4295_v20, %v1387_v53  ;;  %1641 = vadd.xlane.f32.xlu1 %v3924_v16  ;;  %v1661_v40 = vadd.f32 %v3147_v32, %v3145_v54  ;;  %v3051_v16 = vld [vmem:[%s4263_s4 + $0x18] sm:$0xff]   ;;  %v3052_v11 = vld [vmem:[%s4263_s4 + $0x20] sm:$0xff]  }
 0x279   : > { %v3151_v57 = vpop.eup %3150  ;;  %v1390_v0 = vpop.xlane.xlu1 %1389  ;;  %v1713_v7 = vpack.c.bf16 %v3149_v33, %v3145_v54  ;;  %2901 = vmatprep.subr.bf16.mxu1 %v3051_v16 }
 0x27a   : > { %v1571_v23 = vmul.f32 1.442695, %v1455_v18  ;;  %v1573_v8 = vmul.f32 1.442695, %v1456_v14  ;;  %v1457_v1 = vsub.f32 %v4296_v42, %v1390_v0  ;;  %v1458_v44 = vsub.f32 %v4297_v59, %v1390_v0  ;;  %1644 = vadd.xlane.f32.xlu0 %v3928_v22  ;;  %2902 = vmatpush3.bf16.msra.mxu1 %v3051_v16  ;;  %v3053_v59 = vld [vmem:[%s4263_s4 + $0x28] sm:$0xff]   ;;  %v3055_v16 = vld [vmem:[%s4263_s4 + $0x38] sm:$0xff]  }
 0x27b   : > { %v1714_v47 = vpack.c.bf16 %v3151_v57, %v3147_v32  ;;  %v1664_v13 = vadd.f32 %v3151_v57, %v3149_v33  ;;  %2903 = vmatprep.subr.bf16.mxu1 %v3052_v11 }
 0x27c   : > { %3160 = vpow2.f32 %v1571_v23  ;;  %v1575_v27 = vmul.f32 1.442695, %v1457_v1  ;;  %v1577_v19 = vmul.f32 1.442695, %v1458_v44  ;;  %1647 = vadd.xlane.f32.xlu1 %v3933_v24 }
 0x27d   : > { %3162 = vpow2.f32 %v1573_v8  ;;  %1971 = vmatprep.mubr.bf16.mxu1 %v1714_v47 }
 0x27e   : > { %v3153_v21 = vpop.eup %3152  ;;  %3164 = vpow2.f32 %v1575_v27  ;;  %1650 = vadd.xlane.f32.xlu0 %v3940_v61  ;;  %v4300_v61 = vld [vmem:[#allocation12_spill] sm:$0xff]  ;;  %2904 = vmatpush3.bf16.msra.mxu1 %v3052_v11 }
 0x27f   : > { %v3155_v2 = vpop.eup %3154  ;;  %3166 = vpow2.f32 %v1577_v19  ;;  %1972 = vmatmul.mubr.bf16.gmra.mrb[36].mxu1 %v1713_v7  ;;  %v1393_v22 = vpop.xlane.xlu0 %1392  ;;  %2905 = vmatprep.subr.bf16.mxu1 %v3053_v59  ;;  %v3054_v19 = vld [vmem:[%s4263_s4 + $0x30] sm:$0xff]  }
 0x280   : > { %v3157_v4 = vpop.eup %3156  ;;  %v1459_v31 = vsub.f32 %v4298_v25, %v1393_v22  ;;  %v1460_v24 = vsub.f32 %v4299_v63, %v1393_v22  ;;  %1653 = vadd.xlane.f32.xlu1 %v3945_v60  ;;  %v1667_v35 = vadd.f32 %v3155_v2, %v3153_v21 }
 0x281   : > { %v3159_v34 = vpop.eup %3158  ;;  %v1396_v36 = vpop.xlane.xlu1 %1395  ;;  %v1715_v58 = vpack.c.bf16 %v3157_v4, %v3153_v21 }
 0x282   : > { %v1579_v26 = vmul.f32 1.442695, %v1459_v31  ;;  %v1581_v45 = vmul.f32 1.442695, %v1460_v24  ;;  %v1461_v12 = vsub.f32 %v4300_v61, %v1396_v36  ;;  %v1462_v29 = vsub.f32 %v4301_v5, %v1396_v36  ;;  %1656 = vadd.xlane.f32.xlu0 %v3955_v28  ;;  %2906 = vmatpush3.bf16.msra.mxu1 %v3053_v59 }
 0x283   : > { %v1716_v37 = vpack.c.bf16 %v3159_v34, %v3155_v2  ;;  %v1670_v39 = vadd.f32 %v3159_v34, %v3157_v4  ;;  %2907 = vmatprep.subr.bf16.mxu1 %v3054_v19 }
 0x284   : > { %3168 = vpow2.f32 %v1579_v26  ;;  %v1583_v41 = vmul.f32 1.442695, %v1461_v12  ;;  %v1585_v43 = vmul.f32 1.442695, %v1462_v29  ;;  %1659 = vadd.xlane.f32.xlu1 %v1658_v17  ;;  %v4305_v17 = vld [vmem:[#allocation17_spill] sm:$0xff] }
 0x285   : > { %3170 = vpow2.f32 %v1581_v45  ;;  %1979 = vmatprep.mubr.bf16.mxu1 %v1716_v37 }
 0x286   : > { %v3161_v60 = vpop.eup %3160  ;;  %3172 = vpow2.f32 %v1583_v41  ;;  %1662 = vadd.xlane.f32.xlu0 %v1661_v40  ;;  %2908 = vmatpush3.bf16.msra.mxu1 %v3054_v19 }
 0x287   : > { %v3163_v46 = vpop.eup %3162  ;;  %3174 = vpow2.f32 %v1585_v43  ;;  %1980 = vmatmul.mubr.bf16.gmra.mrb[40].mxu1 %v1715_v58  ;;  %v1399_v55 = vpop.xlane.xlu0 %1398  ;;  %2909 = vmatprep.subr.bf16.mxu1 %v3055_v16 }
 0x288   : > { %v3165_v62 = vpop.eup %3164  ;;  %v1463_v51 = vsub.f32 %v4302_v49, %v1399_v55  ;;  %v1464_v28 = vsub.f32 %v4303_v56, %v1399_v55  ;;  %1665 = vadd.xlane.f32.xlu1 %v1664_v13  ;;  %v1673_v10 = vadd.f32 %v3163_v46, %v3161_v60 }
 0x289   : > { %v3167_v15 = vpop.eup %3166  ;;  %v1402_v3 = vpop.xlane.xlu1 %1401  ;;  %v1717_v6 = vpack.c.bf16 %v3165_v62, %v3161_v60 }
 0x28a   : > { %v1587_v9 = vmul.f32 1.442695, %v1463_v51  ;;  %v1589_v30 = vmul.f32 1.442695, %v1464_v28  ;;  %1668 = vadd.xlane.f32.xlu0 %v1667_v35  ;;  %v1465_v48 = vsub.f32 %v4304_v52, %v1402_v3  ;;  %v1466_v50 = vsub.f32 %v4305_v17, %v1402_v3  ;;  %2910 = vmatpush3.bf16.msra.mxu1 %v3055_v16 }
 0x28b   : > { %v1718_v38 = vpack.c.bf16 %v3167_v15, %v3163_v46  ;;  %v1676_v54 = vadd.f32 %v3167_v15, %v3165_v62 }
 0x28c   : > { %3176 = vpow2.f32 %v1587_v9  ;;  %v1591_v32 = vmul.f32 1.442695, %v1465_v48  ;;  %v1593_v53 = vmul.f32 1.442695, %v1466_v50  ;;  %1671 = vadd.xlane.f32.xlu1 %v1670_v39 }
 0x28d   : > { %3178 = vpow2.f32 %v1589_v30  ;;  %1987 = vmatprep.mubr.bf16.mxu1 %v1718_v38 }
 0x28e   : > { %v3169_v33 = vpop.eup %3168  ;;  %3180 = vpow2.f32 %v1591_v32  ;;  %1674 = vadd.xlane.f32.xlu0 %v1673_v10 }
 0x28f   : > { %v3171_v18 = vpop.eup %3170  ;;  %3182 = vpow2.f32 %v1593_v53  ;;  %1988 = vmatmul.mubr.bf16.gmra.mrb[44].mxu1 %v1717_v6 }
 0x290   : > { %v3173_v20 = vpop.eup %3172  ;;  %1677 = vadd.xlane.f32.xlu1 %v1676_v54  ;;  %v1679_v14 = vadd.f32 %v3171_v18, %v3169_v33 }
 0x291   : > { %v3175_v40 = vpop.eup %3174  ;;  %v1719_v57 = vpack.c.bf16 %v3173_v20, %v3169_v33 }
 0x292   : > { %1680 = vadd.xlane.f32.xlu0 %v1679_v14  ;;  %v1720_v0 = vpack.c.bf16 %v3175_v40, %v3171_v18  ;;  %v1682_v7 = vadd.f32 %v3175_v40, %v3173_v20 }
 0x294   : > { %1995 = vmatprep.mubr.bf16.mxu1 %v1720_v0  ;;  %1683 = vadd.xlane.f32.xlu1 %v1682_v7 }
 0x296   : > { %v3177_v23 = vpop.eup %3176 }
 0x297   : > { %v3179_v8 = vpop.eup %3178  ;;  %1996 = vmatmul.mubr.bf16.gmra.mrb[48].mxu1 %v1719_v57 }
 0x298   : > { %v3181_v42 = vpop.eup %3180  ;;  %v1685_v1 = vadd.f32 %v3179_v8, %v3177_v23 }
 0x299   : > { %v3183_v44 = vpop.eup %3182  ;;  %v1721_v47 = vpack.c.bf16 %v3181_v42, %v3177_v23 }
 0x29a   : > { %1686 = vadd.xlane.f32.xlu0 %v1685_v1  ;;  %v1722_v13 = vpack.c.bf16 %v3183_v44, %v3179_v8  ;;  %v1688_v27 = vadd.f32 %v3183_v44, %v3181_v42 }
 0x29c   : > { %2003 = vmatprep.mubr.bf16.mxu1 %v1722_v13  ;;  %1689 = vadd.xlane.f32.xlu1 %v1688_v27 }
 0x29f   : > { %2004 = vmatmul.mubr.bf16.gmra.mrb[52].mxu1 %v1721_v47 }
 0x2e3   : > { %v1597_v21 = vpop.xlane.xlu0 %1596 }
 0x2e5   : > { %v3995_v2 = vpop.xlane.xlu1 %1599 }
 0x2eb   : > { %v3997_v22 = vpop.xlane.xlu0 %1602 }
 0x2ed   : > { %v3999_v4 = vpop.xlane.xlu1 %1605 }
 0x2ef   : > { %v1609_v25 = vpop.xlane.xlu0 %1608 }
 0x2f0   : > { %3184 = vrcp.f32 %v1609_v25 }
 0x2f1   : > { %v1612_v31 = vpop.xlane.xlu1 %1611 }
 0x2f2   : > { %3186 = vrcp.f32 %v1612_v31 }
 0x2f3   : > { %v1615_v63 = vpop.xlane.xlu0 %1614 }
 0x2f4   : > { %3188 = vrcp.f32 %v1615_v63 }
 0x2f5   : > { %v1618_v24 = vpop.xlane.xlu1 %1617 }
 0x2f6   : > { %3190 = vrcp.f32 %v1618_v24 }
 0x2f7   : > { %v1621_v37 = vpop.xlane.xlu0 %1620 }
 0x2f8   : > { %3192 = vrcp.f32 %v1621_v37 }
 0x2f9   : > { %v1624_v39 = vpop.xlane.xlu1 %1623 }
 0x2fa   : > { %v3185_v45 = vpop.eup %3184  ;;  %3194 = vrcp.f32 %v1624_v39 }
 0x2fb   : > { %v1627_v15 = vpop.xlane.xlu0 %1626 }
 0x2fc   : > { %v3187_v12 = vpop.eup %3186  ;;  %3196 = vrcp.f32 %v1627_v15 }
 0x2fd   : > { %v1630_v3 = vpop.xlane.xlu1 %1629 }
 0x2fe   : > { %v3189_v49 = vpop.eup %3188  ;;  %3198 = vrcp.f32 %v1630_v3 }
 0x2ff   : > { %v1633_v33 = vpop.xlane.xlu0 %1632 }
 0x300   : > { %v3191_v56 = vpop.eup %3190  ;;  %3200 = vrcp.f32 %v1633_v33 }
 0x301   : > { %v1636_v11 = vpop.xlane.xlu1 %1635 }
 0x302   : > { %v3193_v50 = vpop.eup %3192  ;;  %3202 = vrcp.f32 %v1636_v11 }
 0x303   : > { %3204 = vrcp.f32 %v1597_v21  ;;  %v1639_v59 = vpop.xlane.xlu0 %1638 }
 0x304   : > { %v3195_v54 = vpop.eup %3194  ;;  %3206 = vrcp.f32 %v3995_v2 }
 0x305   : > { %v1642_v44 = vpop.xlane.xlu1 %1641  ;;  %3208 = vrcp.f32 %v1639_v59 }
 0x306   : > { %v3197_v7 = vpop.eup %3196  ;;  %3210 = vrcp.f32 %v1642_v44 }
 0x307   : > { %3212 = vrcp.f32 %v3997_v22  ;;  %v1645_v37 = vpop.xlane.xlu0 %1644 }
 0x308   : > { %v3199_v8 = vpop.eup %3198  ;;  %3214 = vrcp.f32 %v3999_v4 }
 0x309   : > { %v1648_v39 = vpop.xlane.xlu1 %1647  ;;  %3216 = vrcp.f32 %v1645_v37 }
 0x30a   : > { %v2787_v35 = vpop.f32.mrb[0].mxu1  ;;  %v3201_v63 = vpop.eup %3200  ;;  %3218 = vrcp.f32 %v1648_v39 }
 0x30b   : > { %v2788_v34 = vpop.f32.mrb[1].mxu1 }
 0x30c   : > { %v2789_v36 = vadd.f32 %v2788_v34, %v2787_v35  ;;  %v2790_v58 = vpop.f32.mrb[2].mxu1  ;;  %v3203_v34 = vpop.eup %3202 }
 0x30d   : > { %v2791_v26 = vpop.f32.mrb[3].mxu1 }
 0x30e   : > { %v2792_v61 = vadd.f32 %v2791_v26, %v2790_v58  ;;  %v4001_v5 = vmul.f32 %v3185_v45, %v2789_v36  ;;  %v3205_v58 = vpop.eup %3204 }
 0x310   : > { %v4003_v29 = vmul.f32 %v3187_v12, %v2792_v61  ;;  %v3207_v12 = vpop.eup %3206 }
 0x311   : > { %v3209_v3 = vpop.eup %3208 }
 0x312   : > { %v2793_v41 = vpop.f32.mrb[4].mxu1  ;;  %v2078_v43 = vpack.c.bf16 %v4003_v29, %v4001_v5 }
 0x313   : > { %v2794_v60 = vpop.f32.mrb[5].mxu1 }
 0x314   : > { %v2795_v46 = vadd.f32 %v2794_v60, %v2793_v41  ;;  %v2796_v55 = vpop.f32.mrb[6].mxu1 }
 0x315   : > { %v2797_v62 = vpop.f32.mrb[7].mxu1 }
 0x316   : > { %v2798_v51 = vadd.f32 %v2797_v62, %v2796_v55  ;;  %v4007_v28 = vmul.f32 %v3189_v49, %v2795_v46 }
 0x318   : > { %v4009_v10 = vmul.f32 %v3191_v56, %v2798_v51 }
 0x31a   : > { %v2799_v6 = vpop.f32.mrb[8].mxu1  ;;  %v2079_v9 = vpack.c.bf16 %v4009_v10, %v4007_v28 }
 0x31b   : > { %v2800_v30 = vpop.f32.mrb[9].mxu1 }
 0x31c   : > { %v2801_v52 = vadd.f32 %v2800_v30, %v2799_v6  ;;  %v2802_v48 = vpop.f32.mrb[10].mxu1 }
 0x31d   : > { %v2803_v17 = vpop.f32.mrb[11].mxu1 }
 0x31e   : > { %v2804_v38 = vadd.f32 %v2803_v17, %v2802_v48  ;;  %v4013_v32 = vmul.f32 %v3193_v50, %v2801_v52  ;;  %v3211_v48 = vpop.eup %3210 }
 0x31f   : > { %v3213_v50 = vpop.eup %3212 }
 0x320   : > { %v4015_v53 = vmul.f32 %v3195_v54, %v2804_v38  ;;  %v3215_v11 = vpop.eup %3214 }
 0x322   : > { %v2805_v18 = vpop.f32.mrb[12].mxu1  ;;  %v2080_v20 = vpack.c.bf16 %v4015_v53, %v4013_v32 }
 0x323   : > { %v2806_v14 = vpop.f32.mrb[13].mxu1 }
 0x324   : > { %v2807_v40 = vadd.f32 %v2806_v14, %v2805_v18  ;;  %v2808_v57 = vpop.f32.mrb[14].mxu1  ;;  %v1651_v18 = vpop.xlane.xlu0 %1650 }
 0x325   : > { %v2809_v0 = vpop.f32.mrb[15].mxu1  ;;  %v1654_v14 = vpop.xlane.xlu1 %1653  ;;  %3220 = vrcp.f32 %v1651_v18 }
 0x326   : > { %v2810_v23 = vadd.f32 %v2809_v0, %v2808_v57  ;;  %v4020_v42 = vmul.f32 %v3197_v7, %v2807_v40  ;;  %3222 = vrcp.f32 %v1654_v14 }
 0x328   : > { %v4022_v1 = vmul.f32 %v3199_v8, %v2810_v23 }
 0x32a   : > { %v2811_v47 = vpop.f32.mrb[16].mxu1  ;;  %v2081_v13 = vpack.c.bf16 %v4022_v1, %v4020_v42 }
 0x32b   : > { %v2812_v27 = vpop.f32.mrb[17].mxu1 }
 0x32c   : > { %v2813_v19 = vadd.f32 %v2812_v27, %v2811_v47  ;;  %v2775_v16 = vpop.f32.mrb[64].mxu0  ;;  %v2814_v25 = vpop.f32.mrb[18].mxu1 }
 0x32d   : > { %v2776_v21 = vpop.f32.mrb[65].mxu0  ;;  %v2815_v31 = vpop.f32.mrb[19].mxu1 }
 0x32e   : > { %v2777_v2 = vadd.f32 %v2776_v21, %v2775_v16  ;;  %v2816_v24 = vadd.f32 %v2815_v31, %v2814_v25  ;;  %v2778_v35 = vpop.f32.mrb[66].mxu0  ;;  %v4028_v26 = vmul.f32 %v3201_v63, %v2813_v19  ;;  %v3217_v27 = vpop.eup %3216 }
 0x32f   : > { %v2779_v36 = vpop.f32.mrb[67].mxu0  ;;  %v3219_v16 = vpop.eup %3218 }
 0x330   : > { %v4030_v45 = vmul.f32 %v3203_v34, %v2816_v24  ;;  %v2780_v61 = vadd.f32 %v2779_v36, %v2778_v35  ;;  %v2044_v41 = vmul.f32 %v3205_v58, %v2777_v2  ;;  %v1657_v31 = vpop.xlane.xlu0 %1656  ;;  %v1660_v63 = vpop.xlane.xlu1 %1659 }
 0x331   : > { %3224 = vrcp.f32 %v1657_v31 }
 0x332   : > { %v2045_v60 = vmul.f32 %v3207_v12, %v2780_v61  ;;  %v2817_v46 = vpop.f32.mrb[20].mxu1  ;;  %v2082_v22 = vpack.c.bf16 %v4030_v45, %v4028_v26  ;;  %3226 = vrcp.f32 %v1660_v63  ;;  %v3221_v61 = vpop.eup %3220 }
 0x333   : > { %v2818_v55 = vpop.f32.mrb[21].mxu1  ;;  %v3223_v5 = vpop.eup %3222 }
 0x334   : > { %v2819_v62 = vadd.f32 %v2818_v55, %v2817_v46  ;;  %v2781_v4 = vpop.f32.mrb[68].mxu0  ;;  %v2820_v49 = vpop.f32.mrb[22].mxu1  ;;  %v2076_v51 = vpack.c.bf16 %v2045_v60, %v2044_v41 }
 0x335   : > { %v2782_v56 = vpop.f32.mrb[69].mxu0  ;;  %v2821_v15 = vpop.f32.mrb[23].mxu1 }
 0x336   : > { %v2783_v6 = vadd.f32 %v2782_v56, %v2781_v4  ;;  %v2822_v30 = vadd.f32 %v2821_v15, %v2820_v49  ;;  %v2784_v52 = vpop.f32.mrb[70].mxu0  ;;  %2911 = vmatprep.mubr.bf16.mxu1 %v2076_v51  ;;  %v4034_v38 = vmul.f32 %v3209_v3, %v2819_v62  ;;  %v1663_v37 = vpop.xlane.xlu0 %1662 }
 0x337   : > { %v2785_v17 = vpop.f32.mrb[71].mxu0  ;;  %v1666_v39 = vpop.xlane.xlu1 %1665  ;;  %3228 = vrcp.f32 %v1663_v37 }
 0x338   : > { %v4036_v54 = vmul.f32 %v3211_v48, %v2822_v30  ;;  %v2786_v33 = vadd.f32 %v2785_v17, %v2784_v52  ;;  %v2046_v40 = vmul.f32 %v3213_v50, %v2783_v6  ;;  %3230 = vrcp.f32 %v1666_v39 }
 0x33a   : > { %v2047_v57 = vmul.f32 %v3215_v11, %v2786_v33  ;;  %v2823_v0 = vpop.f32.mrb[24].mxu1  ;;  %v2083_v7 = vpack.c.bf16 %v4036_v54, %v4034_v38  ;;  %v1669_v53 = vpop.xlane.xlu0 %1668 }
 0x33b   : > { %v2824_v23 = vpop.f32.mrb[25].mxu1  ;;  %v3225_v49 = vpop.eup %3224  ;;  %3232 = vrcp.f32 %v1669_v53  ;;  %v4070_v53 = vld [vmem:[%s4264_s5] ss:$0 sm:$0xff] }
 0x33c   : > { %v2077_v8 = vpack.c.bf16 %v2047_v57, %v2046_v40  ;;  %v2825_v59 = vadd.f32 %v2824_v23, %v2823_v0  ;;  %v2826_v44 = vpop.f32.mrb[26].mxu1  ;;  %v3227_v10 = vpop.eup %3226 }
 0x33d   : > { %v2827_v47 = vpop.f32.mrb[27].mxu1 }
 0x33e   : > { %v2828_v19 = vadd.f32 %v2827_v47, %v2826_v44  ;;  %2912 = vmatmul.mubr.bf16.vlgmr.msra.gmra.mrb[56].mxu1 %v2077_v8  ;;  %v2060_v25 = vmul.f32 %v3217_v27, %v2825_v59  ;;  %v1675_v45 = vpop.xlane.xlu0 %1674 }
 0x33f   : > { %2915 = vmatprep.mubr.bf16.mxu1 %v2078_v43 }
 0x340   : > { %v2061_v21 = vmul.f32 %v3219_v16, %v2828_v19 }
 0x341   : > { %v3229_v52 = vpop.eup %3228 }
 0x342   : > { %v2829_v2 = vpop.f32.mrb[28].mxu1  ;;  %v2084_v24 = vpack.c.bf16 %v2061_v21, %v2060_v25  ;;  %v3231_v1 = vpop.eup %3230 }
 0x343   : > { %v2830_v35 = vpop.f32.mrb[29].mxu1  ;;  %v1681_v0 = vpop.xlane.xlu0 %1680 }
 0x344   : > { %v2831_v34 = vadd.f32 %v2830_v35, %v2829_v2  ;;  %v2832_v36 = vpop.f32.mrb[30].mxu1 }
 0x345   : > { %v2833_v58 = vpop.f32.mrb[31].mxu1  ;;  %v3233_v11 = vpop.eup %3232 }
 0x346   : > { %v2834_v12 = vadd.f32 %v2833_v58, %v2832_v36  ;;  %2916 = vmatmul.mubr.bf16.gmra.mrb[60].mxu1 %v2079_v9  ;;  %v2062_v29 = vmul.f32 %v3221_v61, %v2831_v34 }
 0x347   : > { %2919 = vmatprep.mubr.bf16.mxu1 %v2080_v20  ;;  %v1672_v20 = vpop.xlane.xlu1 %1671  ;;  %v1687_v63 = vpop.xlane.xlu0 %1686 }
 0x348   : > { %v2063_v43 = vmul.f32 %v3223_v5, %v2834_v12  ;;  %3234 = vrcp.f32 %v1672_v20  ;;  %v2326_v20 = vld [vmem:[%s4065_s16 + $0x10] sm:$0xff] }
 0x349   : > { %3236 = vrcp.f32 %v1675_v45  ;;  %v4088_v45 = vld [vmem:[%s4065_s16 + $0x48] sm:$0xff] }
 0x34a   : > { %v2835_v41 = vpop.f32.mrb[32].mxu1  ;;  %v2085_v60 = vpack.c.bf16 %v2063_v43, %v2062_v29 }
 0x34b   : > { %v2836_v46 = vpop.f32.mrb[33].mxu1 }
 0x34c   : > { %v2837_v55 = vadd.f32 %v2836_v46, %v2835_v41  ;;  %v2838_v62 = vpop.f32.mrb[34].mxu1 }
 0x34d   : > { %v2839_v4 = vpop.f32.mrb[35].mxu1 }
 0x34e   : > { %v2840_v28 = vadd.f32 %v2839_v4, %v2838_v62  ;;  %2920 = vmatmul.mubr.bf16.gmra.mrb[64].mxu1 %v2081_v13  ;;  %v2064_v9 = vmul.f32 %v3225_v49, %v2837_v55 }
 0x34f   : > { %2923 = vmatprep.mubr.bf16.mxu1 %v2082_v22  ;;  %v1678_v22 = vpop.xlane.xlu1 %1677 }
 0x350   : > { %v2065_v32 = vmul.f32 %v3227_v10, %v2840_v28  ;;  %3238 = vrcp.f32 %v1678_v22  ;;  %v4091_v22 = vld [vmem:[%s4065_s16 + $0x70] sm:$0xff] }
 0x351   : > { %3240 = vrcp.f32 %v1681_v0  ;;  %v4127_v0 = vld [vmem:[%s4065_s16 + $0xd0] sm:$0xff] }
 0x352   : > { %v2841_v51 = vpop.f32.mrb[36].mxu1  ;;  %v2086_v56 = vpack.c.bf16 %v2065_v32, %v2064_v9  ;;  %v3235_v14 = vpop.eup %3234 }
 0x353   : > { %v2842_v15 = vpop.f32.mrb[37].mxu1  ;;  %v3237_v19 = vpop.eup %3236 }
 0x354   : > { %v2843_v3 = vadd.f32 %v2842_v15, %v2841_v51  ;;  %v2844_v6 = vpop.f32.mrb[38].mxu1  ;;  %v2324_v51 = vld [vmem:[%s4065_s16] sm:$0xff]  ;;  %v2327_v15 = vld [vmem:[%s4065_s16 + $0x18] sm:$0xff] }
 0x355   : > { %v2845_v30 = vpop.f32.mrb[39].mxu1 }
 0x356   : > { %v2846_v42 = vadd.f32 %v2845_v30, %v2844_v6  ;;  %2924 = vmatmul.mubr.bf16.gmra.mrb[68].mxu1 %v2083_v7  ;;  %v2066_v13 = vmul.f32 %v3229_v52, %v2843_v3  ;;  %v1684_v7 = vpop.xlane.xlu1 %1683  ;;  %v2325_v3 = vld [vmem:[%s4065_s16 + $0x8] sm:$0xff]  ;;  %v2330_v6 = vld [vmem:[%s4065_s16 + $0x30] sm:$0xff]  ;;  %v2328_v30 = vld [vmem:[%s4065_s16 + $0x20] sm:$0xff] }
 0x357   : > { %2927 = vmatprep.mubr.bf16.mxu1 %v2084_v24  ;;  %3242 = vrcp.f32 %v1684_v7  ;;  %v2331_v52 = vld [vmem:[%s4065_s16 + $0x38] sm:$0xff]  ;;  %v4130_v7 = vld [vmem:[%s4065_s16 + $0xc0] sm:$0xff] }
 0x358   : > { %v2067_v26 = vmul.f32 %v3231_v1, %v2846_v42  ;;  %3244 = vrcp.f32 %v1687_v63  ;;  %v2329_v42 = vld [vmem:[%s4065_s16 + $0x28] sm:$0xff]  ;;  %v2334_v1 = vld [vmem:[%s4065_s16 + $0x50] sm:$0xff] }
 0x35a   : > { %v2847_v48 = vpop.f32.mrb[40].mxu1  ;;  %v2087_v17 = vpack.c.bf16 %v2067_v26, %v2066_v13  ;;  %v3239_v25 = vpop.eup %3238  ;;  %v4082_v13 = vld [vmem:[%s4065_s16 + $0x40] sm:$0xff]  ;;  %v4085_v26 = vld [vmem:[%s4065_s16 + $0x58] sm:$0xff] }
 0x35b   : > { %v2848_v50 = vpop.f32.mrb[41].mxu1  ;;  %v1690_v2 = vpop.xlane.xlu1 %1689 }
 0x35c   : > { %v2849_v38 = vadd.f32 %v2848_v50, %v2847_v48  ;;  %v2850_v54 = vpop.f32.mrb[42].mxu1  ;;  %3246 = vrcp.f32 %v1690_v2  ;;  %v3241_v12 = vpop.eup %3240  ;;  %v4094_v48 = vld [vmem:[%s4065_s16 + $0x60] sm:$0xff]  ;;  %v4100_v50 = vld [vmem:[%s4065_s16 + $0x68] sm:$0xff] }
 0x35d   : > { %v2851_v33 = vpop.f32.mrb[43].mxu1 }
 0x35e   : > { %v2852_v18 = vadd.f32 %v2851_v33, %v2850_v54  ;;  %2928 = vmatmul.mubr.bf16.gmra.mrb[72].mxu1 %v2085_v60  ;;  %v2068_v40 = vmul.f32 %v3233_v11, %v2849_v38  ;;  %v4103_v38 = vld [vmem:[%s4065_s16 + $0x90] sm:$0xff]  ;;  %v4106_v54 = vld [vmem:[%s4065_s16 + $0x80] sm:$0xff]  ;;  %v4109_v33 = vld [vmem:[%s4065_s16 + $0x98] sm:$0xff] }
 0x35f   : > { %2931 = vmatprep.mubr.bf16.mxu1 %v2086_v56  ;;  %v4112_v11 = vld [vmem:[%s4065_s16 + $0x88] sm:$0xff] }
 0x360   : > { %v2069_v57 = vmul.f32 %v3235_v14, %v2852_v18  ;;  %v4115_v18 = vld [vmem:[%s4065_s16 + $0xb0] sm:$0xff]  ;;  %v4118_v14 = vld [vmem:[%s4065_s16 + $0xa0] sm:$0xff] }
 0x361   : > { %v3243_v29 = vpop.eup %3242 }
 0x362   : > { %v2853_v23 = vpop.f32.mrb[44].mxu1  ;;  %v2088_v8 = vpack.c.bf16 %v2069_v57, %v2068_v40  ;;  %v3245_v4 = vpop.eup %3244  ;;  %v4121_v40 = vld [vmem:[%s4065_s16 + $0xb8] sm:$0xff]  ;;  %v4124_v57 = vld [vmem:[%s4065_s16 + $0xa8] sm:$0xff] }
 0x363   : > { %v2854_v59 = vpop.f32.mrb[45].mxu1 }
 0x364   : > { %v2855_v44 = vadd.f32 %v2854_v59, %v2853_v23  ;;  %v2856_v47 = vpop.f32.mrb[46].mxu1  ;;  %v4134_v59 = vld [vmem:[%s4065_s16 + $0xd8] sm:$0xff] }
 0x365   : > { %v2857_v27 = vpop.f32.mrb[47].mxu1 }
 0x366   : > { %v2858_v16 = vadd.f32 %v2857_v27, %v2856_v47  ;;  %2932 = vmatmul.mubr.bf16.gmra.mrb[76].mxu1 %v2087_v17  ;;  %v2070_v21 = vmul.f32 %v3237_v19, %v2855_v44  ;;  %v3247_v28 = vpop.eup %3246  ;;  %v4097_v17 = vld [vmem:[%s4065_s16 + $0x78] sm:$0xff]  ;;  %v4137_v44 = vld [vmem:[%s4065_s16 + $0xc8] sm:$0xff]  ;;  %v4140_v47 = vld [vmem:[%s4065_s16 + $0xf0] sm:$0xff] }
 0x367   : > { %2935 = vmatprep.mubr.bf16.mxu1 %v2088_v8 }
 0x368   : > { %v2071_v31 = vmul.f32 %v3239_v25, %v2858_v16  ;;  %v4151_v16 = vld [vmem:[%s4065_s16 + $0xe0] sm:$0xff]  ;;  %v4154_v25 = vld [vmem:[%s4065_s16 + $0xf8] sm:$0xff] }
 0x36a   : > { %v2859_v24 = vpop.f32.mrb[48].mxu1  ;;  %v2089_v35 = vpack.c.bf16 %v2071_v31, %v2070_v21  ;;  %v4157_v21 = vld [vmem:[%s4065_s16 + $0xe8] sm:$0xff] }
 0x36b   : > { %v2860_v34 = vpop.f32.mrb[49].mxu1 }
 0x36c   : > { %v2861_v36 = vadd.f32 %v2860_v34, %v2859_v24  ;;  %v2862_v58 = vpop.f32.mrb[50].mxu1 }
 0x36d   : > { %v2863_v61 = vpop.f32.mrb[51].mxu1 }
 0x36e   : > { %v2864_v5 = vadd.f32 %v2863_v61, %v2862_v58  ;;  %2936 = vmatmul.mubr.bf16.gmra.mrb[80].mxu1 %v2089_v35  ;;  %v2072_v43 = vmul.f32 %v3241_v12, %v2861_v36 }
 0x370   : > { %v2073_v37 = vmul.f32 %v3243_v29, %v2864_v5 }
 0x372   : > { %v2865_v39 = vpop.f32.mrb[52].mxu1  ;;  %v2090_v41 = vpack.c.bf16 %v2073_v37, %v2072_v43 }
 0x373   : > { %v2866_v60 = vpop.f32.mrb[53].mxu1 }
 0x374   : > { %v2867_v46 = vadd.f32 %v2866_v60, %v2865_v39  ;;  %v2868_v55 = vpop.f32.mrb[54].mxu1  ;;  %2939 = vmatprep.mubr.bf16.mxu1 %v2090_v41 }
 0x375   : > { %v2869_v62 = vpop.f32.mrb[55].mxu1 }
 0x376   : > { %v2870_v49 = vadd.f32 %v2869_v62, %v2868_v55  ;;  %v2074_v10 = vmul.f32 %v3245_v4, %v2867_v46 }
 0x378   : > { %v2075_v9 = vmul.f32 %v3247_v28, %v2870_v49 }
 0x37a   : > { %v2091_v32 = vpack.c.bf16 %v2075_v9, %v2074_v10 }
 0x37c   : > { %2940 = vmatmul.mubr.bf16.gmra.mrb[84].mxu1 %v2091_v32 }
 0x411   : > { %v2913_v56 = vpop.f32.mrb[56].mxu1 }
 0x412   : > { %v2206_v23 = vadd.f32 %v2913_v56, %v4070_v53  ;;  %v2197_v8 = vpop.f32.mrb[57].mxu1 }
 0x413   : > { %v2198_v27 = vadd.f32 %v4070_v53, %v2197_v8  ;;  %v2914_v19 = vpop.f32.mrb[58].mxu1 }
 0x414   : > { %v2358_v31 = vadd.f32 %v2326_v20, %v2206_v23  ;;  %v2209_v63 = vadd.f32 %v2914_v19, %v4070_v53  ;;  %v2200_v2 = vpop.f32.mrb[59].mxu1 }
 0x415   : > { %v2356_v24 = vadd.f32 %v2324_v51, %v2198_v27  ;;  %v2201_v35 = vadd.f32 %v4070_v53, %v2200_v2 }
 0x416   : > { %v2359_v34 = vadd.f32 %v2327_v15, %v2209_v63  ;;  %2390 = vst [vmem:[%s4147_s28 + $0x10] sm:$0xff] %v2358_v31 }
 0x417   : > { %v2357_v36 = vadd.f32 %v2325_v3, %v2201_v35  ;;  %2388 = vst [vmem:[%s4147_s28] sm:$0xff] %v2356_v24 }
 0x418   : > { %2391 = vst [vmem:[%s4147_s28 + $0x18] sm:$0xff] %v2359_v34 }
 0x419   : > { %v2917_v58 = vpop.f32.mrb[60].mxu1  ;;  %2389 = vst [vmem:[%s4147_s28 + $0x8] sm:$0xff] %v2357_v36 }
 0x41a   : > { %v2222_v61 = vadd.f32 %v2917_v58, %v4070_v53  ;;  %v2213_v12 = vpop.f32.mrb[61].mxu1 }
 0x41b   : > { %v2214_v5 = vadd.f32 %v4070_v53, %v2213_v12  ;;  %v2918_v29 = vpop.f32.mrb[62].mxu1 }
 0x41c   : > { %v2362_v43 = vadd.f32 %v2330_v6, %v2222_v61  ;;  %v2225_v37 = vadd.f32 %v2918_v29, %v4070_v53  ;;  %v2216_v39 = vpop.f32.mrb[63].mxu1 }
 0x41d   : > { %v2360_v41 = vadd.f32 %v2328_v30, %v2214_v5  ;;  %v2217_v60 = vadd.f32 %v4070_v53, %v2216_v39 }
 0x41e   : > { %v2363_v46 = vadd.f32 %v2331_v52, %v2225_v37  ;;  %2394 = vst [vmem:[%s4147_s28 + $0x30] sm:$0xff] %v2362_v43 }
 0x41f   : > { %v2361_v55 = vadd.f32 %v2329_v42, %v2217_v60  ;;  %2392 = vst [vmem:[%s4147_s28 + $0x20] sm:$0xff] %v2360_v41 }
 0x420   : > { %2395 = vst [vmem:[%s4147_s28 + $0x38] sm:$0xff] %v2363_v46 }
 0x421   : > { %v2921_v62 = vpop.f32.mrb[64].mxu1  ;;  %2393 = vst [vmem:[%s4147_s28 + $0x28] sm:$0xff] %v2361_v55 }
 0x422   : > { %v2238_v4 = vadd.f32 %v2921_v62, %v4070_v53  ;;  %v2229_v49 = vpop.f32.mrb[65].mxu1 }
 0x423   : > { %v2230_v28 = vadd.f32 %v4070_v53, %v2229_v49  ;;  %v2922_v10 = vpop.f32.mrb[66].mxu1 }
 0x424   : > { %v2366_v9 = vadd.f32 %v2334_v1, %v2238_v4  ;;  %v2241_v32 = vadd.f32 %v2922_v10, %v4070_v53  ;;  %v2232_v20 = vpop.f32.mrb[67].mxu1 }
 0x425   : > { %v2364_v51 = vadd.f32 %v4082_v13, %v2230_v28  ;;  %v2233_v56 = vadd.f32 %v4070_v53, %v2232_v20 }
 0x426   : > { %v2367_v15 = vadd.f32 %v4085_v26, %v2241_v32  ;;  %2398 = vst [vmem:[%s4147_s28 + $0x50] sm:$0xff] %v2366_v9 }
 0x427   : > { %v2365_v3 = vadd.f32 %v4088_v45, %v2233_v56  ;;  %2396 = vst [vmem:[%s4147_s28 + $0x40] sm:$0xff] %v2364_v51 }
 0x428   : > { %2399 = vst [vmem:[%s4147_s28 + $0x58] sm:$0xff] %v2367_v15 }
 0x429   : > { %v2925_v6 = vpop.f32.mrb[68].mxu1  ;;  %2397 = vst [vmem:[%s4147_s28 + $0x48] sm:$0xff] %v2365_v3 }
 0x42a   : > { %v2254_v30 = vadd.f32 %v2925_v6, %v4070_v53  ;;  %v2245_v52 = vpop.f32.mrb[69].mxu1 }
 0x42b   : > { %v2246_v42 = vadd.f32 %v4070_v53, %v2245_v52  ;;  %v2926_v1 = vpop.f32.mrb[70].mxu1 }
 0x42c   : > { %v2370_v13 = vadd.f32 %v4091_v22, %v2254_v30  ;;  %v2257_v26 = vadd.f32 %v2926_v1, %v4070_v53  ;;  %v2248_v23 = vpop.f32.mrb[71].mxu1 }
 0x42d   : > { %v2368_v45 = vadd.f32 %v4094_v48, %v2246_v42  ;;  %v2249_v8 = vadd.f32 %v4070_v53, %v2248_v23 }
 0x42e   : > { %v2371_v27 = vadd.f32 %v4097_v17, %v2257_v26  ;;  %2402 = vst [vmem:[%s4147_s28 + $0x70] sm:$0xff] %v2370_v13 }
 0x42f   : > { %v2369_v19 = vadd.f32 %v4100_v50, %v2249_v8  ;;  %2400 = vst [vmem:[%s4147_s28 + $0x60] sm:$0xff] %v2368_v45 }
 0x430   : > { %2403 = vst [vmem:[%s4147_s28 + $0x78] sm:$0xff] %v2371_v27 }
 0x431   : > { %v2929_v31 = vpop.f32.mrb[72].mxu1  ;;  %2401 = vst [vmem:[%s4147_s28 + $0x68] sm:$0xff] %v2369_v19 }
 0x432   : > { %v2270_v22 = vadd.f32 %v2929_v31, %v4070_v53  ;;  %v2261_v63 = vpop.f32.mrb[73].mxu1 }
 0x433   : > { %v2262_v48 = vadd.f32 %v4070_v53, %v2261_v63  ;;  %v2930_v2 = vpop.f32.mrb[74].mxu1 }
 0x434   : > { %v2374_v24 = vadd.f32 %v4103_v38, %v2270_v22  ;;  %v2273_v17 = vadd.f32 %v2930_v2, %v4070_v53  ;;  %v2264_v35 = vpop.f32.mrb[75].mxu1 }
 0x435   : > { %v2372_v50 = vadd.f32 %v4106_v54, %v2262_v48  ;;  %v2265_v34 = vadd.f32 %v4070_v53, %v2264_v35 }
 0x436   : > { %v2375_v36 = vadd.f32 %v4109_v33, %v2273_v17  ;;  %2406 = vst [vmem:[%s4147_s28 + $0x90] sm:$0xff] %v2374_v24 }
 0x437   : > { %v2373_v58 = vadd.f32 %v4112_v11, %v2265_v34  ;;  %2404 = vst [vmem:[%s4147_s28 + $0x80] sm:$0xff] %v2372_v50 }
 0x438   : > { %2407 = vst [vmem:[%s4147_s28 + $0x98] sm:$0xff] %v2375_v36 }
 0x439   : > { %v2933_v61 = vpop.f32.mrb[76].mxu1  ;;  %2405 = vst [vmem:[%s4147_s28 + $0x88] sm:$0xff] %v2373_v58 }
 0x43a   : > { %v2286_v38 = vadd.f32 %v2933_v61, %v4070_v53  ;;  %v2277_v12 = vpop.f32.mrb[77].mxu1 }
 0x43b   : > { %v2278_v54 = vadd.f32 %v4070_v53, %v2277_v12  ;;  %v2934_v5 = vpop.f32.mrb[78].mxu1 }
 0x43c   : > { %v2378_v29 = vadd.f32 %v4115_v18, %v2286_v38  ;;  %v2289_v33 = vadd.f32 %v2934_v5, %v4070_v53  ;;  %v2280_v43 = vpop.f32.mrb[79].mxu1 }
 0x43d   : > { %v2376_v11 = vadd.f32 %v4118_v14, %v2278_v54  ;;  %v2281_v37 = vadd.f32 %v4070_v53, %v2280_v43 }
 0x43e   : > { %v2379_v39 = vadd.f32 %v4121_v40, %v2289_v33  ;;  %2410 = vst [vmem:[%s4147_s28 + $0xb0] sm:$0xff] %v2378_v29 }
 0x43f   : > { %v2377_v41 = vadd.f32 %v4124_v57, %v2281_v37  ;;  %2408 = vst [vmem:[%s4147_s28 + $0xa0] sm:$0xff] %v2376_v11 }
 0x440   : > { %2411 = vst [vmem:[%s4147_s28 + $0xb8] sm:$0xff] %v2379_v39 }
 0x441   : > { %v2937_v60 = vpop.f32.mrb[80].mxu1  ;;  %2409 = vst [vmem:[%s4147_s28 + $0xa8] sm:$0xff] %v2377_v41 }
 0x442   : > { %v2302_v18 = vadd.f32 %v2937_v60, %v4070_v53  ;;  %v2293_v46 = vpop.f32.mrb[81].mxu1 }
 0x443   : > { %v2294_v14 = vadd.f32 %v4070_v53, %v2293_v46  ;;  %v2938_v55 = vpop.f32.mrb[82].mxu1 }
 0x444   : > { %v2382_v62 = vadd.f32 %v4127_v0, %v2302_v18  ;;  %v2305_v40 = vadd.f32 %v2938_v55, %v4070_v53  ;;  %v2296_v4 = vpop.f32.mrb[83].mxu1 }
 0x445   : > { %v2380_v57 = vadd.f32 %v4130_v7, %v2294_v14  ;;  %v2297_v49 = vadd.f32 %v4070_v53, %v2296_v4 }
 0x446   : > { %v2383_v28 = vadd.f32 %v4134_v59, %v2305_v40  ;;  %2414 = vst [vmem:[%s4147_s28 + $0xd0] sm:$0xff] %v2382_v62 }
 0x447   : > { %v2381_v10 = vadd.f32 %v4137_v44, %v2297_v49  ;;  %2412 = vst [vmem:[%s4147_s28 + $0xc0] sm:$0xff] %v2380_v57 }
 0x448   : > { %2415 = vst [vmem:[%s4147_s28 + $0xd8] sm:$0xff] %v2383_v28 }
 0x449   : > { %2413 = vst [vmem:[%s4147_s28 + $0xc8] sm:$0xff] %v2381_v10 }
 0x44f   : > { %v2941_v0 = vpop.f32.mrb[84].mxu1 }
 0x450   : > { %v2318_v9 = vadd.f32 %v2941_v0, %v4070_v53  ;;  %v2309_v32 = vpop.f32.mrb[85].mxu1 }
 0x451   : > { %v2310_v7 = vadd.f32 %v4070_v53, %v2309_v32  ;;  %v2942_v20 = vpop.f32.mrb[86].mxu1 }
 0x452   : > { %v2386_v51 = vadd.f32 %v4140_v47, %v2318_v9  ;;  %v2321_v59 = vadd.f32 %v2942_v20, %v4070_v53  ;;  %v2312_v56 = vpop.f32.mrb[87].mxu1 }
 0x453   : > { %v2384_v44 = vadd.f32 %v4151_v16, %v2310_v7  ;;  %v2313_v15 = vadd.f32 %v4070_v53, %v2312_v56 }
 0x454   : > { %v2387_v3 = vadd.f32 %v4154_v25, %v2321_v59  ;;  %2418 = vst [vmem:[%s4147_s28 + $0xf0] sm:$0xff] %v2386_v51 }
 0x455   : > { %v2385_v6 = vadd.f32 %v4157_v21, %v2313_v15  ;;  %2416 = vst [vmem:[%s4147_s28 + $0xe0] sm:$0xff] %v2384_v44 }
 0x456   : > { %2419 = vst [vmem:[%s4147_s28 + $0xf8] sm:$0xff] %v2387_v3 }
 0x457   : > { %2417 = vst [vmem:[%s4147_s28 + $0xe8] sm:$0xff] %v2385_v6 }
 0x458 PF: > { %s16_s25 = sadd.s32 1, %s3286_s25   ;;  %s4306_s21 = smov %s3274_s22 }
 0x459   : > { %p13_p10 = scmp.ge.s32.totalorder %s16_s25, 4   ;;  %s4307_s22 = smov %s3362_s30 }
 0x45a   : > { %s4308_s23 = smov %s3282_s24  ;;  %s4309_s24 = smov %s4311_s26 }
 0x45b   :  { %15 = sbr.rel (!%p13_p10) target bundleno = 3 (0x3), region = 221 }

</bundles_post_ra>
